<compile_context>
chip_gen: v5e
topology: v5e:2x2
jax: 0.10.0
libtpu: 0.0.40
codegen_flags: <defaults>
</compile_context>

<pallas_src>
import jax
import jax.numpy as jnp
import numpy as np
from jax.experimental import pallas as pl
from jax.experimental.pallas import tpu as pltpu


def bidaf_output_kernel(att_ref, mod_ref, mask_ref,
                        projw_ref, wm2_ref,
                        wih_ref, whh_ref, lstmb_ref, bias_ref,
                        logp1_ref, logp2_ref,
                        gxf_ref, gxb_ref, houtf_ref, houtb_ref):
    Bb, L, D = att_ref.shape
    H = D // 2
    G = 4 * H

    att = att_ref[...]                       # (Bb, L, D) f32
    mod = mod_ref[...]                       # (Bb, L, D) f32
    mask = mask_ref[...]                     # (Bb, L) in {0, 1}, f32

    wa1 = projw_ref[0:1, :]                  # (1, D)
    wm1 = projw_ref[1:2, :]                  # (1, D)
    wa2 = projw_ref[2:3, :]                  # (1, D)
    wm2f = wm2_ref[0:1, :].reshape(1, 1, H)  # mod_linear_2, fwd half
    wm2b = wm2_ref[1:2, :].reshape(1, 1, H)  # mod_linear_2, bwd half
    whh = whh_ref[...]                       # (2H, 8H) bf16, block-diagonal fused
    b1 = bias_ref[:, 0:1]                    # (1, 1)
    b2 = bias_ref[:, 1:2]                    # (1, 1)

    # ---- fused att/mod linear projections (one VPU pass each) ----
    logits_1 = (jnp.sum(att * wa1, axis=-1)
                + jnp.sum(mod * wm1, axis=-1) + b1)           # (Bb, L)
    l2_att = jnp.sum(att * wa2, axis=-1)                      # (Bb, L)

    # ---- hoisted LSTM input projection: ONE fused bf16 MXU matmul ----
    # (fwd + bwd W_ih concatenated to (D, 8H)), biases folded in once.
    x2d = mod.reshape(Bb * L, D).astype(wih_ref.dtype)        # batch-major flatten
    gx = (jnp.dot(x2d, wih_ref[...], preferred_element_type=jnp.float32)
          + lstmb_ref[...])                                   # (Bb*L, 8H) f32
    # One-time relayout to time-major (single swapaxes, no per-b staging loop)
    # so the recurrence does cheap full-tile leading-axis reads gx*_ref[t].
    gx_tm = jnp.swapaxes(gx.reshape(Bb, L, 2 * G), 0, 1)      # (L, Bb, 8H)
    gxf_ref[...] = gx_tm[:, :, :G].astype(gxf_ref.dtype)      # bf16 scratch
    gxb_ref[...] = gx_tm[:, :, G:].astype(gxb_ref.dtype)

    lengths = jnp.sum(mask, axis=-1, keepdims=True).astype(jnp.int32)   # (Bb, 1)

    def gates_to_hc(g, c):
        # PyTorch LSTM gate order (i, f, g, o); nonlinearities / state in f32.
        i = jax.nn.sigmoid(g[:, 0:H])
        f = jax.nn.sigmoid(g[:, H:2 * H])
        gg = jnp.tanh(g[:, 2 * H:3 * H])
        o = jax.nn.sigmoid(g[:, 3 * H:4 * H])
        c_new = f * c + i * gg
        return o * jnp.tanh(c_new), c_new

    def step(s, carry):
        hf, cf, hb, cb = carry                                # (Bb, H) f32, in vregs
        tb = L - 1 - s
        # Single fused recurrence matmul: [hf | hb] @ blockdiag(Whh_f, Whh_b).
        h_cat = jnp.concatenate([hf, hb], axis=-1).astype(whh.dtype)   # (Bb, 2H) bf16
        g = jnp.dot(h_cat, whh, preferred_element_type=jnp.float32)    # (Bb, 8H) f32
        gf = g[:, :G] + gxf_ref[s]          # forward direction, time s
        gb = g[:, G:] + gxb_ref[tb]         # backward direction, time L-1-s
        hf_new, cf_new = gates_to_hc(gf, cf)
        hb_new, cb_new = gates_to_hc(gb, cb)
        valid_f = s < lengths               # (Bb, 1) pack_padded gating
        valid_b = tb < lengths
        # Time-major hidden-state stash; mod_linear_2 is applied after the loop.
        houtf_ref[s] = jnp.where(valid_f, hf_new, 0.0)
        houtb_ref[tb] = jnp.where(valid_b, hb_new, 0.0)
        hf = jnp.where(valid_f, hf_new, hf)
        cf = jnp.where(valid_f, cf_new, cf)
        hb = jnp.where(valid_b, hb_new, hb)
        cb = jnp.where(valid_b, cb_new, cb)
        return hf, cf, hb, cb

    # Unroll tuned to the batch tile: fat tiles hold large gate temporaries per
    # unrolled step, so cap the unroll to avoid vreg spills on the serial path.
    if L <= 16:
        unroll = True
    elif Bb <= 16:
        unroll = 8
    else:
        unroll = 4 if Bb <= 32 else 2
    z0 = jnp.zeros((Bb, H), jnp.float32)
    jax.lax.fori_loop(0, L, step, (z0, z0, z0, z0), unroll=unroll)

    # mod_linear_2 as one post-loop VPU mul + lane reduce (off the serial path).
    l2_mod = (jnp.sum(houtf_ref[...] * wm2f, axis=-1)
              + jnp.sum(houtb_ref[...] * wm2b, axis=-1)).T    # (Bb, L)
    logits_2 = l2_att + l2_mod + b2

    neg_big = jnp.float32(-1e30)

    def masked_log_softmax(lg):                               # over time (lane axis)
        ml = jnp.where(mask > 0.5, lg, neg_big)
        mx = jnp.max(ml, axis=-1, keepdims=True)
        zc = ml - mx
        lse = jnp.log(jnp.sum(jnp.exp(zc), axis=-1, keepdims=True))
        return zc - lse

    logp1_ref[...] = masked_log_softmax(logits_1)
    logp2_ref[...] = masked_log_softmax(logits_2)


# --------------------------- wrapper / tiling ---------------------------

def _round_up(x, m):
    return -(-x // m) * m


def _tpu_vmem_plan():
    """(tiling budget, vmem_limit_bytes, prefer grid >= 2) per TPU generation."""
    try:
        kind = jax.devices()[0].device_kind.lower()
    except Exception:
        kind = ""
    if ("v5" in kind) or ("v6" in kind):
        phys = 128 * 1024 * 1024          # v5e / v6e: 128 MiB physical VMEM
    else:
        phys = 64 * 1024 * 1024           # v7x (and unknown): 64 MiB per TensorCore
    prefer_multi = ("v7" in kind) or ("7x" in kind)   # 2 TCs/chip: keep grid >= 2
    return int(phys * 0.70), int(phys * 0.85), prefer_multi


def _vmem_bytes_estimate(block_b, L, D, H):
    """Rough per-program VMEM footprint (double-buffered I/O + scratch + temps)."""
    n = max(_round_up(block_b, 8), 8)
    Ls, Lp = _round_up(L, 8), _round_up(L, 128)
    Dp, Hp = _round_up(D, 128), _round_up(H, 128)
    Gp, G2p = _round_up(4 * H, 128), _round_up(8 * H, 128)
    io = 2 * 2 * n * Ls * Dp * 4                       # att + mod, double-buffered
    io += 2 * n * Lp * 4 + 2 * 2 * n * Lp * 4          # mask + two outputs
    w = 2 * (Dp * G2p * 2 + _round_up(2 * H, 8) * G2p * 2
             + G2p * 4 + 3 * Dp * 4 + 2 * Hp * 4 + 128 * 4)
    scr = 2 * L * n * Gp * 2 + 2 * L * n * Hp * 4      # bf16 gates + f32 hidden states
    tmp = L * n * (Dp * 4 + Dp * 2 + 2 * G2p * 4)      # matmul / relayout temporaries
    return io + w + scr + tmp


def _choose_block_b(B, L, D, H, budget, prefer_multi):
    cands = sorted({B} | {c for c in range(8, B, 8) if B % c == 0})
    fitting = [c for c in cands if _vmem_bytes_estimate(c, L, D, H) <= budget]
    if not fitting:
        return cands[0]
    if prefer_multi:                      # v7x: keep the batch grid >= 2 tiles
        multi = [c for c in fitting if B // c >= 2]
        if multi:
            return max(multi)
    return max(fitting)                   # single-TC chips: biggest tile wins


def init_params(key, hidden_size):
    H = hidden_size
    D = 2 * H
    ks = jax.random.split(key, 12)
    s = 0.1
    f32 = jnp.float32
    return {
        # nn.Linear(2H, 1) weights stored as (1, 2H) row vectors.
        'wa1': s * jax.random.normal(ks[0], (1, D), f32),
        'wm1': s * jax.random.normal(ks[1], (1, D), f32),
        'wa2': s * jax.random.normal(ks[2], (1, D), f32),
        'wm2': s * jax.random.normal(ks[3], (1, D), f32),
        'b1': jnp.float32(0.1),
        'b2': jnp.float32(-0.2),
        # PyTorch LSTM layout: weight_ih (4H, 2H), weight_hh (4H, H),
        # bias_ih / bias_hh (4H,), gate order (i, f, g, o); forward + reverse.
        'w_ih_f': s * jax.random.normal(ks[4], (4 * H, D), f32),
        'w_hh_f': s * jax.random.normal(ks[5], (4 * H, H), f32),
        'b_ih_f': s * jax.random.normal(ks[6], (4 * H,), f32),
        'b_hh_f': s * jax.random.normal(ks[7], (4 * H,), f32),
        'w_ih_b': s * jax.random.normal(ks[8], (4 * H, D), f32),
        'w_hh_b': s * jax.random.normal(ks[9], (4 * H, H), f32),
        'b_ih_b': s * jax.random.normal(ks[10], (4 * H,), f32),
        'b_hh_b': s * jax.random.normal(ks[11], (4 * H,), f32),
    }


def bidaf_output_pallas(att, mod, mask, params, block_b=None, mxu_dtype=jnp.bfloat16):
    B0, L, D = att.shape
    H = D // 2
    maskf = mask.astype(jnp.float32)

    # Pad odd batch sizes (> 8) to a multiple of 8 so the tile stays bounded;
    # padded rows carry mask == 0 and are sliced off at the end.
    if B0 > 8 and B0 % 8 != 0:
        pad = _round_up(B0, 8) - B0
        att = jnp.pad(att, ((0, pad), (0, 0), (0, 0)))
        mod = jnp.pad(mod, ((0, pad), (0, 0), (0, 0)))
        maskf = jnp.pad(maskf, ((0, pad), (0, 0)))
    B = att.shape[0]

    budget, vmem_limit, prefer_multi = _tpu_vmem_plan()
    if block_b is None:
        block_b = _choose_block_b(B, L, D, H, budget, prefer_multi)
    assert B % block_b == 0 and (block_b == B or block_b % 8 == 0)
    grid = (B // block_b,)

    # --- weight prep: PyTorch layouts -> fused, MXU-friendly layouts ---
    projw = jnp.concatenate([params['wa1'], params['wm1'], params['wa2']],
                            axis=0).astype(jnp.float32)                 # (3, D)
    wm2 = jnp.concatenate([params['wm2'][:, :H], params['wm2'][:, H:]],
                          axis=0).astype(jnp.float32)                   # (2, H)
    bias = jnp.stack([params['b1'], params['b2']]).reshape(1, 2).astype(jnp.float32)
    # Fused bidirectional input projection: (D, 8H) = [W_ih_f.T | W_ih_b.T], bf16.
    wih = jnp.concatenate([params['w_ih_f'], params['w_ih_b']],
                          axis=0).T.astype(mxu_dtype)                   # (D, 8H)
    # Fused block-diagonal recurrence weight: [hf | hb] @ whh -> [gates_f | gates_b].
    whh = jnp.zeros((2 * H, 8 * H), jnp.float32)
    whh = whh.at[:H, :4 * H].set(params['w_hh_f'].T)
    whh = whh.at[H:, 4 * H:].set(params['w_hh_b'].T)
    whh = whh.astype(mxu_dtype)                                         # (2H, 8H)
    lstmb = jnp.concatenate([params['b_ih_f'] + params['b_hh_f'],
                             params['b_ih_b'] + params['b_hh_b']]
                            ).reshape(1, 8 * H).astype(jnp.float32)     # (1, 8H)

    batched3 = lambda i: (i, 0, 0)
    batched2 = lambda i: (i, 0)
    full2 = lambda i: (0, 0)

    in_specs = [
        pl.BlockSpec((block_b, L, D), batched3),   # att
        pl.BlockSpec((block_b, L, D), batched3),   # mod
        pl.BlockSpec((block_b, L), batched2),      # mask
        pl.BlockSpec((3, D), full2),               # att/mod linear-1/2 weights
        pl.BlockSpec((2, H), full2),               # mod_linear_2 weight (fwd/bwd)
        pl.BlockSpec((D, 8 * H), full2),           # fused W_ih (bf16)
        pl.BlockSpec((2 * H, 8 * H), full2),       # fused block-diag W_hh (bf16)
        pl.BlockSpec((1, 8 * H), full2),           # fused LSTM bias (ih + hh)
        pl.BlockSpec((1, 2), full2),               # b1, b2
    ]
    out_specs = (pl.BlockSpec((block_b, L), batched2),
                 pl.BlockSpec((block_b, L), batched2))
    scratch_shapes = [
        pltpu.VMEM((L, block_b, 4 * H), mxu_dtype),     # hoisted fwd input gates (bf16)
        pltpu.VMEM((L, block_b, 4 * H), mxu_dtype),     # hoisted bwd input gates (bf16)
        pltpu.VMEM((L, block_b, H), jnp.float32),       # fwd hidden states (masked)
        pltpu.VMEM((L, block_b, H), jnp.float32),       # bwd hidden states (masked)
    ]

    logp1, logp2 = pl.pallas_call(
        bidaf_output_kernel,
        out_shape=(jax.ShapeDtypeStruct((B, L), jnp.float32),
                   jax.ShapeDtypeStruct((B, L), jnp.float32)),
        grid=grid,
        in_specs=in_specs,
        out_specs=out_specs,
        scratch_shapes=scratch_shapes,
        compiler_params=pltpu.CompilerParams(
            dimension_semantics=("parallel",),
            vmem_limit_bytes=vmem_limit),
    )(att, mod, maskf, projw, wm2, wih, whh, lstmb, bias)

    return logp1[:B0], logp2[:B0]                  # (B, L) each, lane-dense


# ------------------------------ reference ------------------------------

def ref_bidaf_output(att, mod, mask, params):
    """Pure-JAX reference mirroring the PyTorch forward pass (eval mode, f32)."""
    B, L, D = att.shape
    H = D // 2
    maskf = mask.astype(jnp.float32)
    lengths = jnp.sum(maskf, axis=-1).astype(jnp.int32)   # (B,)

    logits1 = (jnp.sum(att * params['wa1'], -1)
               + jnp.sum(mod * params['wm1'], -1) + params['b1'])

    wxf = params['w_ih_f'].T; whf = params['w_hh_f'].T
    bf = params['b_ih_f'] + params['b_hh_f']
    wxb = params['w_ih_b'].T; whb = params['w_hh_b'].T
    bb = params['b_ih_b'] + params['b_hh_b']

    def cell(x, h, c, wx, wh, b):
        g = x @ wx + h @ wh + b
        i = jax.nn.sigmoid(g[:, :H]); f = jax.nn.sigmoid(g[:, H:2 * H])
        gg = jnp.tanh(g[:, 2 * H:3 * H]); o = jax.nn.sigmoid(g[:, 3 * H:])
        c2 = f * c + i * gg
        return o * jnp.tanh(c2), c2

    hf = jnp.zeros((B, H)); cf = jnp.zeros((B, H))
    outs_f = []
    for t in range(L):
        h2, c2 = cell(mod[:, t], hf, cf, wxf, whf, bf)
        v = (t < lengths)[:, None]
        outs_f.append(jnp.where(v, h2, 0.0))
        hf = jnp.where(v, h2, hf); cf = jnp.where(v, c2, cf)

    hb = jnp.zeros((B, H)); cb = jnp.zeros((B, H))
    outs_b = [None] * L
    for t in range(L - 1, -1, -1):
        h2, c2 = cell(mod[:, t], hb, cb, wxb, whb, bb)
        v = (t < lengths)[:, None]
        outs_b[t] = jnp.where(v, h2, 0.0)
        hb = jnp.where(v, h2, hb); cb = jnp.where(v, c2, cb)

    mod2 = jnp.concatenate([jnp.stack(outs_f, 1), jnp.stack(outs_b, 1)], axis=-1)
    logits2 = (jnp.sum(att * params['wa2'], -1)
               + jnp.sum(mod2 * params['wm2'], -1) + params['b2'])

    def masked_log_softmax(lg):
        ml = maskf * lg + (1.0 - maskf) * (-1e30)
        return jax.nn.log_softmax(ml, axis=-1)

    return masked_log_softmax(logits1), masked_log_softmax(logits2)


if __name__ == "__main__":
    key = jax.random.PRNGKey(0)
    B, L, H = 2, 8, 32
    D = 2 * H
    k1, k2, k3 = jax.random.split(key, 3)

    att = jax.random.normal(k1, (B, L, D), jnp.float32)
    mod = jax.random.normal(k2, (B, L, D), jnp.float32)
    seq_lengths = jnp.array([L, 5], jnp.int32)
    mask = (jnp.arange(L)[None, :] < seq_lengths[:, None]).astype(jnp.float32)

    params = init_params(k3, H)

    log_p1, log_p2 = jax.block_until_ready(bidaf_output_pallas(att, mod, mask, params))

    ref_p1, ref_p2 = ref_bidaf_output(att, mod, mask, params)
    # bf16 MXU operands + bf16 gate staging accumulate small error over the
    # serial LSTM steps; validate against the f32 reference with loosened tol.
    np.testing.assert_allclose(np.asarray(log_p1), np.asarray(ref_p1), rtol=3e-2, atol=3e-2)
    np.testing.assert_allclose(np.asarray(log_p2), np.asarray(ref_p2), rtol=3e-2, atol=3e-2)

    print("KERNEL_OK")
</pallas_src>

<mosaic_0001>
module attributes {stable_mosaic.version = 11 : i64} {
  func.func @bidaf_output_kernel(%arg0: i32, %arg1: memref<2x8x64xf32, #tpu.memory_space<vmem>>, %arg2: memref<2x8x64xf32, #tpu.memory_space<vmem>>, %arg3: memref<2x8xf32, #tpu.memory_space<vmem>>, %arg4: memref<3x64xf32, #tpu.memory_space<vmem>>, %arg5: memref<2x32xf32, #tpu.memory_space<vmem>>, %arg6: memref<64x256xbf16, #tpu.memory_space<vmem>>, %arg7: memref<64x256xbf16, #tpu.memory_space<vmem>>, %arg8: memref<1x256xf32, #tpu.memory_space<vmem>>, %arg9: memref<1x2xf32, #tpu.memory_space<vmem>>, %arg10: memref<2x8xf32, #tpu.memory_space<vmem>>, %arg11: memref<2x8xf32, #tpu.memory_space<vmem>>, %arg12: memref<8x2x128xbf16, #tpu.memory_space<vmem>>, %arg13: memref<8x2x128xbf16, #tpu.memory_space<vmem>>, %arg14: memref<8x2x32xf32, #tpu.memory_space<vmem>>, %arg15: memref<8x2x32xf32, #tpu.memory_space<vmem>>) attributes {dimension_semantics = [#tpu.dimension_semantics<parallel>], iteration_bounds = array<i64: 1>, scalar_prefetch = 0 : i64, scratch_operands = 4 : i64, tpu.core_type = #tpu.core_type<tc>, window_params = [{transform_indices = @transform_0, window_bounds = array<i64: 2, 8, 64>}, {transform_indices = @transform_1, window_bounds = array<i64: 2, 8, 64>}, {transform_indices = @transform_2, window_bounds = array<i64: 2, 8>}, {pipeline_mode = #tpu.pipeline_mode<synchronous>, transform_indices = @transform_3, window_bounds = array<i64: 3, 64>}, {pipeline_mode = #tpu.pipeline_mode<synchronous>, transform_indices = @transform_4, window_bounds = array<i64: 2, 32>}, {pipeline_mode = #tpu.pipeline_mode<synchronous>, transform_indices = @transform_5, window_bounds = array<i64: 64, 256>}, {pipeline_mode = #tpu.pipeline_mode<synchronous>, transform_indices = @transform_6, window_bounds = array<i64: 64, 256>}, {pipeline_mode = #tpu.pipeline_mode<synchronous>, transform_indices = @transform_7, window_bounds = array<i64: 1, 256>}, {pipeline_mode = #tpu.pipeline_mode<synchronous>, transform_indices = @transform_8, window_bounds = array<i64: 1, 2>}, {transform_indices = @transform_9, window_bounds = array<i64: 2, 8>}, {transform_indices = @transform_10, window_bounds = array<i64: 2, 8>}]} {
    %c0 = arith.constant 0 : index
    %c0_0 = arith.constant 0 : index
    %c0_1 = arith.constant 0 : index
    %0 = vector.load %arg1[%c0, %c0_0, %c0_1] : memref<2x8x64xf32, #tpu.memory_space<vmem>>, vector<2x8x64xf32>
    %c0_2 = arith.constant 0 : index
    %c0_3 = arith.constant 0 : index
    %c0_4 = arith.constant 0 : index
    %1 = vector.load %arg2[%c0_2, %c0_3, %c0_4] : memref<2x8x64xf32, #tpu.memory_space<vmem>>, vector<2x8x64xf32>
    %c0_5 = arith.constant 0 : index
    %c0_6 = arith.constant 0 : index
    %2 = vector.load %arg3[%c0_5, %c0_6] : memref<2x8xf32, #tpu.memory_space<vmem>>, vector<2x8xf32>
    %c0_7 = arith.constant 0 : index
    %c0_8 = arith.constant 0 : index
    %3 = vector.load %arg4[%c0_7, %c0_8] : memref<3x64xf32, #tpu.memory_space<vmem>>, vector<1x64xf32>
    %c1 = arith.constant 1 : index
    %c0_9 = arith.constant 0 : index
    %4 = vector.load %arg4[%c1, %c0_9] : memref<3x64xf32, #tpu.memory_space<vmem>>, vector<1x64xf32>
    %c2 = arith.constant 2 : index
    %c0_10 = arith.constant 0 : index
    %5 = vector.load %arg4[%c2, %c0_10] : memref<3x64xf32, #tpu.memory_space<vmem>>, vector<1x64xf32>
    %c0_11 = arith.constant 0 : index
    %c0_12 = arith.constant 0 : index
    %6 = vector.load %arg5[%c0_11, %c0_12] : memref<2x32xf32, #tpu.memory_space<vmem>>, vector<1x32xf32>
    %7 = vector.shape_cast %6 : vector<1x32xf32> to vector<1x1x32xf32>
    %c1_13 = arith.constant 1 : index
    %c0_14 = arith.constant 0 : index
    %8 = vector.load %arg5[%c1_13, %c0_14] : memref<2x32xf32, #tpu.memory_space<vmem>>, vector<1x32xf32>
    %9 = vector.shape_cast %8 : vector<1x32xf32> to vector<1x1x32xf32>
    %c0_15 = arith.constant 0 : index
    %c0_16 = arith.constant 0 : index
    %10 = vector.load %arg7[%c0_15, %c0_16] : memref<64x256xbf16, #tpu.memory_space<vmem>>, vector<64x256xbf16>
    %c0_17 = arith.constant 0 : index
    %c0_18 = arith.constant 0 : index
    %11 = vector.load %arg9[%c0_17, %c0_18] : memref<1x2xf32, #tpu.memory_space<vmem>>, vector<1x1xf32>
    %c0_19 = arith.constant 0 : index
    %c1_20 = arith.constant 1 : index
    %12 = vector.load %arg9[%c0_19, %c1_20] : memref<1x2xf32, #tpu.memory_space<vmem>>, vector<1x1xf32>
    %13 = vector.shape_cast %3 : vector<1x64xf32> to vector<1x1x64xf32>
    %14 = vector.broadcast %13 : vector<1x1x64xf32> to vector<2x8x64xf32>
    %15 = arith.mulf %0, %14 : vector<2x8x64xf32>
    %cst = arith.constant dense<0.000000e+00> : vector<2x8xf32>
    %16 = vector.multi_reduction <add>, %15, %cst [2] : vector<2x8x64xf32> to vector<2x8xf32>
    %17 = vector.shape_cast %4 : vector<1x64xf32> to vector<1x1x64xf32>
    %18 = vector.broadcast %17 : vector<1x1x64xf32> to vector<2x8x64xf32>
    %19 = arith.mulf %1, %18 : vector<2x8x64xf32>
    %cst_21 = arith.constant dense<0.000000e+00> : vector<2x8xf32>
    %20 = vector.multi_reduction <add>, %19, %cst_21 [2] : vector<2x8x64xf32> to vector<2x8xf32>
    %21 = arith.addf %16, %20 : vector<2x8xf32>
    %22 = vector.broadcast %11 : vector<1x1xf32> to vector<2x8xf32>
    %23 = arith.addf %21, %22 : vector<2x8xf32>
    %24 = vector.shape_cast %5 : vector<1x64xf32> to vector<1x1x64xf32>
    %25 = vector.broadcast %24 : vector<1x1x64xf32> to vector<2x8x64xf32>
    %26 = arith.mulf %0, %25 : vector<2x8x64xf32>
    %cst_22 = arith.constant dense<0.000000e+00> : vector<2x8xf32>
    %27 = vector.multi_reduction <add>, %26, %cst_22 [2] : vector<2x8x64xf32> to vector<2x8xf32>
    %28 = vector.shape_cast %1 : vector<2x8x64xf32> to vector<16x64xf32>
    %29 = arith.truncf %28 : vector<16x64xf32> to vector<16x64xbf16>
    %c0_23 = arith.constant 0 : index
    %c0_24 = arith.constant 0 : index
    %30 = vector.load %arg6[%c0_23, %c0_24] : memref<64x256xbf16, #tpu.memory_space<vmem>>, vector<64x256xbf16>
    %cst_25 = arith.constant dense<0.000000e+00> : vector<16x256xf32>
    %31 = tpu.matmul %29, %30, %cst_25 {dimension_numbers = #tpu.dot_dimension_numbers<[1], [0], [0], [1], [0, 0, 1, 1], [], []>} : vector<16x64xbf16>, vector<64x256xbf16>, vector<16x256xf32> -> vector<16x256xf32>
    %c0_26 = arith.constant 0 : index
    %c0_27 = arith.constant 0 : index
    %32 = vector.load %arg8[%c0_26, %c0_27] : memref<1x256xf32, #tpu.memory_space<vmem>>, vector<1x256xf32>
    %33 = vector.broadcast %32 : vector<1x256xf32> to vector<16x256xf32>
    %34 = arith.addf %31, %33 : vector<16x256xf32>
    %35 = vector.shape_cast %34 : vector<16x256xf32> to vector<2x8x256xf32>
    %36 = tpu.transpose %35, [1, 0, 2] : vector<2x8x256xf32> -> vector<8x2x256xf32>
    %37 = vector.extract_strided_slice %36 {offsets = [0, 0, 0], sizes = [8, 2, 128], strides = [1, 1, 1]} : vector<8x2x256xf32> to vector<8x2x128xf32>
    %38 = arith.truncf %37 : vector<8x2x128xf32> to vector<8x2x128xbf16>
    %c0_28 = arith.constant 0 : index
    %c0_29 = arith.constant 0 : index
    %c0_30 = arith.constant 0 : index
    %39 = vector.load %arg12[%c0_28, %c0_29, %c0_30] : memref<8x2x128xbf16, #tpu.memory_space<vmem>>, vector<8x2x128xbf16>
    tpu.vector_store %arg12[%c0_28, %c0_29, %c0_30], %38 {strides = array<i32>} : memref<8x2x128xbf16, #tpu.memory_space<vmem>>, vector<8x2x128xbf16>,
    %40 = vector.extract_strided_slice %36 {offsets = [0, 0, 128], sizes = [8, 2, 128], strides = [1, 1, 1]} : vector<8x2x256xf32> to vector<8x2x128xf32>
    %41 = arith.truncf %40 : vector<8x2x128xf32> to vector<8x2x128xbf16>
    %c0_31 = arith.constant 0 : index
    %c0_32 = arith.constant 0 : index
    %c0_33 = arith.constant 0 : index
    %42 = vector.load %arg13[%c0_31, %c0_32, %c0_33] : memref<8x2x128xbf16, #tpu.memory_space<vmem>>, vector<8x2x128xbf16>
    tpu.vector_store %arg13[%c0_31, %c0_32, %c0_33], %41 {strides = array<i32>} : memref<8x2x128xbf16, #tpu.memory_space<vmem>>, vector<8x2x128xbf16>,
    %cst_34 = arith.constant dense<0.000000e+00> : vector<2xf32>
    %43 = vector.multi_reduction <add>, %2, %cst_34 [1] : vector<2x8xf32> to vector<2xf32>
    %44 = vector.shape_cast %43 : vector<2xf32> to vector<2x1xf32>
    %45 = arith.fptosi %44 : vector<2x1xf32> to vector<2x1xi32>
    %cst_35 = arith.constant 0.000000e+00 : f32
    %46 = vector.broadcast %cst_35 : f32 to vector<2x32xf32>
    %c0_i32 = arith.constant 0 : i32
    %c7_i32 = arith.constant 7 : i32
    %47 = arith.subi %c7_i32, %c0_i32 : i32
    %48 = tpu.concatenate %46, %46 in 1 : vector<2x32xf32>, vector<2x32xf32> -> vector<2x64xf32>
    %49 = arith.truncf %48 : vector<2x64xf32> to vector<2x64xbf16>
    %cst_36 = arith.constant dense<0.000000e+00> : vector<2x256xf32>
    %50 = tpu.matmul %49, %10, %cst_36 {dimension_numbers = #tpu.dot_dimension_numbers<[1], [0], [0], [1], [0, 0, 1, 1], [], []>} : vector<2x64xbf16>, vector<64x256xbf16>, vector<2x256xf32> -> vector<2x256xf32>
    %51 = vector.extract_strided_slice %50 {offsets = [0, 0], sizes = [2, 128], strides = [1, 1]} : vector<2x256xf32> to vector<2x128xf32>
    %52 = arith.index_cast %c0_i32 : i32 to index
    %c0_37 = arith.constant 0 : index
    %c0_38 = arith.constant 0 : index
    %53 = vector.load %arg12[%52, %c0_37, %c0_38] : memref<8x2x128xbf16, #tpu.memory_space<vmem>>, vector<1x2x128xbf16>
    %54 = vector.shape_cast %53 : vector<1x2x128xbf16> to vector<2x128xbf16>
    %55 = arith.extf %54 : vector<2x128xbf16> to vector<2x128xf32>
    %56 = arith.addf %51, %55 : vector<2x128xf32>
    %57 = vector.extract_strided_slice %50 {offsets = [0, 128], sizes = [2, 128], strides = [1, 1]} : vector<2x256xf32> to vector<2x128xf32>
    %58 = arith.index_cast %47 : i32 to index
    %c0_39 = arith.constant 0 : index
    %c0_40 = arith.constant 0 : index
    %59 = vector.load %arg13[%58, %c0_39, %c0_40] : memref<8x2x128xbf16, #tpu.memory_space<vmem>>, vector<1x2x128xbf16>
    %60 = vector.shape_cast %59 : vector<1x2x128xbf16> to vector<2x128xbf16>
    %61 = arith.extf %60 : vector<2x128xbf16> to vector<2x128xf32>
    %62 = arith.addf %57, %61 : vector<2x128xf32>
    %63 = vector.extract_strided_slice %56 {offsets = [0, 0], sizes = [2, 32], strides = [1, 1]} : vector<2x128xf32> to vector<2x32xf32>
    %64 = arith.negf %63 : vector<2x32xf32>
    %65 = math.exp %64 : vector<2x32xf32>
    %cst_41 = arith.constant 1.000000e+00 : f32
    %66 = vector.broadcast %cst_41 : f32 to vector<2x32xf32>
    %67 = arith.addf %66, %65 : vector<2x32xf32>
    %68 = arith.divf %66, %67 : vector<2x32xf32>
    %69 = vector.extract_strided_slice %56 {offsets = [0, 32], sizes = [2, 32], strides = [1, 1]} : vector<2x128xf32> to vector<2x32xf32>
    %70 = arith.negf %69 : vector<2x32xf32>
    %71 = math.exp %70 : vector<2x32xf32>
    %cst_42 = arith.constant 1.000000e+00 : f32
    %72 = vector.broadcast %cst_42 : f32 to vector<2x32xf32>
    %73 = arith.addf %72, %71 : vector<2x32xf32>
    %74 = arith.divf %72, %73 : vector<2x32xf32>
    %75 = vector.extract_strided_slice %56 {offsets = [0, 64], sizes = [2, 32], strides = [1, 1]} : vector<2x128xf32> to vector<2x32xf32>
    %76 = math.tanh %75 : vector<2x32xf32>
    %77 = vector.extract_strided_slice %56 {offsets = [0, 96], sizes = [2, 32], strides = [1, 1]} : vector<2x128xf32> to vector<2x32xf32>
    %78 = arith.negf %77 : vector<2x32xf32>
    %79 = math.exp %78 : vector<2x32xf32>
    %cst_43 = arith.constant 1.000000e+00 : f32
    %80 = vector.broadcast %cst_43 : f32 to vector<2x32xf32>
    %81 = arith.addf %80, %79 : vector<2x32xf32>
    %82 = arith.divf %80, %81 : vector<2x32xf32>
    %83 = arith.mulf %74, %46 : vector<2x32xf32>
    %84 = arith.mulf %68, %76 : vector<2x32xf32>
    %85 = arith.addf %83, %84 : vector<2x32xf32>
    %86 = math.tanh %85 : vector<2x32xf32>
    %87 = arith.mulf %82, %86 : vector<2x32xf32>
    %88 = vector.extract_strided_slice %62 {offsets = [0, 0], sizes = [2, 32], strides = [1, 1]} : vector<2x128xf32> to vector<2x32xf32>
    %89 = arith.negf %88 : vector<2x32xf32>
    %90 = math.exp %89 : vector<2x32xf32>
    %cst_44 = arith.constant 1.000000e+00 : f32
    %91 = vector.broadcast %cst_44 : f32 to vector<2x32xf32>
    %92 = arith.addf %91, %90 : vector<2x32xf32>
    %93 = arith.divf %91, %92 : vector<2x32xf32>
    %94 = vector.extract_strided_slice %62 {offsets = [0, 32], sizes = [2, 32], strides = [1, 1]} : vector<2x128xf32> to vector<2x32xf32>
    %95 = arith.negf %94 : vector<2x32xf32>
    %96 = math.exp %95 : vector<2x32xf32>
    %cst_45 = arith.constant 1.000000e+00 : f32
    %97 = vector.broadcast %cst_45 : f32 to vector<2x32xf32>
    %98 = arith.addf %97, %96 : vector<2x32xf32>
    %99 = arith.divf %97, %98 : vector<2x32xf32>
    %100 = vector.extract_strided_slice %62 {offsets = [0, 64], sizes = [2, 32], strides = [1, 1]} : vector<2x128xf32> to vector<2x32xf32>
    %101 = math.tanh %100 : vector<2x32xf32>
    %102 = vector.extract_strided_slice %62 {offsets = [0, 96], sizes = [2, 32], strides = [1, 1]} : vector<2x128xf32> to vector<2x32xf32>
    %103 = arith.negf %102 : vector<2x32xf32>
    %104 = math.exp %103 : vector<2x32xf32>
    %cst_46 = arith.constant 1.000000e+00 : f32
    %105 = vector.broadcast %cst_46 : f32 to vector<2x32xf32>
    %106 = arith.addf %105, %104 : vector<2x32xf32>
    %107 = arith.divf %105, %106 : vector<2x32xf32>
    %108 = arith.mulf %99, %46 : vector<2x32xf32>
    %109 = arith.mulf %93, %101 : vector<2x32xf32>
    %110 = arith.addf %108, %109 : vector<2x32xf32>
    %111 = math.tanh %110 : vector<2x32xf32>
    %112 = arith.mulf %107, %111 : vector<2x32xf32>
    %113 = vector.broadcast %c0_i32 : i32 to vector<2x1xi32>
    %114 = arith.cmpi slt, %113, %45 : vector<2x1xi32>
    %115 = vector.broadcast %47 : i32 to vector<2x1xi32>
    %116 = arith.cmpi slt, %115, %45 : vector<2x1xi32>
    %cst_47 = arith.constant 0.000000e+00 : f32
    %117 = vector.shape_cast %114 : vector<2x1xi1> to vector<2x1xi1>
    %118 = vector.broadcast %117 : vector<2x1xi1> to vector<2x32xi1>
    %119 = vector.broadcast %cst_47 : f32 to vector<2x32xf32>
    %120 = arith.select %118, %87, %119 : vector<2x32xi1>, vector<2x32xf32>
    %121 = arith.index_cast %c0_i32 : i32 to index
    %c0_48 = arith.constant 0 : index
    %c0_49 = arith.constant 0 : index
    %122 = vector.load %arg14[%121, %c0_48, %c0_49] : memref<8x2x32xf32, #tpu.memory_space<vmem>>, vector<1x2x32xf32>
    %123 = vector.shape_cast %122 : vector<1x2x32xf32> to vector<2x32xf32>
    %124 = vector.shape_cast %120 : vector<2x32xf32> to vector<1x2x32xf32>
    tpu.vector_store %arg14[%121, %c0_48, %c0_49], %124 {strides = array<i32>} : memref<8x2x32xf32, #tpu.memory_space<vmem>>, vector<1x2x32xf32>,
    %cst_50 = arith.constant 0.000000e+00 : f32
    %125 = vector.shape_cast %116 : vector<2x1xi1> to vector<2x1xi1>
    %126 = vector.broadcast %125 : vector<2x1xi1> to vector<2x32xi1>
    %127 = vector.broadcast %cst_50 : f32 to vector<2x32xf32>
    %128 = arith.select %126, %112, %127 : vector<2x32xi1>, vector<2x32xf32>
    %129 = arith.index_cast %47 : i32 to index
    %c0_51 = arith.constant 0 : index
    %c0_52 = arith.constant 0 : index
    %130 = vector.load %arg15[%129, %c0_51, %c0_52] : memref<8x2x32xf32, #tpu.memory_space<vmem>>, vector<1x2x32xf32>
    %131 = vector.shape_cast %130 : vector<1x2x32xf32> to vector<2x32xf32>
    %132 = vector.shape_cast %128 : vector<2x32xf32> to vector<1x2x32xf32>
    tpu.vector_store %arg15[%129, %c0_51, %c0_52], %132 {strides = array<i32>} : memref<8x2x32xf32, #tpu.memory_space<vmem>>, vector<1x2x32xf32>,
    %133 = vector.shape_cast %114 : vector<2x1xi1> to vector<2x1xi1>
    %134 = vector.broadcast %133 : vector<2x1xi1> to vector<2x32xi1>
    %135 = arith.select %134, %87, %46 : vector<2x32xi1>, vector<2x32xf32>
    %136 = vector.shape_cast %114 : vector<2x1xi1> to vector<2x1xi1>
    %137 = vector.broadcast %136 : vector<2x1xi1> to vector<2x32xi1>
    %138 = arith.select %137, %85, %46 : vector<2x32xi1>, vector<2x32xf32>
    %139 = vector.shape_cast %116 : vector<2x1xi1> to vector<2x1xi1>
    %140 = vector.broadcast %139 : vector<2x1xi1> to vector<2x32xi1>
    %141 = arith.select %140, %112, %46 : vector<2x32xi1>, vector<2x32xf32>
    %142 = vector.shape_cast %116 : vector<2x1xi1> to vector<2x1xi1>
    %143 = vector.broadcast %142 : vector<2x1xi1> to vector<2x32xi1>
    %144 = arith.select %143, %110, %46 : vector<2x32xi1>, vector<2x32xf32>
    %c1_i32 = arith.constant 1 : i32
    %c7_i32_53 = arith.constant 7 : i32
    %145 = arith.subi %c7_i32_53, %c1_i32 : i32
    %146 = tpu.concatenate %135, %141 in 1 : vector<2x32xf32>, vector<2x32xf32> -> vector<2x64xf32>
    %147 = arith.truncf %146 : vector<2x64xf32> to vector<2x64xbf16>
    %cst_54 = arith.constant dense<0.000000e+00> : vector<2x256xf32>
    %148 = tpu.matmul %147, %10, %cst_54 {dimension_numbers = #tpu.dot_dimension_numbers<[1], [0], [0], [1], [0, 0, 1, 1], [], []>} : vector<2x64xbf16>, vector<64x256xbf16>, vector<2x256xf32> -> vector<2x256xf32>
    %149 = vector.extract_strided_slice %148 {offsets = [0, 0], sizes = [2, 128], strides = [1, 1]} : vector<2x256xf32> to vector<2x128xf32>
    %150 = arith.index_cast %c1_i32 : i32 to index
    %c0_55 = arith.constant 0 : index
    %c0_56 = arith.constant 0 : index
    %151 = vector.load %arg12[%150, %c0_55, %c0_56] : memref<8x2x128xbf16, #tpu.memory_space<vmem>>, vector<1x2x128xbf16>
    %152 = vector.shape_cast %151 : vector<1x2x128xbf16> to vector<2x128xbf16>
    %153 = arith.extf %152 : vector<2x128xbf16> to vector<2x128xf32>
    %154 = arith.addf %149, %153 : vector<2x128xf32>
    %155 = vector.extract_strided_slice %148 {offsets = [0, 128], sizes = [2, 128], strides = [1, 1]} : vector<2x256xf32> to vector<2x128xf32>
    %156 = arith.index_cast %145 : i32 to index
    %c0_57 = arith.constant 0 : index
    %c0_58 = arith.constant 0 : index
    %157 = vector.load %arg13[%156, %c0_57, %c0_58] : memref<8x2x128xbf16, #tpu.memory_space<vmem>>, vector<1x2x128xbf16>
    %158 = vector.shape_cast %157 : vector<1x2x128xbf16> to vector<2x128xbf16>
    %159 = arith.extf %158 : vector<2x128xbf16> to vector<2x128xf32>
    %160 = arith.addf %155, %159 : vector<2x128xf32>
    %161 = vector.extract_strided_slice %154 {offsets = [0, 0], sizes = [2, 32], strides = [1, 1]} : vector<2x128xf32> to vector<2x32xf32>
    %162 = arith.negf %161 : vector<2x32xf32>
    %163 = math.exp %162 : vector<2x32xf32>
    %cst_59 = arith.constant 1.000000e+00 : f32
    %164 = vector.broadcast %cst_59 : f32 to vector<2x32xf32>
    %165 = arith.addf %164, %163 : vector<2x32xf32>
    %166 = arith.divf %164, %165 : vector<2x32xf32>
    %167 = vector.extract_strided_slice %154 {offsets = [0, 32], sizes = [2, 32], strides = [1, 1]} : vector<2x128xf32> to vector<2x32xf32>
    %168 = arith.negf %167 : vector<2x32xf32>
    %169 = math.exp %168 : vector<2x32xf32>
    %cst_60 = arith.constant 1.000000e+00 : f32
    %170 = vector.broadcast %cst_60 : f32 to vector<2x32xf32>
    %171 = arith.addf %170, %169 : vector<2x32xf32>
    %172 = arith.divf %170, %171 : vector<2x32xf32>
    %173 = vector.extract_strided_slice %154 {offsets = [0, 64], sizes = [2, 32], strides = [1, 1]} : vector<2x128xf32> to vector<2x32xf32>
    %174 = math.tanh %173 : vector<2x32xf32>
    %175 = vector.extract_strided_slice %154 {offsets = [0, 96], sizes = [2, 32], strides = [1, 1]} : vector<2x128xf32> to vector<2x32xf32>
    %176 = arith.negf %175 : vector<2x32xf32>
    %177 = math.exp %176 : vector<2x32xf32>
    %cst_61 = arith.constant 1.000000e+00 : f32
    %178 = vector.broadcast %cst_61 : f32 to vector<2x32xf32>
    %179 = arith.addf %178, %177 : vector<2x32xf32>
    %180 = arith.divf %178, %179 : vector<2x32xf32>
    %181 = arith.mulf %172, %138 : vector<2x32xf32>
    %182 = arith.mulf %166, %174 : vector<2x32xf32>
    %183 = arith.addf %181, %182 : vector<2x32xf32>
    %184 = math.tanh %183 : vector<2x32xf32>
    %185 = arith.mulf %180, %184 : vector<2x32xf32>
    %186 = vector.extract_strided_slice %160 {offsets = [0, 0], sizes = [2, 32], strides = [1, 1]} : vector<2x128xf32> to vector<2x32xf32>
    %187 = arith.negf %186 : vector<2x32xf32>
    %188 = math.exp %187 : vector<2x32xf32>
    %cst_62 = arith.constant 1.000000e+00 : f32
    %189 = vector.broadcast %cst_62 : f32 to vector<2x32xf32>
    %190 = arith.addf %189, %188 : vector<2x32xf32>
    %191 = arith.divf %189, %190 : vector<2x32xf32>
    %192 = vector.extract_strided_slice %160 {offsets = [0, 32], sizes = [2, 32], strides = [1, 1]} : vector<2x128xf32> to vector<2x32xf32>
    %193 = arith.negf %192 : vector<2x32xf32>
    %194 = math.exp %193 : vector<2x32xf32>
    %cst_63 = arith.constant 1.000000e+00 : f32
    %195 = vector.broadcast %cst_63 : f32 to vector<2x32xf32>
    %196 = arith.addf %195, %194 : vector<2x32xf32>
    %197 = arith.divf %195, %196 : vector<2x32xf32>
    %198 = vector.extract_strided_slice %160 {offsets = [0, 64], sizes = [2, 32], strides = [1, 1]} : vector<2x128xf32> to vector<2x32xf32>
    %199 = math.tanh %198 : vector<2x32xf32>
    %200 = vector.extract_strided_slice %160 {offsets = [0, 96], sizes = [2, 32], strides = [1, 1]} : vector<2x128xf32> to vector<2x32xf32>
    %201 = arith.negf %200 : vector<2x32xf32>
    %202 = math.exp %201 : vector<2x32xf32>
    %cst_64 = arith.constant 1.000000e+00 : f32
    %203 = vector.broadcast %cst_64 : f32 to vector<2x32xf32>
    %204 = arith.addf %203, %202 : vector<2x32xf32>
    %205 = arith.divf %203, %204 : vector<2x32xf32>
    %206 = arith.mulf %197, %144 : vector<2x32xf32>
    %207 = arith.mulf %191, %199 : vector<2x32xf32>
    %208 = arith.addf %206, %207 : vector<2x32xf32>
    %209 = math.tanh %208 : vector<2x32xf32>
    %210 = arith.mulf %205, %209 : vector<2x32xf32>
    %211 = vector.broadcast %c1_i32 : i32 to vector<2x1xi32>
    %212 = arith.cmpi slt, %211, %45 : vector<2x1xi32>
    %213 = vector.broadcast %145 : i32 to vector<2x1xi32>
    %214 = arith.cmpi slt, %213, %45 : vector<2x1xi32>
    %cst_65 = arith.constant 0.000000e+00 : f32
    %215 = vector.shape_cast %212 : vector<2x1xi1> to vector<2x1xi1>
    %216 = vector.broadcast %215 : vector<2x1xi1> to vector<2x32xi1>
    %217 = vector.broadcast %cst_65 : f32 to vector<2x32xf32>
    %218 = arith.select %216, %185, %217 : vector<2x32xi1>, vector<2x32xf32>
    %219 = arith.index_cast %c1_i32 : i32 to index
    %c0_66 = arith.constant 0 : index
    %c0_67 = arith.constant 0 : index
    %220 = vector.load %arg14[%219, %c0_66, %c0_67] : memref<8x2x32xf32, #tpu.memory_space<vmem>>, vector<1x2x32xf32>
    %221 = vector.shape_cast %220 : vector<1x2x32xf32> to vector<2x32xf32>
    %222 = vector.shape_cast %218 : vector<2x32xf32> to vector<1x2x32xf32>
    tpu.vector_store %arg14[%219, %c0_66, %c0_67], %222 {strides = array<i32>} : memref<8x2x32xf32, #tpu.memory_space<vmem>>, vector<1x2x32xf32>,
    %cst_68 = arith.constant 0.000000e+00 : f32
    %223 = vector.shape_cast %214 : vector<2x1xi1> to vector<2x1xi1>
    %224 = vector.broadcast %223 : vector<2x1xi1> to vector<2x32xi1>
    %225 = vector.broadcast %cst_68 : f32 to vector<2x32xf32>
    %226 = arith.select %224, %210, %225 : vector<2x32xi1>, vector<2x32xf32>
    %227 = arith.index_cast %145 : i32 to index
    %c0_69 = arith.constant 0 : index
    %c0_70 = arith.constant 0 : index
    %228 = vector.load %arg15[%227, %c0_69, %c0_70] : memref<8x2x32xf32, #tpu.memory_space<vmem>>, vector<1x2x32xf32>
    %229 = vector.shape_cast %228 : vector<1x2x32xf32> to vector<2x32xf32>
    %230 = vector.shape_cast %226 : vector<2x32xf32> to vector<1x2x32xf32>
    tpu.vector_store %arg15[%227, %c0_69, %c0_70], %230 {strides = array<i32>} : memref<8x2x32xf32, #tpu.memory_space<vmem>>, vector<1x2x32xf32>,
    %231 = vector.shape_cast %212 : vector<2x1xi1> to vector<2x1xi1>
    %232 = vector.broadcast %231 : vector<2x1xi1> to vector<2x32xi1>
    %233 = arith.select %232, %185, %135 : vector<2x32xi1>, vector<2x32xf32>
    %234 = vector.shape_cast %212 : vector<2x1xi1> to vector<2x1xi1>
    %235 = vector.broadcast %234 : vector<2x1xi1> to vector<2x32xi1>
    %236 = arith.select %235, %183, %138 : vector<2x32xi1>, vector<2x32xf32>
    %237 = vector.shape_cast %214 : vector<2x1xi1> to vector<2x1xi1>
    %238 = vector.broadcast %237 : vector<2x1xi1> to vector<2x32xi1>
    %239 = arith.select %238, %210, %141 : vector<2x32xi1>, vector<2x32xf32>
    %240 = vector.shape_cast %214 : vector<2x1xi1> to vector<2x1xi1>
    %241 = vector.broadcast %240 : vector<2x1xi1> to vector<2x32xi1>
    %242 = arith.select %241, %208, %144 : vector<2x32xi1>, vector<2x32xf32>
    %c2_i32 = arith.constant 2 : i32
    %c7_i32_71 = arith.constant 7 : i32
    %243 = arith.subi %c7_i32_71, %c2_i32 : i32
    %244 = tpu.concatenate %233, %239 in 1 : vector<2x32xf32>, vector<2x32xf32> -> vector<2x64xf32>
    %245 = arith.truncf %244 : vector<2x64xf32> to vector<2x64xbf16>
    %cst_72 = arith.constant dense<0.000000e+00> : vector<2x256xf32>
    %246 = tpu.matmul %245, %10, %cst_72 {dimension_numbers = #tpu.dot_dimension_numbers<[1], [0], [0], [1], [0, 0, 1, 1], [], []>} : vector<2x64xbf16>, vector<64x256xbf16>, vector<2x256xf32> -> vector<2x256xf32>
    %247 = vector.extract_strided_slice %246 {offsets = [0, 0], sizes = [2, 128], strides = [1, 1]} : vector<2x256xf32> to vector<2x128xf32>
    %248 = arith.index_cast %c2_i32 : i32 to index
    %c0_73 = arith.constant 0 : index
    %c0_74 = arith.constant 0 : index
    %249 = vector.load %arg12[%248, %c0_73, %c0_74] : memref<8x2x128xbf16, #tpu.memory_space<vmem>>, vector<1x2x128xbf16>
    %250 = vector.shape_cast %249 : vector<1x2x128xbf16> to vector<2x128xbf16>
    %251 = arith.extf %250 : vector<2x128xbf16> to vector<2x128xf32>
    %252 = arith.addf %247, %251 : vector<2x128xf32>
    %253 = vector.extract_strided_slice %246 {offsets = [0, 128], sizes = [2, 128], strides = [1, 1]} : vector<2x256xf32> to vector<2x128xf32>
    %254 = arith.index_cast %243 : i32 to index
    %c0_75 = arith.constant 0 : index
    %c0_76 = arith.constant 0 : index
    %255 = vector.load %arg13[%254, %c0_75, %c0_76] : memref<8x2x128xbf16, #tpu.memory_space<vmem>>, vector<1x2x128xbf16>
    %256 = vector.shape_cast %255 : vector<1x2x128xbf16> to vector<2x128xbf16>
    %257 = arith.extf %256 : vector<2x128xbf16> to vector<2x128xf32>
    %258 = arith.addf %253, %257 : vector<2x128xf32>
    %259 = vector.extract_strided_slice %252 {offsets = [0, 0], sizes = [2, 32], strides = [1, 1]} : vector<2x128xf32> to vector<2x32xf32>
    %260 = arith.negf %259 : vector<2x32xf32>
    %261 = math.exp %260 : vector<2x32xf32>
    %cst_77 = arith.constant 1.000000e+00 : f32
    %262 = vector.broadcast %cst_77 : f32 to vector<2x32xf32>
    %263 = arith.addf %262, %261 : vector<2x32xf32>
    %264 = arith.divf %262, %263 : vector<2x32xf32>
    %265 = vector.extract_strided_slice %252 {offsets = [0, 32], sizes = [2, 32], strides = [1, 1]} : vector<2x128xf32> to vector<2x32xf32>
    %266 = arith.negf %265 : vector<2x32xf32>
    %267 = math.exp %266 : vector<2x32xf32>
    %cst_78 = arith.constant 1.000000e+00 : f32
    %268 = vector.broadcast %cst_78 : f32 to vector<2x32xf32>
    %269 = arith.addf %268, %267 : vector<2x32xf32>
    %270 = arith.divf %268, %269 : vector<2x32xf32>
    %271 = vector.extract_strided_slice %252 {offsets = [0, 64], sizes = [2, 32], strides = [1, 1]} : vector<2x128xf32> to vector<2x32xf32>
    %272 = math.tanh %271 : vector<2x32xf32>
    %273 = vector.extract_strided_slice %252 {offsets = [0, 96], sizes = [2, 32], strides = [1, 1]} : vector<2x128xf32> to vector<2x32xf32>
    %274 = arith.negf %273 : vector<2x32xf32>
    %275 = math.exp %274 : vector<2x32xf32>
    %cst_79 = arith.constant 1.000000e+00 : f32
    %276 = vector.broadcast %cst_79 : f32 to vector<2x32xf32>
    %277 = arith.addf %276, %275 : vector<2x32xf32>
    %278 = arith.divf %276, %277 : vector<2x32xf32>
    %279 = arith.mulf %270, %236 : vector<2x32xf32>
    %280 = arith.mulf %264, %272 : vector<2x32xf32>
    %281 = arith.addf %279, %280 : vector<2x32xf32>
    %282 = math.tanh %281 : vector<2x32xf32>
    %283 = arith.mulf %278, %282 : vector<2x32xf32>
    %284 = vector.extract_strided_slice %258 {offsets = [0, 0], sizes = [2, 32], strides = [1, 1]} : vector<2x128xf32> to vector<2x32xf32>
    %285 = arith.negf %284 : vector<2x32xf32>
    %286 = math.exp %285 : vector<2x32xf32>
    %cst_80 = arith.constant 1.000000e+00 : f32
    %287 = vector.broadcast %cst_80 : f32 to vector<2x32xf32>
    %288 = arith.addf %287, %286 : vector<2x32xf32>
    %289 = arith.divf %287, %288 : vector<2x32xf32>
    %290 = vector.extract_strided_slice %258 {offsets = [0, 32], sizes = [2, 32], strides = [1, 1]} : vector<2x128xf32> to vector<2x32xf32>
    %291 = arith.negf %290 : vector<2x32xf32>
    %292 = math.exp %291 : vector<2x32xf32>
    %cst_81 = arith.constant 1.000000e+00 : f32
    %293 = vector.broadcast %cst_81 : f32 to vector<2x32xf32>
    %294 = arith.addf %293, %292 : vector<2x32xf32>
    %295 = arith.divf %293, %294 : vector<2x32xf32>
    %296 = vector.extract_strided_slice %258 {offsets = [0, 64], sizes = [2, 32], strides = [1, 1]} : vector<2x128xf32> to vector<2x32xf32>
    %297 = math.tanh %296 : vector<2x32xf32>
    %298 = vector.extract_strided_slice %258 {offsets = [0, 96], sizes = [2, 32], strides = [1, 1]} : vector<2x128xf32> to vector<2x32xf32>
    %299 = arith.negf %298 : vector<2x32xf32>
    %300 = math.exp %299 : vector<2x32xf32>
    %cst_82 = arith.constant 1.000000e+00 : f32
    %301 = vector.broadcast %cst_82 : f32 to vector<2x32xf32>
    %302 = arith.addf %301, %300 : vector<2x32xf32>
    %303 = arith.divf %301, %302 : vector<2x32xf32>
    %304 = arith.mulf %295, %242 : vector<2x32xf32>
    %305 = arith.mulf %289, %297 : vector<2x32xf32>
    %306 = arith.addf %304, %305 : vector<2x32xf32>
    %307 = math.tanh %306 : vector<2x32xf32>
    %308 = arith.mulf %303, %307 : vector<2x32xf32>
    %309 = vector.broadcast %c2_i32 : i32 to vector<2x1xi32>
    %310 = arith.cmpi slt, %309, %45 : vector<2x1xi32>
    %311 = vector.broadcast %243 : i32 to vector<2x1xi32>
    %312 = arith.cmpi slt, %311, %45 : vector<2x1xi32>
    %cst_83 = arith.constant 0.000000e+00 : f32
    %313 = vector.shape_cast %310 : vector<2x1xi1> to vector<2x1xi1>
    %314 = vector.broadcast %313 : vector<2x1xi1> to vector<2x32xi1>
    %315 = vector.broadcast %cst_83 : f32 to vector<2x32xf32>
    %316 = arith.select %314, %283, %315 : vector<2x32xi1>, vector<2x32xf32>
    %317 = arith.index_cast %c2_i32 : i32 to index
    %c0_84 = arith.constant 0 : index
    %c0_85 = arith.constant 0 : index
    %318 = vector.load %arg14[%317, %c0_84, %c0_85] : memref<8x2x32xf32, #tpu.memory_space<vmem>>, vector<1x2x32xf32>
    %319 = vector.shape_cast %318 : vector<1x2x32xf32> to vector<2x32xf32>
    %320 = vector.shape_cast %316 : vector<2x32xf32> to vector<1x2x32xf32>
    tpu.vector_store %arg14[%317, %c0_84, %c0_85], %320 {strides = array<i32>} : memref<8x2x32xf32, #tpu.memory_space<vmem>>, vector<1x2x32xf32>,
    %cst_86 = arith.constant 0.000000e+00 : f32
    %321 = vector.shape_cast %312 : vector<2x1xi1> to vector<2x1xi1>
    %322 = vector.broadcast %321 : vector<2x1xi1> to vector<2x32xi1>
    %323 = vector.broadcast %cst_86 : f32 to vector<2x32xf32>
    %324 = arith.select %322, %308, %323 : vector<2x32xi1>, vector<2x32xf32>
    %325 = arith.index_cast %243 : i32 to index
    %c0_87 = arith.constant 0 : index
    %c0_88 = arith.constant 0 : index
    %326 = vector.load %arg15[%325, %c0_87, %c0_88] : memref<8x2x32xf32, #tpu.memory_space<vmem>>, vector<1x2x32xf32>
    %327 = vector.shape_cast %326 : vector<1x2x32xf32> to vector<2x32xf32>
    %328 = vector.shape_cast %324 : vector<2x32xf32> to vector<1x2x32xf32>
    tpu.vector_store %arg15[%325, %c0_87, %c0_88], %328 {strides = array<i32>} : memref<8x2x32xf32, #tpu.memory_space<vmem>>, vector<1x2x32xf32>,
    %329 = vector.shape_cast %310 : vector<2x1xi1> to vector<2x1xi1>
    %330 = vector.broadcast %329 : vector<2x1xi1> to vector<2x32xi1>
    %331 = arith.select %330, %283, %233 : vector<2x32xi1>, vector<2x32xf32>
    %332 = vector.shape_cast %310 : vector<2x1xi1> to vector<2x1xi1>
    %333 = vector.broadcast %332 : vector<2x1xi1> to vector<2x32xi1>
    %334 = arith.select %333, %281, %236 : vector<2x32xi1>, vector<2x32xf32>
    %335 = vector.shape_cast %312 : vector<2x1xi1> to vector<2x1xi1>
    %336 = vector.broadcast %335 : vector<2x1xi1> to vector<2x32xi1>
    %337 = arith.select %336, %308, %239 : vector<2x32xi1>, vector<2x32xf32>
    %338 = vector.shape_cast %312 : vector<2x1xi1> to vector<2x1xi1>
    %339 = vector.broadcast %338 : vector<2x1xi1> to vector<2x32xi1>
    %340 = arith.select %339, %306, %242 : vector<2x32xi1>, vector<2x32xf32>
    %c3_i32 = arith.constant 3 : i32
    %c7_i32_89 = arith.constant 7 : i32
    %341 = arith.subi %c7_i32_89, %c3_i32 : i32
    %342 = tpu.concatenate %331, %337 in 1 : vector<2x32xf32>, vector<2x32xf32> -> vector<2x64xf32>
    %343 = arith.truncf %342 : vector<2x64xf32> to vector<2x64xbf16>
    %cst_90 = arith.constant dense<0.000000e+00> : vector<2x256xf32>
    %344 = tpu.matmul %343, %10, %cst_90 {dimension_numbers = #tpu.dot_dimension_numbers<[1], [0], [0], [1], [0, 0, 1, 1], [], []>} : vector<2x64xbf16>, vector<64x256xbf16>, vector<2x256xf32> -> vector<2x256xf32>
    %345 = vector.extract_strided_slice %344 {offsets = [0, 0], sizes = [2, 128], strides = [1, 1]} : vector<2x256xf32> to vector<2x128xf32>
    %346 = arith.index_cast %c3_i32 : i32 to index
    %c0_91 = arith.constant 0 : index
    %c0_92 = arith.constant 0 : index
    %347 = vector.load %arg12[%346, %c0_91, %c0_92] : memref<8x2x128xbf16, #tpu.memory_space<vmem>>, vector<1x2x128xbf16>
    %348 = vector.shape_cast %347 : vector<1x2x128xbf16> to vector<2x128xbf16>
    %349 = arith.extf %348 : vector<2x128xbf16> to vector<2x128xf32>
    %350 = arith.addf %345, %349 : vector<2x128xf32>
    %351 = vector.extract_strided_slice %344 {offsets = [0, 128], sizes = [2, 128], strides = [1, 1]} : vector<2x256xf32> to vector<2x128xf32>
    %352 = arith.index_cast %341 : i32 to index
    %c0_93 = arith.constant 0 : index
    %c0_94 = arith.constant 0 : index
    %353 = vector.load %arg13[%352, %c0_93, %c0_94] : memref<8x2x128xbf16, #tpu.memory_space<vmem>>, vector<1x2x128xbf16>
    %354 = vector.shape_cast %353 : vector<1x2x128xbf16> to vector<2x128xbf16>
    %355 = arith.extf %354 : vector<2x128xbf16> to vector<2x128xf32>
    %356 = arith.addf %351, %355 : vector<2x128xf32>
    %357 = vector.extract_strided_slice %350 {offsets = [0, 0], sizes = [2, 32], strides = [1, 1]} : vector<2x128xf32> to vector<2x32xf32>
    %358 = arith.negf %357 : vector<2x32xf32>
    %359 = math.exp %358 : vector<2x32xf32>
    %cst_95 = arith.constant 1.000000e+00 : f32
    %360 = vector.broadcast %cst_95 : f32 to vector<2x32xf32>
    %361 = arith.addf %360, %359 : vector<2x32xf32>
    %362 = arith.divf %360, %361 : vector<2x32xf32>
    %363 = vector.extract_strided_slice %350 {offsets = [0, 32], sizes = [2, 32], strides = [1, 1]} : vector<2x128xf32> to vector<2x32xf32>
    %364 = arith.negf %363 : vector<2x32xf32>
    %365 = math.exp %364 : vector<2x32xf32>
    %cst_96 = arith.constant 1.000000e+00 : f32
    %366 = vector.broadcast %cst_96 : f32 to vector<2x32xf32>
    %367 = arith.addf %366, %365 : vector<2x32xf32>
    %368 = arith.divf %366, %367 : vector<2x32xf32>
    %369 = vector.extract_strided_slice %350 {offsets = [0, 64], sizes = [2, 32], strides = [1, 1]} : vector<2x128xf32> to vector<2x32xf32>
    %370 = math.tanh %369 : vector<2x32xf32>
    %371 = vector.extract_strided_slice %350 {offsets = [0, 96], sizes = [2, 32], strides = [1, 1]} : vector<2x128xf32> to vector<2x32xf32>
    %372 = arith.negf %371 : vector<2x32xf32>
    %373 = math.exp %372 : vector<2x32xf32>
    %cst_97 = arith.constant 1.000000e+00 : f32
    %374 = vector.broadcast %cst_97 : f32 to vector<2x32xf32>
    %375 = arith.addf %374, %373 : vector<2x32xf32>
    %376 = arith.divf %374, %375 : vector<2x32xf32>
    %377 = arith.mulf %368, %334 : vector<2x32xf32>
    %378 = arith.mulf %362, %370 : vector<2x32xf32>
    %379 = arith.addf %377, %378 : vector<2x32xf32>
    %380 = math.tanh %379 : vector<2x32xf32>
    %381 = arith.mulf %376, %380 : vector<2x32xf32>
    %382 = vector.extract_strided_slice %356 {offsets = [0, 0], sizes = [2, 32], strides = [1, 1]} : vector<2x128xf32> to vector<2x32xf32>
    %383 = arith.negf %382 : vector<2x32xf32>
    %384 = math.exp %383 : vector<2x32xf32>
    %cst_98 = arith.constant 1.000000e+00 : f32
    %385 = vector.broadcast %cst_98 : f32 to vector<2x32xf32>
    %386 = arith.addf %385, %384 : vector<2x32xf32>
    %387 = arith.divf %385, %386 : vector<2x32xf32>
    %388 = vector.extract_strided_slice %356 {offsets = [0, 32], sizes = [2, 32], strides = [1, 1]} : vector<2x128xf32> to vector<2x32xf32>
    %389 = arith.negf %388 : vector<2x32xf32>
    %390 = math.exp %389 : vector<2x32xf32>
    %cst_99 = arith.constant 1.000000e+00 : f32
    %391 = vector.broadcast %cst_99 : f32 to vector<2x32xf32>
    %392 = arith.addf %391, %390 : vector<2x32xf32>
    %393 = arith.divf %391, %392 : vector<2x32xf32>
    %394 = vector.extract_strided_slice %356 {offsets = [0, 64], sizes = [2, 32], strides = [1, 1]} : vector<2x128xf32> to vector<2x32xf32>
    %395 = math.tanh %394 : vector<2x32xf32>
    %396 = vector.extract_strided_slice %356 {offsets = [0, 96], sizes = [2, 32], strides = [1, 1]} : vector<2x128xf32> to vector<2x32xf32>
    %397 = arith.negf %396 : vector<2x32xf32>
    %398 = math.exp %397 : vector<2x32xf32>
    %cst_100 = arith.constant 1.000000e+00 : f32
    %399 = vector.broadcast %cst_100 : f32 to vector<2x32xf32>
    %400 = arith.addf %399, %398 : vector<2x32xf32>
    %401 = arith.divf %399, %400 : vector<2x32xf32>
    %402 = arith.mulf %393, %340 : vector<2x32xf32>
    %403 = arith.mulf %387, %395 : vector<2x32xf32>
    %404 = arith.addf %402, %403 : vector<2x32xf32>
    %405 = math.tanh %404 : vector<2x32xf32>
    %406 = arith.mulf %401, %405 : vector<2x32xf32>
    %407 = vector.broadcast %c3_i32 : i32 to vector<2x1xi32>
    %408 = arith.cmpi slt, %407, %45 : vector<2x1xi32>
    %409 = vector.broadcast %341 : i32 to vector<2x1xi32>
    %410 = arith.cmpi slt, %409, %45 : vector<2x1xi32>
    %cst_101 = arith.constant 0.000000e+00 : f32
    %411 = vector.shape_cast %408 : vector<2x1xi1> to vector<2x1xi1>
    %412 = vector.broadcast %411 : vector<2x1xi1> to vector<2x32xi1>
    %413 = vector.broadcast %cst_101 : f32 to vector<2x32xf32>
    %414 = arith.select %412, %381, %413 : vector<2x32xi1>, vector<2x32xf32>
    %415 = arith.index_cast %c3_i32 : i32 to index
    %c0_102 = arith.constant 0 : index
    %c0_103 = arith.constant 0 : index
    %416 = vector.load %arg14[%415, %c0_102, %c0_103] : memref<8x2x32xf32, #tpu.memory_space<vmem>>, vector<1x2x32xf32>
    %417 = vector.shape_cast %416 : vector<1x2x32xf32> to vector<2x32xf32>
    %418 = vector.shape_cast %414 : vector<2x32xf32> to vector<1x2x32xf32>
    tpu.vector_store %arg14[%415, %c0_102, %c0_103], %418 {strides = array<i32>} : memref<8x2x32xf32, #tpu.memory_space<vmem>>, vector<1x2x32xf32>,
    %cst_104 = arith.constant 0.000000e+00 : f32
    %419 = vector.shape_cast %410 : vector<2x1xi1> to vector<2x1xi1>
    %420 = vector.broadcast %419 : vector<2x1xi1> to vector<2x32xi1>
    %421 = vector.broadcast %cst_104 : f32 to vector<2x32xf32>
    %422 = arith.select %420, %406, %421 : vector<2x32xi1>, vector<2x32xf32>
    %423 = arith.index_cast %341 : i32 to index
    %c0_105 = arith.constant 0 : index
    %c0_106 = arith.constant 0 : index
    %424 = vector.load %arg15[%423, %c0_105, %c0_106] : memref<8x2x32xf32, #tpu.memory_space<vmem>>, vector<1x2x32xf32>
    %425 = vector.shape_cast %424 : vector<1x2x32xf32> to vector<2x32xf32>
    %426 = vector.shape_cast %422 : vector<2x32xf32> to vector<1x2x32xf32>
    tpu.vector_store %arg15[%423, %c0_105, %c0_106], %426 {strides = array<i32>} : memref<8x2x32xf32, #tpu.memory_space<vmem>>, vector<1x2x32xf32>,
    %427 = vector.shape_cast %408 : vector<2x1xi1> to vector<2x1xi1>
    %428 = vector.broadcast %427 : vector<2x1xi1> to vector<2x32xi1>
    %429 = arith.select %428, %381, %331 : vector<2x32xi1>, vector<2x32xf32>
    %430 = vector.shape_cast %408 : vector<2x1xi1> to vector<2x1xi1>
    %431 = vector.broadcast %430 : vector<2x1xi1> to vector<2x32xi1>
    %432 = arith.select %431, %379, %334 : vector<2x32xi1>, vector<2x32xf32>
    %433 = vector.shape_cast %410 : vector<2x1xi1> to vector<2x1xi1>
    %434 = vector.broadcast %433 : vector<2x1xi1> to vector<2x32xi1>
    %435 = arith.select %434, %406, %337 : vector<2x32xi1>, vector<2x32xf32>
    %436 = vector.shape_cast %410 : vector<2x1xi1> to vector<2x1xi1>
    %437 = vector.broadcast %436 : vector<2x1xi1> to vector<2x32xi1>
    %438 = arith.select %437, %404, %340 : vector<2x32xi1>, vector<2x32xf32>
    %c4_i32 = arith.constant 4 : i32
    %c7_i32_107 = arith.constant 7 : i32
    %439 = arith.subi %c7_i32_107, %c4_i32 : i32
    %440 = tpu.concatenate %429, %435 in 1 : vector<2x32xf32>, vector<2x32xf32> -> vector<2x64xf32>
    %441 = arith.truncf %440 : vector<2x64xf32> to vector<2x64xbf16>
    %cst_108 = arith.constant dense<0.000000e+00> : vector<2x256xf32>
    %442 = tpu.matmul %441, %10, %cst_108 {dimension_numbers = #tpu.dot_dimension_numbers<[1], [0], [0], [1], [0, 0, 1, 1], [], []>} : vector<2x64xbf16>, vector<64x256xbf16>, vector<2x256xf32> -> vector<2x256xf32>
    %443 = vector.extract_strided_slice %442 {offsets = [0, 0], sizes = [2, 128], strides = [1, 1]} : vector<2x256xf32> to vector<2x128xf32>
    %444 = arith.index_cast %c4_i32 : i32 to index
    %c0_109 = arith.constant 0 : index
    %c0_110 = arith.constant 0 : index
    %445 = vector.load %arg12[%444, %c0_109, %c0_110] : memref<8x2x128xbf16, #tpu.memory_space<vmem>>, vector<1x2x128xbf16>
    %446 = vector.shape_cast %445 : vector<1x2x128xbf16> to vector<2x128xbf16>
    %447 = arith.extf %446 : vector<2x128xbf16> to vector<2x128xf32>
    %448 = arith.addf %443, %447 : vector<2x128xf32>
    %449 = vector.extract_strided_slice %442 {offsets = [0, 128], sizes = [2, 128], strides = [1, 1]} : vector<2x256xf32> to vector<2x128xf32>
    %450 = arith.index_cast %439 : i32 to index
    %c0_111 = arith.constant 0 : index
    %c0_112 = arith.constant 0 : index
    %451 = vector.load %arg13[%450, %c0_111, %c0_112] : memref<8x2x128xbf16, #tpu.memory_space<vmem>>, vector<1x2x128xbf16>
    %452 = vector.shape_cast %451 : vector<1x2x128xbf16> to vector<2x128xbf16>
    %453 = arith.extf %452 : vector<2x128xbf16> to vector<2x128xf32>
    %454 = arith.addf %449, %453 : vector<2x128xf32>
    %455 = vector.extract_strided_slice %448 {offsets = [0, 0], sizes = [2, 32], strides = [1, 1]} : vector<2x128xf32> to vector<2x32xf32>
    %456 = arith.negf %455 : vector<2x32xf32>
    %457 = math.exp %456 : vector<2x32xf32>
    %cst_113 = arith.constant 1.000000e+00 : f32
    %458 = vector.broadcast %cst_113 : f32 to vector<2x32xf32>
    %459 = arith.addf %458, %457 : vector<2x32xf32>
    %460 = arith.divf %458, %459 : vector<2x32xf32>
    %461 = vector.extract_strided_slice %448 {offsets = [0, 32], sizes = [2, 32], strides = [1, 1]} : vector<2x128xf32> to vector<2x32xf32>
    %462 = arith.negf %461 : vector<2x32xf32>
    %463 = math.exp %462 : vector<2x32xf32>
    %cst_114 = arith.constant 1.000000e+00 : f32
    %464 = vector.broadcast %cst_114 : f32 to vector<2x32xf32>
    %465 = arith.addf %464, %463 : vector<2x32xf32>
    %466 = arith.divf %464, %465 : vector<2x32xf32>
    %467 = vector.extract_strided_slice %448 {offsets = [0, 64], sizes = [2, 32], strides = [1, 1]} : vector<2x128xf32> to vector<2x32xf32>
    %468 = math.tanh %467 : vector<2x32xf32>
    %469 = vector.extract_strided_slice %448 {offsets = [0, 96], sizes = [2, 32], strides = [1, 1]} : vector<2x128xf32> to vector<2x32xf32>
    %470 = arith.negf %469 : vector<2x32xf32>
    %471 = math.exp %470 : vector<2x32xf32>
    %cst_115 = arith.constant 1.000000e+00 : f32
    %472 = vector.broadcast %cst_115 : f32 to vector<2x32xf32>
    %473 = arith.addf %472, %471 : vector<2x32xf32>
    %474 = arith.divf %472, %473 : vector<2x32xf32>
    %475 = arith.mulf %466, %432 : vector<2x32xf32>
    %476 = arith.mulf %460, %468 : vector<2x32xf32>
    %477 = arith.addf %475, %476 : vector<2x32xf32>
    %478 = math.tanh %477 : vector<2x32xf32>
    %479 = arith.mulf %474, %478 : vector<2x32xf32>
    %480 = vector.extract_strided_slice %454 {offsets = [0, 0], sizes = [2, 32], strides = [1, 1]} : vector<2x128xf32> to vector<2x32xf32>
    %481 = arith.negf %480 : vector<2x32xf32>
    %482 = math.exp %481 : vector<2x32xf32>
    %cst_116 = arith.constant 1.000000e+00 : f32
    %483 = vector.broadcast %cst_116 : f32 to vector<2x32xf32>
    %484 = arith.addf %483, %482 : vector<2x32xf32>
    %485 = arith.divf %483, %484 : vector<2x32xf32>
    %486 = vector.extract_strided_slice %454 {offsets = [0, 32], sizes = [2, 32], strides = [1, 1]} : vector<2x128xf32> to vector<2x32xf32>
    %487 = arith.negf %486 : vector<2x32xf32>
    %488 = math.exp %487 : vector<2x32xf32>
    %cst_117 = arith.constant 1.000000e+00 : f32
    %489 = vector.broadcast %cst_117 : f32 to vector<2x32xf32>
    %490 = arith.addf %489, %488 : vector<2x32xf32>
    %491 = arith.divf %489, %490 : vector<2x32xf32>
    %492 = vector.extract_strided_slice %454 {offsets = [0, 64], sizes = [2, 32], strides = [1, 1]} : vector<2x128xf32> to vector<2x32xf32>
    %493 = math.tanh %492 : vector<2x32xf32>
    %494 = vector.extract_strided_slice %454 {offsets = [0, 96], sizes = [2, 32], strides = [1, 1]} : vector<2x128xf32> to vector<2x32xf32>
    %495 = arith.negf %494 : vector<2x32xf32>
    %496 = math.exp %495 : vector<2x32xf32>
    %cst_118 = arith.constant 1.000000e+00 : f32
    %497 = vector.broadcast %cst_118 : f32 to vector<2x32xf32>
    %498 = arith.addf %497, %496 : vector<2x32xf32>
    %499 = arith.divf %497, %498 : vector<2x32xf32>
    %500 = arith.mulf %491, %438 : vector<2x32xf32>
    %501 = arith.mulf %485, %493 : vector<2x32xf32>
    %502 = arith.addf %500, %501 : vector<2x32xf32>
    %503 = math.tanh %502 : vector<2x32xf32>
    %504 = arith.mulf %499, %503 : vector<2x32xf32>
    %505 = vector.broadcast %c4_i32 : i32 to vector<2x1xi32>
    %506 = arith.cmpi slt, %505, %45 : vector<2x1xi32>
    %507 = vector.broadcast %439 : i32 to vector<2x1xi32>
    %508 = arith.cmpi slt, %507, %45 : vector<2x1xi32>
    %cst_119 = arith.constant 0.000000e+00 : f32
    %509 = vector.shape_cast %506 : vector<2x1xi1> to vector<2x1xi1>
    %510 = vector.broadcast %509 : vector<2x1xi1> to vector<2x32xi1>
    %511 = vector.broadcast %cst_119 : f32 to vector<2x32xf32>
    %512 = arith.select %510, %479, %511 : vector<2x32xi1>, vector<2x32xf32>
    %513 = arith.index_cast %c4_i32 : i32 to index
    %c0_120 = arith.constant 0 : index
    %c0_121 = arith.constant 0 : index
    %514 = vector.load %arg14[%513, %c0_120, %c0_121] : memref<8x2x32xf32, #tpu.memory_space<vmem>>, vector<1x2x32xf32>
    %515 = vector.shape_cast %514 : vector<1x2x32xf32> to vector<2x32xf32>
    %516 = vector.shape_cast %512 : vector<2x32xf32> to vector<1x2x32xf32>
    tpu.vector_store %arg14[%513, %c0_120, %c0_121], %516 {strides = array<i32>} : memref<8x2x32xf32, #tpu.memory_space<vmem>>, vector<1x2x32xf32>,
    %cst_122 = arith.constant 0.000000e+00 : f32
    %517 = vector.shape_cast %508 : vector<2x1xi1> to vector<2x1xi1>
    %518 = vector.broadcast %517 : vector<2x1xi1> to vector<2x32xi1>
    %519 = vector.broadcast %cst_122 : f32 to vector<2x32xf32>
    %520 = arith.select %518, %504, %519 : vector<2x32xi1>, vector<2x32xf32>
    %521 = arith.index_cast %439 : i32 to index
    %c0_123 = arith.constant 0 : index
    %c0_124 = arith.constant 0 : index
    %522 = vector.load %arg15[%521, %c0_123, %c0_124] : memref<8x2x32xf32, #tpu.memory_space<vmem>>, vector<1x2x32xf32>
    %523 = vector.shape_cast %522 : vector<1x2x32xf32> to vector<2x32xf32>
    %524 = vector.shape_cast %520 : vector<2x32xf32> to vector<1x2x32xf32>
    tpu.vector_store %arg15[%521, %c0_123, %c0_124], %524 {strides = array<i32>} : memref<8x2x32xf32, #tpu.memory_space<vmem>>, vector<1x2x32xf32>,
    %525 = vector.shape_cast %506 : vector<2x1xi1> to vector<2x1xi1>
    %526 = vector.broadcast %525 : vector<2x1xi1> to vector<2x32xi1>
    %527 = arith.select %526, %479, %429 : vector<2x32xi1>, vector<2x32xf32>
    %528 = vector.shape_cast %506 : vector<2x1xi1> to vector<2x1xi1>
    %529 = vector.broadcast %528 : vector<2x1xi1> to vector<2x32xi1>
    %530 = arith.select %529, %477, %432 : vector<2x32xi1>, vector<2x32xf32>
    %531 = vector.shape_cast %508 : vector<2x1xi1> to vector<2x1xi1>
    %532 = vector.broadcast %531 : vector<2x1xi1> to vector<2x32xi1>
    %533 = arith.select %532, %504, %435 : vector<2x32xi1>, vector<2x32xf32>
    %534 = vector.shape_cast %508 : vector<2x1xi1> to vector<2x1xi1>
    %535 = vector.broadcast %534 : vector<2x1xi1> to vector<2x32xi1>
    %536 = arith.select %535, %502, %438 : vector<2x32xi1>, vector<2x32xf32>
    %c5_i32 = arith.constant 5 : i32
    %c7_i32_125 = arith.constant 7 : i32
    %537 = arith.subi %c7_i32_125, %c5_i32 : i32
    %538 = tpu.concatenate %527, %533 in 1 : vector<2x32xf32>, vector<2x32xf32> -> vector<2x64xf32>
    %539 = arith.truncf %538 : vector<2x64xf32> to vector<2x64xbf16>
    %cst_126 = arith.constant dense<0.000000e+00> : vector<2x256xf32>
    %540 = tpu.matmul %539, %10, %cst_126 {dimension_numbers = #tpu.dot_dimension_numbers<[1], [0], [0], [1], [0, 0, 1, 1], [], []>} : vector<2x64xbf16>, vector<64x256xbf16>, vector<2x256xf32> -> vector<2x256xf32>
    %541 = vector.extract_strided_slice %540 {offsets = [0, 0], sizes = [2, 128], strides = [1, 1]} : vector<2x256xf32> to vector<2x128xf32>
    %542 = arith.index_cast %c5_i32 : i32 to index
    %c0_127 = arith.constant 0 : index
    %c0_128 = arith.constant 0 : index
    %543 = vector.load %arg12[%542, %c0_127, %c0_128] : memref<8x2x128xbf16, #tpu.memory_space<vmem>>, vector<1x2x128xbf16>
    %544 = vector.shape_cast %543 : vector<1x2x128xbf16> to vector<2x128xbf16>
    %545 = arith.extf %544 : vector<2x128xbf16> to vector<2x128xf32>
    %546 = arith.addf %541, %545 : vector<2x128xf32>
    %547 = vector.extract_strided_slice %540 {offsets = [0, 128], sizes = [2, 128], strides = [1, 1]} : vector<2x256xf32> to vector<2x128xf32>
    %548 = arith.index_cast %537 : i32 to index
    %c0_129 = arith.constant 0 : index
    %c0_130 = arith.constant 0 : index
    %549 = vector.load %arg13[%548, %c0_129, %c0_130] : memref<8x2x128xbf16, #tpu.memory_space<vmem>>, vector<1x2x128xbf16>
    %550 = vector.shape_cast %549 : vector<1x2x128xbf16> to vector<2x128xbf16>
    %551 = arith.extf %550 : vector<2x128xbf16> to vector<2x128xf32>
    %552 = arith.addf %547, %551 : vector<2x128xf32>
    %553 = vector.extract_strided_slice %546 {offsets = [0, 0], sizes = [2, 32], strides = [1, 1]} : vector<2x128xf32> to vector<2x32xf32>
    %554 = arith.negf %553 : vector<2x32xf32>
    %555 = math.exp %554 : vector<2x32xf32>
    %cst_131 = arith.constant 1.000000e+00 : f32
    %556 = vector.broadcast %cst_131 : f32 to vector<2x32xf32>
    %557 = arith.addf %556, %555 : vector<2x32xf32>
    %558 = arith.divf %556, %557 : vector<2x32xf32>
    %559 = vector.extract_strided_slice %546 {offsets = [0, 32], sizes = [2, 32], strides = [1, 1]} : vector<2x128xf32> to vector<2x32xf32>
    %560 = arith.negf %559 : vector<2x32xf32>
    %561 = math.exp %560 : vector<2x32xf32>
    %cst_132 = arith.constant 1.000000e+00 : f32
    %562 = vector.broadcast %cst_132 : f32 to vector<2x32xf32>
    %563 = arith.addf %562, %561 : vector<2x32xf32>
    %564 = arith.divf %562, %563 : vector<2x32xf32>
    %565 = vector.extract_strided_slice %546 {offsets = [0, 64], sizes = [2, 32], strides = [1, 1]} : vector<2x128xf32> to vector<2x32xf32>
    %566 = math.tanh %565 : vector<2x32xf32>
    %567 = vector.extract_strided_slice %546 {offsets = [0, 96], sizes = [2, 32], strides = [1, 1]} : vector<2x128xf32> to vector<2x32xf32>
    %568 = arith.negf %567 : vector<2x32xf32>
    %569 = math.exp %568 : vector<2x32xf32>
    %cst_133 = arith.constant 1.000000e+00 : f32
    %570 = vector.broadcast %cst_133 : f32 to vector<2x32xf32>
    %571 = arith.addf %570, %569 : vector<2x32xf32>
    %572 = arith.divf %570, %571 : vector<2x32xf32>
    %573 = arith.mulf %564, %530 : vector<2x32xf32>
    %574 = arith.mulf %558, %566 : vector<2x32xf32>
    %575 = arith.addf %573, %574 : vector<2x32xf32>
    %576 = math.tanh %575 : vector<2x32xf32>
    %577 = arith.mulf %572, %576 : vector<2x32xf32>
    %578 = vector.extract_strided_slice %552 {offsets = [0, 0], sizes = [2, 32], strides = [1, 1]} : vector<2x128xf32> to vector<2x32xf32>
    %579 = arith.negf %578 : vector<2x32xf32>
    %580 = math.exp %579 : vector<2x32xf32>
    %cst_134 = arith.constant 1.000000e+00 : f32
    %581 = vector.broadcast %cst_134 : f32 to vector<2x32xf32>
    %582 = arith.addf %581, %580 : vector<2x32xf32>
    %583 = arith.divf %581, %582 : vector<2x32xf32>
    %584 = vector.extract_strided_slice %552 {offsets = [0, 32], sizes = [2, 32], strides = [1, 1]} : vector<2x128xf32> to vector<2x32xf32>
    %585 = arith.negf %584 : vector<2x32xf32>
    %586 = math.exp %585 : vector<2x32xf32>
    %cst_135 = arith.constant 1.000000e+00 : f32
    %587 = vector.broadcast %cst_135 : f32 to vector<2x32xf32>
    %588 = arith.addf %587, %586 : vector<2x32xf32>
    %589 = arith.divf %587, %588 : vector<2x32xf32>
    %590 = vector.extract_strided_slice %552 {offsets = [0, 64], sizes = [2, 32], strides = [1, 1]} : vector<2x128xf32> to vector<2x32xf32>
    %591 = math.tanh %590 : vector<2x32xf32>
    %592 = vector.extract_strided_slice %552 {offsets = [0, 96], sizes = [2, 32], strides = [1, 1]} : vector<2x128xf32> to vector<2x32xf32>
    %593 = arith.negf %592 : vector<2x32xf32>
    %594 = math.exp %593 : vector<2x32xf32>
    %cst_136 = arith.constant 1.000000e+00 : f32
    %595 = vector.broadcast %cst_136 : f32 to vector<2x32xf32>
    %596 = arith.addf %595, %594 : vector<2x32xf32>
    %597 = arith.divf %595, %596 : vector<2x32xf32>
    %598 = arith.mulf %589, %536 : vector<2x32xf32>
    %599 = arith.mulf %583, %591 : vector<2x32xf32>
    %600 = arith.addf %598, %599 : vector<2x32xf32>
    %601 = math.tanh %600 : vector<2x32xf32>
    %602 = arith.mulf %597, %601 : vector<2x32xf32>
    %603 = vector.broadcast %c5_i32 : i32 to vector<2x1xi32>
    %604 = arith.cmpi slt, %603, %45 : vector<2x1xi32>
    %605 = vector.broadcast %537 : i32 to vector<2x1xi32>
    %606 = arith.cmpi slt, %605, %45 : vector<2x1xi32>
    %cst_137 = arith.constant 0.000000e+00 : f32
    %607 = vector.shape_cast %604 : vector<2x1xi1> to vector<2x1xi1>
    %608 = vector.broadcast %607 : vector<2x1xi1> to vector<2x32xi1>
    %609 = vector.broadcast %cst_137 : f32 to vector<2x32xf32>
    %610 = arith.select %608, %577, %609 : vector<2x32xi1>, vector<2x32xf32>
    %611 = arith.index_cast %c5_i32 : i32 to index
    %c0_138 = arith.constant 0 : index
    %c0_139 = arith.constant 0 : index
    %612 = vector.load %arg14[%611, %c0_138, %c0_139] : memref<8x2x32xf32, #tpu.memory_space<vmem>>, vector<1x2x32xf32>
    %613 = vector.shape_cast %612 : vector<1x2x32xf32> to vector<2x32xf32>
    %614 = vector.shape_cast %610 : vector<2x32xf32> to vector<1x2x32xf32>
    tpu.vector_store %arg14[%611, %c0_138, %c0_139], %614 {strides = array<i32>} : memref<8x2x32xf32, #tpu.memory_space<vmem>>, vector<1x2x32xf32>,
    %cst_140 = arith.constant 0.000000e+00 : f32
    %615 = vector.shape_cast %606 : vector<2x1xi1> to vector<2x1xi1>
    %616 = vector.broadcast %615 : vector<2x1xi1> to vector<2x32xi1>
    %617 = vector.broadcast %cst_140 : f32 to vector<2x32xf32>
    %618 = arith.select %616, %602, %617 : vector<2x32xi1>, vector<2x32xf32>
    %619 = arith.index_cast %537 : i32 to index
    %c0_141 = arith.constant 0 : index
    %c0_142 = arith.constant 0 : index
    %620 = vector.load %arg15[%619, %c0_141, %c0_142] : memref<8x2x32xf32, #tpu.memory_space<vmem>>, vector<1x2x32xf32>
    %621 = vector.shape_cast %620 : vector<1x2x32xf32> to vector<2x32xf32>
    %622 = vector.shape_cast %618 : vector<2x32xf32> to vector<1x2x32xf32>
    tpu.vector_store %arg15[%619, %c0_141, %c0_142], %622 {strides = array<i32>} : memref<8x2x32xf32, #tpu.memory_space<vmem>>, vector<1x2x32xf32>,
    %623 = vector.shape_cast %604 : vector<2x1xi1> to vector<2x1xi1>
    %624 = vector.broadcast %623 : vector<2x1xi1> to vector<2x32xi1>
    %625 = arith.select %624, %577, %527 : vector<2x32xi1>, vector<2x32xf32>
    %626 = vector.shape_cast %604 : vector<2x1xi1> to vector<2x1xi1>
    %627 = vector.broadcast %626 : vector<2x1xi1> to vector<2x32xi1>
    %628 = arith.select %627, %575, %530 : vector<2x32xi1>, vector<2x32xf32>
    %629 = vector.shape_cast %606 : vector<2x1xi1> to vector<2x1xi1>
    %630 = vector.broadcast %629 : vector<2x1xi1> to vector<2x32xi1>
    %631 = arith.select %630, %602, %533 : vector<2x32xi1>, vector<2x32xf32>
    %632 = vector.shape_cast %606 : vector<2x1xi1> to vector<2x1xi1>
    %633 = vector.broadcast %632 : vector<2x1xi1> to vector<2x32xi1>
    %634 = arith.select %633, %600, %536 : vector<2x32xi1>, vector<2x32xf32>
    %c6_i32 = arith.constant 6 : i32
    %c7_i32_143 = arith.constant 7 : i32
    %635 = arith.subi %c7_i32_143, %c6_i32 : i32
    %636 = tpu.concatenate %625, %631 in 1 : vector<2x32xf32>, vector<2x32xf32> -> vector<2x64xf32>
    %637 = arith.truncf %636 : vector<2x64xf32> to vector<2x64xbf16>
    %cst_144 = arith.constant dense<0.000000e+00> : vector<2x256xf32>
    %638 = tpu.matmul %637, %10, %cst_144 {dimension_numbers = #tpu.dot_dimension_numbers<[1], [0], [0], [1], [0, 0, 1, 1], [], []>} : vector<2x64xbf16>, vector<64x256xbf16>, vector<2x256xf32> -> vector<2x256xf32>
    %639 = vector.extract_strided_slice %638 {offsets = [0, 0], sizes = [2, 128], strides = [1, 1]} : vector<2x256xf32> to vector<2x128xf32>
    %640 = arith.index_cast %c6_i32 : i32 to index
    %c0_145 = arith.constant 0 : index
    %c0_146 = arith.constant 0 : index
    %641 = vector.load %arg12[%640, %c0_145, %c0_146] : memref<8x2x128xbf16, #tpu.memory_space<vmem>>, vector<1x2x128xbf16>
    %642 = vector.shape_cast %641 : vector<1x2x128xbf16> to vector<2x128xbf16>
    %643 = arith.extf %642 : vector<2x128xbf16> to vector<2x128xf32>
    %644 = arith.addf %639, %643 : vector<2x128xf32>
    %645 = vector.extract_strided_slice %638 {offsets = [0, 128], sizes = [2, 128], strides = [1, 1]} : vector<2x256xf32> to vector<2x128xf32>
    %646 = arith.index_cast %635 : i32 to index
    %c0_147 = arith.constant 0 : index
    %c0_148 = arith.constant 0 : index
    %647 = vector.load %arg13[%646, %c0_147, %c0_148] : memref<8x2x128xbf16, #tpu.memory_space<vmem>>, vector<1x2x128xbf16>
    %648 = vector.shape_cast %647 : vector<1x2x128xbf16> to vector<2x128xbf16>
    %649 = arith.extf %648 : vector<2x128xbf16> to vector<2x128xf32>
    %650 = arith.addf %645, %649 : vector<2x128xf32>
    %651 = vector.extract_strided_slice %644 {offsets = [0, 0], sizes = [2, 32], strides = [1, 1]} : vector<2x128xf32> to vector<2x32xf32>
    %652 = arith.negf %651 : vector<2x32xf32>
    %653 = math.exp %652 : vector<2x32xf32>
    %cst_149 = arith.constant 1.000000e+00 : f32
    %654 = vector.broadcast %cst_149 : f32 to vector<2x32xf32>
    %655 = arith.addf %654, %653 : vector<2x32xf32>
    %656 = arith.divf %654, %655 : vector<2x32xf32>
    %657 = vector.extract_strided_slice %644 {offsets = [0, 32], sizes = [2, 32], strides = [1, 1]} : vector<2x128xf32> to vector<2x32xf32>
    %658 = arith.negf %657 : vector<2x32xf32>
    %659 = math.exp %658 : vector<2x32xf32>
    %cst_150 = arith.constant 1.000000e+00 : f32
    %660 = vector.broadcast %cst_150 : f32 to vector<2x32xf32>
    %661 = arith.addf %660, %659 : vector<2x32xf32>
    %662 = arith.divf %660, %661 : vector<2x32xf32>
    %663 = vector.extract_strided_slice %644 {offsets = [0, 64], sizes = [2, 32], strides = [1, 1]} : vector<2x128xf32> to vector<2x32xf32>
    %664 = math.tanh %663 : vector<2x32xf32>
    %665 = vector.extract_strided_slice %644 {offsets = [0, 96], sizes = [2, 32], strides = [1, 1]} : vector<2x128xf32> to vector<2x32xf32>
    %666 = arith.negf %665 : vector<2x32xf32>
    %667 = math.exp %666 : vector<2x32xf32>
    %cst_151 = arith.constant 1.000000e+00 : f32
    %668 = vector.broadcast %cst_151 : f32 to vector<2x32xf32>
    %669 = arith.addf %668, %667 : vector<2x32xf32>
    %670 = arith.divf %668, %669 : vector<2x32xf32>
    %671 = arith.mulf %662, %628 : vector<2x32xf32>
    %672 = arith.mulf %656, %664 : vector<2x32xf32>
    %673 = arith.addf %671, %672 : vector<2x32xf32>
    %674 = math.tanh %673 : vector<2x32xf32>
    %675 = arith.mulf %670, %674 : vector<2x32xf32>
    %676 = vector.extract_strided_slice %650 {offsets = [0, 0], sizes = [2, 32], strides = [1, 1]} : vector<2x128xf32> to vector<2x32xf32>
    %677 = arith.negf %676 : vector<2x32xf32>
    %678 = math.exp %677 : vector<2x32xf32>
    %cst_152 = arith.constant 1.000000e+00 : f32
    %679 = vector.broadcast %cst_152 : f32 to vector<2x32xf32>
    %680 = arith.addf %679, %678 : vector<2x32xf32>
    %681 = arith.divf %679, %680 : vector<2x32xf32>
    %682 = vector.extract_strided_slice %650 {offsets = [0, 32], sizes = [2, 32], strides = [1, 1]} : vector<2x128xf32> to vector<2x32xf32>
    %683 = arith.negf %682 : vector<2x32xf32>
    %684 = math.exp %683 : vector<2x32xf32>
    %cst_153 = arith.constant 1.000000e+00 : f32
    %685 = vector.broadcast %cst_153 : f32 to vector<2x32xf32>
    %686 = arith.addf %685, %684 : vector<2x32xf32>
    %687 = arith.divf %685, %686 : vector<2x32xf32>
    %688 = vector.extract_strided_slice %650 {offsets = [0, 64], sizes = [2, 32], strides = [1, 1]} : vector<2x128xf32> to vector<2x32xf32>
    %689 = math.tanh %688 : vector<2x32xf32>
    %690 = vector.extract_strided_slice %650 {offsets = [0, 96], sizes = [2, 32], strides = [1, 1]} : vector<2x128xf32> to vector<2x32xf32>
    %691 = arith.negf %690 : vector<2x32xf32>
    %692 = math.exp %691 : vector<2x32xf32>
    %cst_154 = arith.constant 1.000000e+00 : f32
    %693 = vector.broadcast %cst_154 : f32 to vector<2x32xf32>
    %694 = arith.addf %693, %692 : vector<2x32xf32>
    %695 = arith.divf %693, %694 : vector<2x32xf32>
    %696 = arith.mulf %687, %634 : vector<2x32xf32>
    %697 = arith.mulf %681, %689 : vector<2x32xf32>
    %698 = arith.addf %696, %697 : vector<2x32xf32>
    %699 = math.tanh %698 : vector<2x32xf32>
    %700 = arith.mulf %695, %699 : vector<2x32xf32>
    %701 = vector.broadcast %c6_i32 : i32 to vector<2x1xi32>
    %702 = arith.cmpi slt, %701, %45 : vector<2x1xi32>
    %703 = vector.broadcast %635 : i32 to vector<2x1xi32>
    %704 = arith.cmpi slt, %703, %45 : vector<2x1xi32>
    %cst_155 = arith.constant 0.000000e+00 : f32
    %705 = vector.shape_cast %702 : vector<2x1xi1> to vector<2x1xi1>
    %706 = vector.broadcast %705 : vector<2x1xi1> to vector<2x32xi1>
    %707 = vector.broadcast %cst_155 : f32 to vector<2x32xf32>
    %708 = arith.select %706, %675, %707 : vector<2x32xi1>, vector<2x32xf32>
    %709 = arith.index_cast %c6_i32 : i32 to index
    %c0_156 = arith.constant 0 : index
    %c0_157 = arith.constant 0 : index
    %710 = vector.load %arg14[%709, %c0_156, %c0_157] : memref<8x2x32xf32, #tpu.memory_space<vmem>>, vector<1x2x32xf32>
    %711 = vector.shape_cast %710 : vector<1x2x32xf32> to vector<2x32xf32>
    %712 = vector.shape_cast %708 : vector<2x32xf32> to vector<1x2x32xf32>
    tpu.vector_store %arg14[%709, %c0_156, %c0_157], %712 {strides = array<i32>} : memref<8x2x32xf32, #tpu.memory_space<vmem>>, vector<1x2x32xf32>,
    %cst_158 = arith.constant 0.000000e+00 : f32
    %713 = vector.shape_cast %704 : vector<2x1xi1> to vector<2x1xi1>
    %714 = vector.broadcast %713 : vector<2x1xi1> to vector<2x32xi1>
    %715 = vector.broadcast %cst_158 : f32 to vector<2x32xf32>
    %716 = arith.select %714, %700, %715 : vector<2x32xi1>, vector<2x32xf32>
    %717 = arith.index_cast %635 : i32 to index
    %c0_159 = arith.constant 0 : index
    %c0_160 = arith.constant 0 : index
    %718 = vector.load %arg15[%717, %c0_159, %c0_160] : memref<8x2x32xf32, #tpu.memory_space<vmem>>, vector<1x2x32xf32>
    %719 = vector.shape_cast %718 : vector<1x2x32xf32> to vector<2x32xf32>
    %720 = vector.shape_cast %716 : vector<2x32xf32> to vector<1x2x32xf32>
    tpu.vector_store %arg15[%717, %c0_159, %c0_160], %720 {strides = array<i32>} : memref<8x2x32xf32, #tpu.memory_space<vmem>>, vector<1x2x32xf32>,
    %721 = vector.shape_cast %702 : vector<2x1xi1> to vector<2x1xi1>
    %722 = vector.broadcast %721 : vector<2x1xi1> to vector<2x32xi1>
    %723 = arith.select %722, %675, %625 : vector<2x32xi1>, vector<2x32xf32>
    %724 = vector.shape_cast %702 : vector<2x1xi1> to vector<2x1xi1>
    %725 = vector.broadcast %724 : vector<2x1xi1> to vector<2x32xi1>
    %726 = arith.select %725, %673, %628 : vector<2x32xi1>, vector<2x32xf32>
    %727 = vector.shape_cast %704 : vector<2x1xi1> to vector<2x1xi1>
    %728 = vector.broadcast %727 : vector<2x1xi1> to vector<2x32xi1>
    %729 = arith.select %728, %700, %631 : vector<2x32xi1>, vector<2x32xf32>
    %730 = vector.shape_cast %704 : vector<2x1xi1> to vector<2x1xi1>
    %731 = vector.broadcast %730 : vector<2x1xi1> to vector<2x32xi1>
    %732 = arith.select %731, %698, %634 : vector<2x32xi1>, vector<2x32xf32>
    %c7_i32_161 = arith.constant 7 : i32
    %c7_i32_162 = arith.constant 7 : i32
    %733 = arith.subi %c7_i32_162, %c7_i32_161 : i32
    %734 = tpu.concatenate %723, %729 in 1 : vector<2x32xf32>, vector<2x32xf32> -> vector<2x64xf32>
    %735 = arith.truncf %734 : vector<2x64xf32> to vector<2x64xbf16>
    %cst_163 = arith.constant dense<0.000000e+00> : vector<2x256xf32>
    %736 = tpu.matmul %735, %10, %cst_163 {dimension_numbers = #tpu.dot_dimension_numbers<[1], [0], [0], [1], [0, 0, 1, 1], [], []>} : vector<2x64xbf16>, vector<64x256xbf16>, vector<2x256xf32> -> vector<2x256xf32>
    %737 = vector.extract_strided_slice %736 {offsets = [0, 0], sizes = [2, 128], strides = [1, 1]} : vector<2x256xf32> to vector<2x128xf32>
    %738 = arith.index_cast %c7_i32_161 : i32 to index
    %c0_164 = arith.constant 0 : index
    %c0_165 = arith.constant 0 : index
    %739 = vector.load %arg12[%738, %c0_164, %c0_165] : memref<8x2x128xbf16, #tpu.memory_space<vmem>>, vector<1x2x128xbf16>
    %740 = vector.shape_cast %739 : vector<1x2x128xbf16> to vector<2x128xbf16>
    %741 = arith.extf %740 : vector<2x128xbf16> to vector<2x128xf32>
    %742 = arith.addf %737, %741 : vector<2x128xf32>
    %743 = vector.extract_strided_slice %736 {offsets = [0, 128], sizes = [2, 128], strides = [1, 1]} : vector<2x256xf32> to vector<2x128xf32>
    %744 = arith.index_cast %733 : i32 to index
    %c0_166 = arith.constant 0 : index
    %c0_167 = arith.constant 0 : index
    %745 = vector.load %arg13[%744, %c0_166, %c0_167] : memref<8x2x128xbf16, #tpu.memory_space<vmem>>, vector<1x2x128xbf16>
    %746 = vector.shape_cast %745 : vector<1x2x128xbf16> to vector<2x128xbf16>
    %747 = arith.extf %746 : vector<2x128xbf16> to vector<2x128xf32>
    %748 = arith.addf %743, %747 : vector<2x128xf32>
    %749 = vector.extract_strided_slice %742 {offsets = [0, 0], sizes = [2, 32], strides = [1, 1]} : vector<2x128xf32> to vector<2x32xf32>
    %750 = arith.negf %749 : vector<2x32xf32>
    %751 = math.exp %750 : vector<2x32xf32>
    %cst_168 = arith.constant 1.000000e+00 : f32
    %752 = vector.broadcast %cst_168 : f32 to vector<2x32xf32>
    %753 = arith.addf %752, %751 : vector<2x32xf32>
    %754 = arith.divf %752, %753 : vector<2x32xf32>
    %755 = vector.extract_strided_slice %742 {offsets = [0, 32], sizes = [2, 32], strides = [1, 1]} : vector<2x128xf32> to vector<2x32xf32>
    %756 = arith.negf %755 : vector<2x32xf32>
    %757 = math.exp %756 : vector<2x32xf32>
    %cst_169 = arith.constant 1.000000e+00 : f32
    %758 = vector.broadcast %cst_169 : f32 to vector<2x32xf32>
    %759 = arith.addf %758, %757 : vector<2x32xf32>
    %760 = arith.divf %758, %759 : vector<2x32xf32>
    %761 = vector.extract_strided_slice %742 {offsets = [0, 64], sizes = [2, 32], strides = [1, 1]} : vector<2x128xf32> to vector<2x32xf32>
    %762 = math.tanh %761 : vector<2x32xf32>
    %763 = vector.extract_strided_slice %742 {offsets = [0, 96], sizes = [2, 32], strides = [1, 1]} : vector<2x128xf32> to vector<2x32xf32>
    %764 = arith.negf %763 : vector<2x32xf32>
    %765 = math.exp %764 : vector<2x32xf32>
    %cst_170 = arith.constant 1.000000e+00 : f32
    %766 = vector.broadcast %cst_170 : f32 to vector<2x32xf32>
    %767 = arith.addf %766, %765 : vector<2x32xf32>
    %768 = arith.divf %766, %767 : vector<2x32xf32>
    %769 = arith.mulf %760, %726 : vector<2x32xf32>
    %770 = arith.mulf %754, %762 : vector<2x32xf32>
    %771 = arith.addf %769, %770 : vector<2x32xf32>
    %772 = math.tanh %771 : vector<2x32xf32>
    %773 = arith.mulf %768, %772 : vector<2x32xf32>
    %774 = vector.extract_strided_slice %748 {offsets = [0, 0], sizes = [2, 32], strides = [1, 1]} : vector<2x128xf32> to vector<2x32xf32>
    %775 = arith.negf %774 : vector<2x32xf32>
    %776 = math.exp %775 : vector<2x32xf32>
    %cst_171 = arith.constant 1.000000e+00 : f32
    %777 = vector.broadcast %cst_171 : f32 to vector<2x32xf32>
    %778 = arith.addf %777, %776 : vector<2x32xf32>
    %779 = arith.divf %777, %778 : vector<2x32xf32>
    %780 = vector.extract_strided_slice %748 {offsets = [0, 32], sizes = [2, 32], strides = [1, 1]} : vector<2x128xf32> to vector<2x32xf32>
    %781 = arith.negf %780 : vector<2x32xf32>
    %782 = math.exp %781 : vector<2x32xf32>
    %cst_172 = arith.constant 1.000000e+00 : f32
    %783 = vector.broadcast %cst_172 : f32 to vector<2x32xf32>
    %784 = arith.addf %783, %782 : vector<2x32xf32>
    %785 = arith.divf %783, %784 : vector<2x32xf32>
    %786 = vector.extract_strided_slice %748 {offsets = [0, 64], sizes = [2, 32], strides = [1, 1]} : vector<2x128xf32> to vector<2x32xf32>
    %787 = math.tanh %786 : vector<2x32xf32>
    %788 = vector.extract_strided_slice %748 {offsets = [0, 96], sizes = [2, 32], strides = [1, 1]} : vector<2x128xf32> to vector<2x32xf32>
    %789 = arith.negf %788 : vector<2x32xf32>
    %790 = math.exp %789 : vector<2x32xf32>
    %cst_173 = arith.constant 1.000000e+00 : f32
    %791 = vector.broadcast %cst_173 : f32 to vector<2x32xf32>
    %792 = arith.addf %791, %790 : vector<2x32xf32>
    %793 = arith.divf %791, %792 : vector<2x32xf32>
    %794 = arith.mulf %785, %732 : vector<2x32xf32>
    %795 = arith.mulf %779, %787 : vector<2x32xf32>
    %796 = arith.addf %794, %795 : vector<2x32xf32>
    %797 = math.tanh %796 : vector<2x32xf32>
    %798 = arith.mulf %793, %797 : vector<2x32xf32>
    %799 = vector.broadcast %c7_i32_161 : i32 to vector<2x1xi32>
    %800 = arith.cmpi slt, %799, %45 : vector<2x1xi32>
    %801 = vector.broadcast %733 : i32 to vector<2x1xi32>
    %802 = arith.cmpi slt, %801, %45 : vector<2x1xi32>
    %cst_174 = arith.constant 0.000000e+00 : f32
    %803 = vector.shape_cast %800 : vector<2x1xi1> to vector<2x1xi1>
    %804 = vector.broadcast %803 : vector<2x1xi1> to vector<2x32xi1>
    %805 = vector.broadcast %cst_174 : f32 to vector<2x32xf32>
    %806 = arith.select %804, %773, %805 : vector<2x32xi1>, vector<2x32xf32>
    %807 = arith.index_cast %c7_i32_161 : i32 to index
    %c0_175 = arith.constant 0 : index
    %c0_176 = arith.constant 0 : index
    %808 = vector.load %arg14[%807, %c0_175, %c0_176] : memref<8x2x32xf32, #tpu.memory_space<vmem>>, vector<1x2x32xf32>
    %809 = vector.shape_cast %808 : vector<1x2x32xf32> to vector<2x32xf32>
    %810 = vector.shape_cast %806 : vector<2x32xf32> to vector<1x2x32xf32>
    tpu.vector_store %arg14[%807, %c0_175, %c0_176], %810 {strides = array<i32>} : memref<8x2x32xf32, #tpu.memory_space<vmem>>, vector<1x2x32xf32>,
    %cst_177 = arith.constant 0.000000e+00 : f32
    %811 = vector.shape_cast %802 : vector<2x1xi1> to vector<2x1xi1>
    %812 = vector.broadcast %811 : vector<2x1xi1> to vector<2x32xi1>
    %813 = vector.broadcast %cst_177 : f32 to vector<2x32xf32>
    %814 = arith.select %812, %798, %813 : vector<2x32xi1>, vector<2x32xf32>
    %815 = arith.index_cast %733 : i32 to index
    %c0_178 = arith.constant 0 : index
    %c0_179 = arith.constant 0 : index
    %816 = vector.load %arg15[%815, %c0_178, %c0_179] : memref<8x2x32xf32, #tpu.memory_space<vmem>>, vector<1x2x32xf32>
    %817 = vector.shape_cast %816 : vector<1x2x32xf32> to vector<2x32xf32>
    %818 = vector.shape_cast %814 : vector<2x32xf32> to vector<1x2x32xf32>
    tpu.vector_store %arg15[%815, %c0_178, %c0_179], %818 {strides = array<i32>} : memref<8x2x32xf32, #tpu.memory_space<vmem>>, vector<1x2x32xf32>,
    %819 = vector.shape_cast %800 : vector<2x1xi1> to vector<2x1xi1>
    %820 = vector.broadcast %819 : vector<2x1xi1> to vector<2x32xi1>
    %821 = arith.select %820, %773, %723 : vector<2x32xi1>, vector<2x32xf32>
    %822 = vector.shape_cast %800 : vector<2x1xi1> to vector<2x1xi1>
    %823 = vector.broadcast %822 : vector<2x1xi1> to vector<2x32xi1>
    %824 = arith.select %823, %771, %726 : vector<2x32xi1>, vector<2x32xf32>
    %825 = vector.shape_cast %802 : vector<2x1xi1> to vector<2x1xi1>
    %826 = vector.broadcast %825 : vector<2x1xi1> to vector<2x32xi1>
    %827 = arith.select %826, %798, %729 : vector<2x32xi1>, vector<2x32xf32>
    %828 = vector.shape_cast %802 : vector<2x1xi1> to vector<2x1xi1>
    %829 = vector.broadcast %828 : vector<2x1xi1> to vector<2x32xi1>
    %830 = arith.select %829, %796, %732 : vector<2x32xi1>, vector<2x32xf32>
    %c8_i32 = arith.constant 8 : i32
    %c0_180 = arith.constant 0 : index
    %c0_181 = arith.constant 0 : index
    %c0_182 = arith.constant 0 : index
    %831 = vector.load %arg14[%c0_180, %c0_181, %c0_182] : memref<8x2x32xf32, #tpu.memory_space<vmem>>, vector<8x2x32xf32>
    %832 = vector.broadcast %7 : vector<1x1x32xf32> to vector<8x2x32xf32>
    %833 = arith.mulf %831, %832 : vector<8x2x32xf32>
    %cst_183 = arith.constant dense<0.000000e+00> : vector<8x2xf32>
    %834 = vector.multi_reduction <add>, %833, %cst_183 [2] : vector<8x2x32xf32> to vector<8x2xf32>
    %c0_184 = arith.constant 0 : index
    %c0_185 = arith.constant 0 : index
    %c0_186 = arith.constant 0 : index
    %835 = vector.load %arg15[%c0_184, %c0_185, %c0_186] : memref<8x2x32xf32, #tpu.memory_space<vmem>>, vector<8x2x32xf32>
    %836 = vector.broadcast %9 : vector<1x1x32xf32> to vector<8x2x32xf32>
    %837 = arith.mulf %835, %836 : vector<8x2x32xf32>
    %cst_187 = arith.constant dense<0.000000e+00> : vector<8x2xf32>
    %838 = vector.multi_reduction <add>, %837, %cst_187 [2] : vector<8x2x32xf32> to vector<8x2xf32>
    %839 = arith.addf %834, %838 : vector<8x2xf32>
    %840 = tpu.transpose %839, [1, 0] : vector<8x2xf32> -> vector<2x8xf32>
    %841 = arith.addf %27, %840 : vector<2x8xf32>
    %842 = vector.broadcast %12 : vector<1x1xf32> to vector<2x8xf32>
    %843 = arith.addf %841, %842 : vector<2x8xf32>
    %cst_188 = arith.constant 5.000000e-01 : f32
    %844 = vector.broadcast %cst_188 : f32 to vector<2x8xf32>
    %845 = arith.cmpf ogt, %2, %844 : vector<2x8xf32>
    %cst_189 = arith.constant -1.000000e+30 : f32
    %846 = vector.broadcast %cst_189 : f32 to vector<2x8xf32>
    %847 = arith.select %845, %23, %846 : vector<2x8xi1>, vector<2x8xf32>
    %cst_190 = arith.constant dense<0xFF800000> : vector<2xf32>
    %848 = vector.multi_reduction <maximumf>, %847, %cst_190 [1] : vector<2x8xf32> to vector<2xf32>
    %849 = vector.shape_cast %848 : vector<2xf32> to vector<2x1xf32>
    %850 = vector.broadcast %849 : vector<2x1xf32> to vector<2x8xf32>
    %851 = arith.subf %847, %850 : vector<2x8xf32>
    %852 = math.exp %851 : vector<2x8xf32>
    %cst_191 = arith.constant dense<0.000000e+00> : vector<2xf32>
    %853 = vector.multi_reduction <add>, %852, %cst_191 [1] : vector<2x8xf32> to vector<2xf32>
    %854 = vector.shape_cast %853 : vector<2xf32> to vector<2x1xf32>
    %855 = math.log %854 : vector<2x1xf32>
    %856 = vector.broadcast %855 : vector<2x1xf32> to vector<2x8xf32>
    %857 = arith.subf %851, %856 : vector<2x8xf32>
    %c0_192 = arith.constant 0 : index
    %c0_193 = arith.constant 0 : index
    %858 = vector.load %arg10[%c0_192, %c0_193] : memref<2x8xf32, #tpu.memory_space<vmem>>, vector<2x8xf32>
    tpu.vector_store %arg10[%c0_192, %c0_193], %857 {strides = array<i32>} : memref<2x8xf32, #tpu.memory_space<vmem>>, vector<2x8xf32>,
    %cst_194 = arith.constant 5.000000e-01 : f32
    %859 = vector.broadcast %cst_194 : f32 to vector<2x8xf32>
    %860 = arith.cmpf ogt, %2, %859 : vector<2x8xf32>
    %cst_195 = arith.constant -1.000000e+30 : f32
    %861 = vector.broadcast %cst_195 : f32 to vector<2x8xf32>
    %862 = arith.select %860, %843, %861 : vector<2x8xi1>, vector<2x8xf32>
    %cst_196 = arith.constant dense<0xFF800000> : vector<2xf32>
    %863 = vector.multi_reduction <maximumf>, %862, %cst_196 [1] : vector<2x8xf32> to vector<2xf32>
    %864 = vector.shape_cast %863 : vector<2xf32> to vector<2x1xf32>
    %865 = vector.broadcast %864 : vector<2x1xf32> to vector<2x8xf32>
    %866 = arith.subf %862, %865 : vector<2x8xf32>
    %867 = math.exp %866 : vector<2x8xf32>
    %cst_197 = arith.constant dense<0.000000e+00> : vector<2xf32>
    %868 = vector.multi_reduction <add>, %867, %cst_197 [1] : vector<2x8xf32> to vector<2xf32>
    %869 = vector.shape_cast %868 : vector<2xf32> to vector<2x1xf32>
    %870 = math.log %869 : vector<2x1xf32>
    %871 = vector.broadcast %870 : vector<2x1xf32> to vector<2x8xf32>
    %872 = arith.subf %866, %871 : vector<2x8xf32>
    %c0_198 = arith.constant 0 : index
    %c0_199 = arith.constant 0 : index
    %873 = vector.load %arg11[%c0_198, %c0_199] : memref<2x8xf32, #tpu.memory_space<vmem>>, vector<2x8xf32>
    tpu.vector_store %arg11[%c0_198, %c0_199], %872 {strides = array<i32>} : memref<2x8xf32, #tpu.memory_space<vmem>>, vector<2x8xf32>,
    return
  }
  func.func @transform_0(%arg0: i32) -> (i32, i32, i32) {
    %c0_i32 = arith.constant 0 : i32
    %c0_i32_0 = arith.constant 0 : i32
    %c0_i32_1 = arith.constant 0 : i32
    return %arg0, %c0_i32, %c0_i32_0 : i32, i32, i32
  }
  func.func @transform_1(%arg0: i32) -> (i32, i32, i32) {
    %c0_i32 = arith.constant 0 : i32
    %c0_i32_0 = arith.constant 0 : i32
    %c0_i32_1 = arith.constant 0 : i32
    return %arg0, %c0_i32, %c0_i32_0 : i32, i32, i32
  }
  func.func @transform_2(%arg0: i32) -> (i32, i32) {
    %c0_i32 = arith.constant 0 : i32
    %c0_i32_0 = arith.constant 0 : i32
    return %arg0, %c0_i32 : i32, i32
  }
  func.func @transform_3(%arg0: i32) -> (i32, i32) {
    %c0_i32 = arith.constant 0 : i32
    %c0_i32_0 = arith.constant 0 : i32
    %c0_i32_1 = arith.constant 0 : i32
    return %c0_i32, %c0_i32_0 : i32, i32
  }
  func.func @transform_4(%arg0: i32) -> (i32, i32) {
    %c0_i32 = arith.constant 0 : i32
    %c0_i32_0 = arith.constant 0 : i32
    %c0_i32_1 = arith.constant 0 : i32
    return %c0_i32, %c0_i32_0 : i32, i32
  }
  func.func @transform_5(%arg0: i32) -> (i32, i32) {
    %c0_i32 = arith.constant 0 : i32
    %c0_i32_0 = arith.constant 0 : i32
    %c0_i32_1 = arith.constant 0 : i32
    return %c0_i32, %c0_i32_0 : i32, i32
  }
  func.func @transform_6(%arg0: i32) -> (i32, i32) {
    %c0_i32 = arith.constant 0 : i32
    %c0_i32_0 = arith.constant 0 : i32
    %c0_i32_1 = arith.constant 0 : i32
    return %c0_i32, %c0_i32_0 : i32, i32
  }
  func.func @transform_7(%arg0: i32) -> (i32, i32) {
    %c0_i32 = arith.constant 0 : i32
    %c0_i32_0 = arith.constant 0 : i32
    %c0_i32_1 = arith.constant 0 : i32
    return %c0_i32, %c0_i32_0 : i32, i32
  }
  func.func @transform_8(%arg0: i32) -> (i32, i32) {
    %c0_i32 = arith.constant 0 : i32
    %c0_i32_0 = arith.constant 0 : i32
    %c0_i32_1 = arith.constant 0 : i32
    return %c0_i32, %c0_i32_0 : i32, i32
  }
  func.func @transform_9(%arg0: i32) -> (i32, i32) {
    %c0_i32 = arith.constant 0 : i32
    %c0_i32_0 = arith.constant 0 : i32
    return %arg0, %c0_i32 : i32, i32
  }
  func.func @transform_10(%arg0: i32) -> (i32, i32) {
    %c0_i32 = arith.constant 0 : i32
    %c0_i32_0 = arith.constant 0 : i32
    return %arg0, %c0_i32 : i32, i32
  }
}

</mosaic_0001>

<bundles_post_ra>
// kernel: tpu_custom_call.1
= control target key start
LH: loop header
LB: loop body
LE: loop exit
PB: predicated region body
PF: predicated region fallthrough
CT: control target
= control target key end

     0   :  { %16 = vsyncpa [#allocation7], 0  ;;  %s3052_s0 = inlined_call_operand.hbm [shape: f32[2,8,64], index: 0, kind: input, shape index: {}]   ;;  %s3053_s1 = inlined_call_operand.hbm [shape: f32[2,8,64], index: 1, kind: input, shape index: {}]   ;;  %s3054_s2 = inlined_call_operand.hbm [shape: f32[2,8], index: 2, kind: input, shape index: {}]   ;;  %s3055_s3 = inlined_call_operand.hbm [shape: f32[3,64], index: 3, kind: input, shape index: {}]   ;;  %s3056_s4 = inlined_call_operand.vmem [shape: f32[2,32], index: 4, kind: input, shape index: {}]   ;;  %s3057_s5 = inlined_call_operand.hbm [shape: bf16[64,256], index: 5, kind: input, shape index: {}]   ;;  %s3058_s6 = inlined_call_operand.hbm [shape: bf16[64,256], index: 6, kind: input, shape index: {}]   ;;  %s3059_s7 = inlined_call_operand.vmem [shape: f32[1,256], index: 7, kind: input, shape index: {}]   ;;  %s3060_s8 = inlined_call_operand.vmem [shape: f32[1,2], index: 8, kind: input, shape index: {}]   ;;  %s3061_s9 = inlined_call_operand.hbm [shape: f32[2,8], index: 9, kind: output, shape index: {0}]   ;;  %s3062_s10 = inlined_call_operand.hbm [shape: f32[2,8], index: 10, kind: output, shape index: {1}]  }
   0x1   :  { %17 = vsyncpa [#allocation10], 0 }
   0x2   :  { %18 = vsyncpa [#allocation13], 0 }
   0x3   :  { %19 = vsyncpa [#allocation16], 0 }
   0x4   :  { %20 = vsyncpa [#allocation8], 0 }
   0x5   :  { %21 = vsyncpa [#allocation19], 0  ;;  %s39_s15 = sshll.u32 %s3053_s1, 4  ;;  %s2318_s16 = smov [#allocation9]   ;;  %s40_s15 = int_to_ptr.hbm [resolvable:$true] %s39_s15 }
   0x6   :  { %s41_s17 = sshll.u32 %s2318_s16, 4  ;;  %s64_s20 = sshll.u32 %s3055_s3, 4  ;;  %s42_s17 = int_to_ptr.vmem [resolvable:$true] %s41_s17  ;;  %s65_s20 = int_to_ptr.hbm [resolvable:$true] %s64_s20 }
   0x7   :  { %s2319_s21 = smov 128   ;;  %s2320_s22 = smov 8  }
   0x8   :  { %47 = dma.hbm_to_vmem [thread:$0]  %s40_s15, 256, %s42_s17, [#allocation10], %s2319_s21, %s2319_s21, %s2320_s22  }
   0x9   :  { %s2321_s23 = smov [#allocation12]   ;;  %s26_s1 = sshll.u32 %s3052_s0, 4  ;;  %s27_s1 = int_to_ptr.hbm [resolvable:$true] %s26_s1 }
   0xa   :  { %s66_s24 = sshll.u32 %s2321_s23, 4  ;;  %s53_s3 = sshll.u32 %s3054_s2, 4  ;;  %s67_s24 = int_to_ptr.vmem [resolvable:$true] %s66_s24  ;;  %s54_s3 = int_to_ptr.hbm [resolvable:$true] %s53_s3 }
   0xb   :  { %69 = dma.hbm_to_vmem [thread:$0]  %s65_s20, 64, %s67_s24, [#allocation13]  }
   0xc   :  { %s2322_s29 = smov [#allocation6]   ;;  %s2323_s11 = smov [#allocation11]  }
   0xd   :  { %s28_s30 = sshll.u32 %s2322_s29, 4  ;;  %s55_s12 = sshll.u32 %s2323_s11, 4  ;;  %s29_s30 = int_to_ptr.vmem [resolvable:$true] %s28_s30  ;;  %s56_s12 = int_to_ptr.vmem [resolvable:$true] %s55_s12 }
   0xe   :  { %34 = dma.hbm_to_vmem [thread:$0]  %s27_s1, 256, %s29_s30, [#allocation7], %s2319_s21, %s2319_s21, %s2320_s22  }
   0xf   :  { %s76_s0 = sshll.u32 %s3057_s5, 4  ;;  %s89_s2 = sshll.u32 %s3058_s6, 4  ;;  %s77_s0 = int_to_ptr.hbm [resolvable:$true] %s76_s0  ;;  %s90_s2 = int_to_ptr.hbm [resolvable:$true] %s89_s2 }
  0x10   :  { %58 = dma.hbm_to_vmem [thread:$0]  %s54_s3, 32, %s56_s12, [#allocation10]  }
  0x11   :  { %s2324_s17 = smov [#allocation14]   ;;  %s2325_s19 = smov [#allocation15]  }
  0x12   :  { %s78_s18 = sshll.u32 %s2324_s17, 4  ;;  %s91_s20 = sshll.u32 %s2325_s19, 4  ;;  %s79_s18 = int_to_ptr.vmem [resolvable:$true] %s78_s18  ;;  %s92_s20 = int_to_ptr.vmem [resolvable:$true] %s91_s20 }
  0x13   :  { %84 = dma.hbm_to_vmem [thread:$0]  %s77_s0, 1024, %s79_s18, [#allocation13], %s2319_s21, %s2319_s21, %s2320_s22  }
  0x14   :  { %97 = dma.hbm_to_vmem [thread:$0]  %s90_s2, 1024, %s92_s20, [#allocation16], %s2319_s21, %s2319_s21, %s2320_s22  }
  0x15   :  { %2306 = dma.done.wait [#allocation7], 256  }
  0x16   :  { %2307 = vsyncadd [#allocation7], 4294967040 }
  0x17   :  { %2308 = dma.done.wait [#allocation10], 288  }
  0x18   :  { %2309 = vsyncadd [#allocation10], 4294967008 }
  0x19   :  { %2310 = dma.done.wait [#allocation13], 1088  }
  0x1a   :  { %2311 = vsyncadd [#allocation13], 4294966208 }
  0x1b   :  { %2312 = dma.done.wait [#allocation16], 1024  }
  0x1c   :  { %2313 = vsyncadd [#allocation16], 4294966272  ;;  %v1855_v0 = vld [vmem:[#allocation14 + $0x30] sm:$0xf]  ;;  %v1940_v1 = vld [vmem:[#allocation14 + $0x34] sm:$0xf0] }
  0x1d   :  { %v1939_v2 = vld [vmem:[#allocation14 + $0x34] sm:$0xf]  ;;  %v1856_v3 = vor.u32 %v1940_v1, %v1855_v0  ;;  %v1857_v4 = vld [vmem:[#allocation14 + $0x38] sm:$0xf0]  ;;  %v1847_v5 = vld [vmem:[#allocation14 + $0x20] sm:$0xf] }
  0x1e   :  { %v1938_v6 = vld [vmem:[#allocation14 + $0x24] sm:$0xf0]  ;;  %v1860_v7 = vor.u32 %v1939_v2, %v1857_v4  ;;  %v1937_v8 = vld [vmem:[#allocation14 + $0x24] sm:$0xf]  ;;  %v1849_v9 = vld [vmem:[#allocation14 + $0x28] sm:$0xf0] }
  0x1f   :  { %246 = vmatpush.bf16.msra.mxu0 %v1856_v3  ;;  %v1848_v10 = vor.u32 %v1938_v6, %v1847_v5  ;;  %v1852_v11 = vor.u32 %v1937_v8, %v1849_v9  ;;  %v1839_v12 = vld [vmem:[#allocation14 + $0x10] sm:$0xf]  ;;  %v1936_v13 = vld [vmem:[#allocation14 + $0x14] sm:$0xf0]  ;;  %v1935_v14 = vld [vmem:[#allocation14 + $0x14] sm:$0xf] }
  0x20   :  { %260 = vmatpush.bf16.msra.mxu1 %v1860_v7  ;;  %v1841_v15 = vld [vmem:[#allocation14 + $0x18] sm:$0xf0]  ;;  %v1889_v16 = vld [vmem:[#allocation15 + $0x30] sm:$0xf]  ;;  %v1932_v17 = vld [vmem:[#allocation15 + $0x34] sm:$0xf0]  ;;  %v1840_v19 = vor.u32 %v1936_v13, %v1839_v12 }
  0x21   :  { %v1881_v18 = vld [vmem:[#allocation15 + $0x20] sm:$0xf]  ;;  %v1934_v21 = vld [vmem:[#allocation14 + $0x4] sm:$0xf0]  ;;  %v2420_v22 = vor.u32 %v1932_v17, %v1889_v16  ;;  %v1844_v24 = vor.u32 %v1935_v14, %v1841_v15  ;;  %v1933_v25 = vld [vmem:[#allocation14 + $0x4] sm:$0xf] }
  0x22   :  { %v1831_v20 = vld [vmem:[#allocation14] sm:$0xf]  ;;  %v1930_v23 = vld [vmem:[#allocation15 + $0x24] sm:$0xf0]  ;;  %v1931_v26 = vld [vmem:[#allocation15 + $0x34] sm:$0xf] }
  0x23   :  { %247 = vmatpush.bf16.msra.mxu0 %v1848_v10  ;;  %v1891_v27 = vld [vmem:[#allocation15 + $0x38] sm:$0xf0]  ;;  %v1833_v28 = vld [vmem:[#allocation14 + $0x8] sm:$0xf0]  ;;  %460 = vmatpush.bf16.msra.mxu2 %v2420_v22  ;;  %v2423_v29 = vor.u32 %v1930_v23, %v1881_v18  ;;  %v1929_v31 = vld [vmem:[#allocation15 + $0x24] sm:$0xf]  ;;  %v1832_v36 = vor.u32 %v1934_v21, %v1831_v20 }
  0x24   :  { %261 = vmatpush.bf16.msra.mxu1 %v1852_v11  ;;  %v2425_v30 = vor.u32 %v1931_v26, %v1891_v27  ;;  %v1883_v32 = vld [vmem:[#allocation15 + $0x28] sm:$0xf0]  ;;  %v1873_v34 = vld [vmem:[#allocation15 + $0x10] sm:$0xf]  ;;  %v1928_v35 = vld [vmem:[#allocation15 + $0x14] sm:$0xf0]  ;;  %v1836_v40 = vor.u32 %v1933_v25, %v1833_v28 }
  0x25   :  { %v129_v33 = vld [vmem:[#allocation9] sm:$0xff]  ;;  %v130_v37 = vld [vmem:[#allocation9 + $0x8] sm:$0xff]  ;;  %v2428_v38 = vor.u32 %v1929_v31, %v1883_v32  ;;  %v1875_v41 = vld [vmem:[#allocation15 + $0x18] sm:$0xf0]  ;;  %v2431_v42 = vor.u32 %v1928_v35, %v1873_v34  ;;  %vm149_vm0 = vcmask 523264   ;;  %v2326_v51 = vmov 0.0|0.0  }
  0x26   :  { %473 = vmatpush.bf16.msra.mxu3 %v2425_v30  ;;  %v1927_v39 = vld [vmem:[#allocation15 + $0x14] sm:$0xf]  ;;  %v184_v43 = vpack.c.bf16 %v130_v37, %v129_v33  ;;  %v1865_v44 = vld [vmem:[#allocation15] sm:$0xf]  ;;  %v1926_v45 = vld [vmem:[#allocation15 + $0x4] sm:$0xf0] }
  0x27   :  { %248 = vmatpush.bf16.msra.mxu0 %v1840_v19  ;;  %461 = vmatpush.bf16.msra.mxu2 %v2423_v29  ;;  %v2434_v46 = vor.u32 %v1927_v39, %v1875_v41  ;;  %v1925_v47 = vld [vmem:[#allocation15 + $0x4] sm:$0xf]  ;;  %v1867_v48 = vld [vmem:[#allocation15 + $0x8] sm:$0xf0]  ;;  %v2438_v49 = vor.u32 %v1926_v45, %v1865_v44  ;;  %v193_v52 = vld [vmem:[%s3059_s7] sm:$0x3] }
  0x28   :  { %262 = vmatpush.bf16.msra.mxu1 %v1844_v24  ;;  %v2444_v50 = vor.u32 %v1925_v47, %v1867_v48  ;;  %v195_v53 = vperm.slane %v193_v52, 0  ;;  %v196_v54 = vperm.slane %v193_v52, 1  ;;  %v2327_v55 = vmov 1983009808   ;;  %s2329_s7 = smov 64   ;;  %s2330_s21 = smov 32  }
  0x29   :  { %v274_v56 = vunpack.c.l.s4 %v2327_v55  ;;  %vm271_vm1 = vcmask 1047556   ;;  %v2328_v1 = vmov 1934713408   ;;  %vm3063_vm2 = vcmask 58368   ;;  %s1800_s3 = sshll.u32 %s3061_s9, 4  ;;  %s2334_s29 = smov [#allocation18]   ;;  %s1801_s3 = int_to_ptr.hbm [resolvable:$true] %s1800_s3 }
  0x2a   :  { %474 = vmatpush.bf16.msra.mxu3 %v2428_v38  ;;  %v296_v2 = vunpack.c.l.s4 %v2328_v1  ;;  %vm572_vm14 = vcmask 254976   ;;  %vm588_vm15 = vcmask 261120   ;;  %s1809_s30 = sshll.u32 %s2334_s29, 4  ;;  %s1811_s13 = sshll.u32 %s3062_s10, 4  ;;  %s1810_s30 = int_to_ptr.vmem [resolvable:$true] %s1809_s30  ;;  %s1812_s13 = int_to_ptr.hbm [resolvable:$true] %s1811_s13 }
  0x2b   :  { %249 = vmatpush.bf16.msra.mxu0 %v1832_v36  ;;  %462 = vmatpush.bf16.msra.mxu2 %v2431_v42  ;;  %v275_v62 = vunpack.c.0.s8 %v274_v56 }
  0x2c   :  { %263 = vmatpush.bf16.msra.mxu1 %v1836_v40  ;;  %v297_v10 = vunpack.c.0.s8 %v296_v2 }
  0x2e   :  { %1861 = vmatmul.msk.bf16.vlgmr.msra.gmra.mxu0 %vm149_vm0, %v184_v43  ;;  %475 = vmatpush.bf16.msra.mxu3 %v2434_v46 }
  0x2f   :  { %598 = vmatpush.bf16.msrb.mxu0 %v2420_v22  ;;  %1862 = vmatmul.msk.bf16.vlgmr.msra.gmra.mxu1 %vm149_vm0, %v184_v43 }
  0x30   :  { %611 = vmatpush.bf16.msrb.mxu1 %v2425_v30  ;;  %463 = vmatpush.bf16.msra.mxu2 %v2438_v49 }
  0x32   :  { %476 = vmatpush.bf16.msra.mxu3 %v2444_v50 }
  0x33   :  { %599 = vmatpush.bf16.msrb.mxu0 %v2423_v29  ;;  %464 = vmatmul.bf16.vlgmr.msra.gmra.mxu2 %v2326_v51 }
  0x34   :  { %612 = vmatpush.bf16.msrb.mxu1 %v2428_v38  ;;  %743 = vmatpush.bf16.msrb.mxu2 %v2420_v22 }
  0x35   :  { %477 = vmatmul.bf16.vlgmr.msra.gmra.mxu3 %v2326_v51 }
  0x36   :  { %756 = vmatpush.bf16.msrb.mxu3 %v2425_v30 }
  0x37   :  { %600 = vmatpush.bf16.msrb.mxu0 %v2431_v42 }
  0x38   :  { %613 = vmatpush.bf16.msrb.mxu1 %v2434_v46  ;;  %744 = vmatpush.bf16.msrb.mxu2 %v2423_v29 }
  0x3a   :  { %757 = vmatpush.bf16.msrb.mxu3 %v2428_v38 }
  0x3b   :  { %601 = vmatpush.bf16.msrb.mxu0 %v2438_v49 }
  0x3c   :  { %614 = vmatpush.bf16.msrb.mxu1 %v2444_v50  ;;  %745 = vmatpush.bf16.msrb.mxu2 %v2431_v42 }
  0x3e   :  { %758 = vmatpush.bf16.msrb.mxu3 %v2434_v46 }
  0x3f   :  { %888 = vmatpush.bf16.msra.mxu0 %v2420_v22 }
  0x40   :  { %901 = vmatpush.bf16.msra.mxu1 %v2425_v30  ;;  %746 = vmatpush.bf16.msrb.mxu2 %v2438_v49 }
  0x42   :  { %759 = vmatpush.bf16.msrb.mxu3 %v2444_v50 }
  0x43   :  { %889 = vmatpush.bf16.msra.mxu0 %v2423_v29 }
  0x44   :  { %902 = vmatpush.bf16.msra.mxu1 %v2428_v38  ;;  %1033 = vmatpush.bf16.msra.mxu2 %v2420_v22 }
  0x46   :  { %1046 = vmatpush.bf16.msra.mxu3 %v2425_v30 }
  0x47   :  { %890 = vmatpush.bf16.msra.mxu0 %v2431_v42 }
  0x48   :  { %903 = vmatpush.bf16.msra.mxu1 %v2434_v46  ;;  %1034 = vmatpush.bf16.msra.mxu2 %v2423_v29 }
  0x4a   :  { %1047 = vmatpush.bf16.msra.mxu3 %v2428_v38 }
  0x4b   :  { %891 = vmatpush.bf16.msra.mxu0 %v2438_v49 }
  0x4c   :  { %904 = vmatpush.bf16.msra.mxu1 %v2444_v50  ;;  %1035 = vmatpush.bf16.msra.mxu2 %v2431_v42 }
  0x4e   :  { %1048 = vmatpush.bf16.msra.mxu3 %v2434_v46 }
  0x50   :  { %1036 = vmatpush.bf16.msra.mxu2 %v2438_v49 }
  0x52   :  { %1049 = vmatpush.bf16.msra.mxu3 %v2444_v50 }
  0xab   :  { %v251_v57 = vpop.f32.mrf.mxu0 }
  0xac   :  { %v252_v58 = vadd.f32 %v251_v57, %v195_v53  ;;  %v265_v59 = vpop.f32.mrf.mxu1 }
  0xad   :  { %v266_v60 = vadd.f32 %v265_v59, %v196_v54 }
  0xae   :  { %v270_v61 = vrot.slane %v252_v58, 4  ;;  %v276_v3 = vperm.slane %v252_v58, %v275_v62 }
  0xaf   :  { %v323_v63 = vrot.slane %v266_v60, 4  ;;  %v328_v5 = vperm.slane %v266_v60, %v275_v62 }
  0xb0   :  { %v272_v0 = vsel %vm271_vm1, 0.0, %v270_v61  ;;  %v293_v12 = vrot.slane %v276_v3, 4 }
  0xb1   :  { %v324_v4 = vsel %vm271_vm1, 0.0, %v323_v63  ;;  %v280_v7 = vperm.slane %v272_v0, %v275_v62  ;;  %v345_v16 = vrot.slane %v328_v5, 4 }
  0xb2   :  { %v332_v13 = vperm.slane %v324_v4, %v275_v62 }
  0xb3   :  { %v253_v6 = vpop.f32.mrf.mxu0  ;;  %v305_v20 = vrot.slane %v280_v7, 4 }
  0xb4   :  { %v254_v8 = vadd.f32 %v253_v6, %v195_v53  ;;  %v267_v9 = vpop.f32.mrf.mxu1  ;;  %v357_v32 = vrot.slane %v332_v13, 4 }
  0xb5   :  { %v268_v11 = vadd.f32 %v267_v9, %v196_v54 }
  0xb6   :  { %v281_v14 = vrot.slane %v254_v8, 4  ;;  %v286_v15 = vperm.slane %v254_v8, %v275_v62  ;;  %v2483_v19 = vpop.f32.mrf.mxu2 }
  0xb7   :  { %v333_v17 = vrot.slane %v268_v11, 4  ;;  %v338_v18 = vperm.slane %v268_v11, %v275_v62 }
  0xb8   :  { %v282_v21 = vsel %vm271_vm1, 0.0, %v281_v14  ;;  %v291_v23 = vrot.slane %v286_v15, 4  ;;  %v294_v24 = vsel %vm271_vm1, %v286_v15, %v293_v12  ;;  %v2488_v31 = vpop.f32.mrf.mxu3 }
  0xb9   :  { %v290_v25 = vperm.slane %v282_v21, %v275_v62  ;;  %v302_v26 = vperm.slane %v294_v24, %v297_v10  ;;  %v334_v27 = vsel %vm271_vm1, 0.0, %v333_v17  ;;  %v343_v28 = vrot.slane %v338_v18, 4 }
  0xba   :  { %v292_v33 = vsel %vm271_vm1, %v291_v23, %v276_v3  ;;  %v342_v34 = vperm.slane %v334_v27, %v275_v62  ;;  %v346_v35 = vsel %vm271_vm1, %v338_v18, %v345_v16 }
  0xbb   :  { %v298_v36 = vperm.slane %v292_v33, %v297_v10  ;;  %v303_v37 = vrot.slane %v290_v25, 4  ;;  %v306_v39 = vsel %vm271_vm1, %v290_v25, %v305_v20  ;;  %v317_v40 = vrot.slane %v302_v26, 4  ;;  %v131_v20 = vld [vmem:[#allocation11] sm:$0x3] }
  0xbc   :  { %v314_v41 = vperm.slane %v306_v39, %v297_v10  ;;  %v377_v43 = vpack.c.bf16 %v302_v26, %v302_v26  ;;  %v344_v44 = vsel %vm271_vm1, %v343_v28, %v328_v5  ;;  %v354_v45 = vperm.slane %v346_v35, %v297_v10 }
  0xbd   :  { %v304_v47 = vsel %vm271_vm1, %v303_v37, %v280_v7  ;;  %v315_v48 = vrot.slane %v298_v36, 4  ;;  %v318_v51 = vsel %vm271_vm1, 0.0, %v317_v40  ;;  %v375_v52 = vpack.c.bf16 %v298_v36, %v298_v36 }
  0xbe   :  { %v310_v53 = vperm.slane %v304_v47, %v297_v10  ;;  %v321_v54 = vrot.slane %v314_v41, 4  ;;  %v378_v55 = vpack.c.bf16 %v318_v51, %v318_v51  ;;  %v381_v56 = vpack.c.bf16 %v314_v41, %v314_v41  ;;  %385 = vst [vmem:[#allocation2 + $0x2] sm:$0x1] %v377_v43  ;;  %v467_v61 = vpop.f32.mrf.mxu2 }
  0xbf   :  { %v316_v57 = vsel %vm271_vm1, 0.0, %v315_v48  ;;  %383 = vst [vmem:[#allocation2] sm:$0x1] %v375_v52  ;;  %v350_v58 = vperm.slane %v344_v44, %v297_v10  ;;  %v355_v59 = vrot.slane %v342_v34, 4  ;;  %v358_v60 = vsel %vm271_vm1, %v342_v34, %v357_v32 }
  0xc0   :  { %v319_v62 = vrot.slane %v310_v53, 4  ;;  %v322_v63 = vsel %vm271_vm1, 0.0, %v321_v54  ;;  %v376_v0 = vpack.c.bf16 %v316_v57, %v316_v57  ;;  %v379_v1 = vpack.c.bf16 %v310_v53, %v310_v53  ;;  %386 = vst [vmem:[#allocation2 + $0x3] sm:$0x1] %v378_v55  ;;  %v480_v6 = vpop.f32.mrf.mxu3 }
  0xc1   :  { %v382_v2 = vpack.c.bf16 %v322_v63, %v322_v63  ;;  %389 = vst [vmem:[#allocation2 + $0x6] sm:$0x1] %v381_v56  ;;  %v356_v3 = vsel %vm271_vm1, %v355_v59, %v332_v13  ;;  %v366_v4 = vperm.slane %v358_v60, %v297_v10  ;;  %v367_v5 = vrot.slane %v350_v58, 4 }
  0xc2   :  { %v320_v7 = vsel %vm271_vm1, 0.0, %v319_v62  ;;  %384 = vst [vmem:[#allocation2 + $0x1] sm:$0x1] %v376_v0  ;;  %v362_v8 = vperm.slane %v356_v3, %v297_v10  ;;  %v369_v9 = vrot.slane %v354_v45, 4  ;;  %v391_v11 = vpack.c.bf16 %v350_v58, %v350_v58 }
  0xc3   :  { %v380_v12 = vpack.c.bf16 %v320_v7, %v320_v7  ;;  %387 = vst [vmem:[#allocation2 + $0x4] sm:$0x1] %v379_v1  ;;  %v368_v14 = vsel %vm271_vm1, 0.0, %v367_v5  ;;  %v373_v15 = vrot.slane %v366_v4, 4  ;;  %v393_v13 = vpack.c.bf16 %v354_v45, %v354_v45 }
  0xc4   :  { %390 = vst [vmem:[#allocation2 + $0x7] sm:$0x1] %v382_v2  ;;  %v370_v16 = vsel %vm271_vm1, 0.0, %v369_v9  ;;  %v371_v17 = vrot.slane %v362_v8, 4  ;;  %v392_v18 = vpack.c.bf16 %v368_v14, %v368_v14  ;;  %v395_v24 = vpack.c.bf16 %v362_v8, %v362_v8 }
  0xc5   :  { %388 = vst [vmem:[#allocation2 + $0x5] sm:$0x1] %v380_v12  ;;  %v374_v21 = vsel %vm271_vm1, 0.0, %v373_v15  ;;  %v394_v23 = vpack.c.bf16 %v370_v16, %v370_v16  ;;  %v408_v26 = vsel %vm3063_vm2, %v131_v20, 0.0  ;;  %v397_v32 = vpack.c.bf16 %v366_v4, %v366_v4 }
  0xc6   :  { %v372_v10 = vsel %vm271_vm1, 0.0, %v371_v17  ;;  %399 = vst [vmem:[#allocation3] sm:$0x1] %v391_v11  ;;  %v482_v25 = vld [vmem:[#allocation2] sm:$0x1]  ;;  %409 = vadd.xlane.f32.xlu2 %v408_v26  ;;  %v398_v33 = vpack.c.bf16 %v374_v21, %v374_v21 }
  0xc7   :  { %v396_v27 = vpack.c.bf16 %v372_v10, %v372_v10  ;;  %400 = vst [vmem:[#allocation3 + $0x1] sm:$0x1] %v392_v18  ;;  %v483_v28 = vunpack.c.l.bf16 %v482_v25 }
  0xc8   :  { %401 = vst [vmem:[#allocation3 + $0x2] sm:$0x1] %v393_v13 }
  0xc9   :  { %402 = vst [vmem:[#allocation3 + $0x3] sm:$0x1] %v394_v23  ;;  %v484_v34 = vadd.f32 %v483_v28, %v2483_v19 }
  0xca   :  { %403 = vst [vmem:[#allocation3 + $0x4] sm:$0x1] %v395_v24 }
  0xcb   :  { %404 = vst [vmem:[#allocation3 + $0x5] sm:$0x1] %v396_v27  ;;  %1975 = vtanh.f32 %v484_v34  ;;  %v1895_v41 = vmul.f32 -1.442695, %v484_v34 }
  0xcc   :  { %405 = vst [vmem:[#allocation3 + $0x6] sm:$0x1] %v397_v32 }
  0xcd   :  { %406 = vst [vmem:[#allocation3 + $0x7] sm:$0x1] %v398_v33 }
  0xd1   :  { %v1976_v35 = vpop.eup %1975 }
  0xd2   :  { %511 = vrot.lane.b32.xlu0 %v1976_v35, %s2329_s7 }
  0xd4   :  { %v486_v36 = vld [vmem:[#allocation3 + $0x7] sm:$0x1] }
  0xd5   :  { %v487_v37 = vunpack.c.l.bf16 %v486_v36 }
  0xd7   :  { %v488_v39 = vadd.f32 %v487_v37, %v2488_v31  ;;  %v621_v37 = vld [vmem:[#allocation2 + $0x1] sm:$0x1] }
  0xd9   :  { %1977 = vtanh.f32 %v488_v39  ;;  %v1896_v44 = vmul.f32 -1.442695, %v488_v39  ;;  %v625_v39 = vld [vmem:[#allocation3 + $0x6] sm:$0x1] }
  0xda   :  { %1979 = vpow2.f32 %v1895_v41  ;;  %v626_v41 = vunpack.c.l.bf16 %v625_v39 }
  0xdf   :  { %v1978_v40 = vpop.eup %1977 }
  0xe0   :  { %548 = vrot.lane.b32.xlu0 %v1978_v40, %s2329_s7  ;;  %v1980_v19 = vpop.eup %1979  ;;  %v622_v40 = vunpack.c.l.bf16 %v621_v37 }
  0xe1   :  { %v492_v43 = vadd.f32 1.0, %v1980_v19 }
  0xe3   :  { %1981 = vrcp.f32 %v492_v43  ;;  %v504_v55 = vand.u32 2147483648, %v492_v43  ;;  %vm498_vm4 = vweird.f32 %v492_v43  ;;  %v502_v56 = vand.u32 2147483647, %v492_v43 }
  0xe4   :  { %1983 = vpow2.f32 %v1896_v44 }
  0xe5   :  { %v505_v59 = vor.u32 1.1754944e-38, %v504_v55  ;;  %vm503_vm6 = vcmp.eq.f32.partialorder %v502_v56, 8.507059e+37 }
  0xe9   :  { %v1982_v45 = vpop.eup %1981 }
  0xea   :  { %v1984_v47 = vpop.eup %1983  ;;  %v494_v48 = vmul.f32 %v1982_v45, %v492_v43  ;;  %vm499_vm3 = vweird.f32 %v1982_v45 }
  0xeb   :  { %v529_v51 = vadd.f32 1.0, %v1984_v47  ;;  %vm500_vm5 = vmor %vm498_vm4, %vm499_vm3 }
  0xec   :  { %v495_v52 = vsub.f32 1.0, %v494_v48 }
  0xed   :  { %1985 = vrcp.f32 %v529_v51  ;;  %v541_v2 = vand.u32 2147483648, %v529_v51  ;;  %vm535_vm8 = vweird.f32 %v529_v51  ;;  %v539_v3 = vand.u32 2147483647, %v529_v51 }
  0xee   :  { %v496_v53 = vmul.f32 %v1982_v45, %v495_v52 }
  0xef   :  { %v542_v5 = vor.u32 1.1754944e-38, %v541_v2  ;;  %vm540_vm10 = vcmp.eq.f32.partialorder %v539_v3, 8.507059e+37 }
  0xf0   :  { %v497_v31 = vadd.f32 %v1982_v45, %v496_v53 }
  0xf2   :  { %v501_v58 = vsel %vm500_vm5, %v1982_v45, %v497_v31 }
  0xf3   :  { %v1986_v54 = vpop.eup %1985  ;;  %v506_v62 = vsel %vm503_vm6, %v505_v59, %v501_v58 }
  0xf4   :  { %v531_v57 = vmul.f32 %v1986_v54, %v529_v51  ;;  %vm536_vm7 = vweird.f32 %v1986_v54  ;;  %v509_v9 = vmul.f32 0.0, %v506_v62 }
  0xf5   :  { %vm537_vm9 = vmor %vm535_vm8, %vm536_vm7 }
  0xf6   :  { %v532_v60 = vsub.f32 1.0, %v531_v57 }
  0xf8   :  { %v533_v0 = vmul.f32 %v1986_v54, %v532_v60 }
  0xfa   :  { %v534_v1 = vadd.f32 %v1986_v54, %v533_v0 }
  0xfc   :  { %v538_v4 = vsel %vm537_vm9, %v1986_v54, %v534_v1 }
  0xfd   :  { %v543_v6 = vsel %vm540_vm10, %v542_v5, %v538_v4 }
  0xfe   :  { %v546_v15 = vmul.f32 0.0, %v543_v6 }
 0x139   :  { %v410_v13 = vpop.xlane.xlu2 %409 }
 0x13a   :  { %v1942_v20 = vceil.f32 %v410_v13  ;;  %v1943_v21 = vfloor.f32 %v410_v13  ;;  %vm1941_vm11 = vcmp.lt.s32.totalorder %v410_v13, 0 }
 0x13c   :  { %v1944_v23 = vsel %vm1941_vm11, %v1942_v20, %v1943_v21 }
 0x13d   :  { %v2520_v10 = vcvt.f32.s32 %v1944_v23 }
 0x13f   :  { %vm3065_vm12 = vcmp.gt.s32.totalorder %v2520_v10, 0  ;;  %vm3064_vm13 = vcmp.gt.s32.totalorder %v2520_v10, 7  ;;  %vm703_vm10 = vcmp.gt.s32.totalorder %v2520_v10, 6  ;;  %vm702_vm11 = vcmp.gt.s32.totalorder %v2520_v10, 1 }
 0x144   :  { %v512_v61 = vpop.permute.xlu0 %511 }
 0x145   :  { %v514_v63 = vmul.f32 %v512_v61, %v506_v62 }
 0x147   :  { %516 = vrot.lane.b32.xlu1 %v514_v63, %s2330_s21 }
 0x152   :  { %v549_v7 = vpop.permute.xlu0 %548 }
 0x153   :  { %v551_v8 = vmul.f32 %v549_v7, %v543_v6 }
 0x155   :  { %553 = vrot.lane.b32.xlu1 %v551_v8, %s2330_s21 }
 0x1b9   :  { %v517_v11 = vpop.permute.xlu1 %516 }
 0x1ba   :  { %v2512_v12 = vadd.f32 %v517_v11, %v509_v9 }
 0x1bc   :  { %1987 = vtanh.f32 %v2512_v12 }
 0x1c2   :  { %v1988_v14 = vpop.eup %1987 }
 0x1c3   :  { %522 = vrot.lane.b32.xlu2 %v1988_v14, %s2329_s7 }
 0x1c7   :  { %v554_v16 = vpop.permute.xlu1 %553 }
 0x1c8   :  { %v2516_v17 = vadd.f32 %v554_v16, %v546_v15 }
 0x1ca   :  { %1989 = vtanh.f32 %v2516_v17  ;;  %v2555_v23 = vsel %vm3064_vm13, %v2516_v17, 0.0 }
 0x1d0   :  { %v1990_v18 = vpop.eup %1989 }
 0x1d1   :  { %559 = vrot.lane.b32.xlu0 %v1990_v18, %s2329_s7 }
 0x21d   :  { %v523_v24 = vpop.permute.xlu2 %522 }
 0x21e   :  { %v525_v25 = vmul.f32 %v523_v24, %v506_v62 }
 0x220   :  { %v2525_v26 = vsel %vm3065_vm12, %v525_v25, 0.0 }
 0x221   :  { %569 = vrot.lane.b32.xlu1 %v2525_v26, %s2330_s21 }
 0x243   :  { %v560_v27 = vpop.permute.xlu0 %559 }
 0x244   :  { %v562_v28 = vmul.f32 %v560_v27, %v543_v6 }
 0x246   :  { %v2532_v32 = vsel %vm3064_vm13, %v562_v28, 0.0 }
 0x247   :  { %585 = vrot.lane.b32.xlu0 %v2532_v32, %s2329_s7 }
 0x293   :  { %v570_v33 = vpop.permute.xlu1 %569 }
 0x294   :  { %573 = vst.msk [vmem:[#allocation4] sm:$0x3] %vm572_vm14, %v570_v33 }
 0x2b9   :  { %v586_v34 = vpop.permute.xlu0 %585 }
 0x2ba   :  { %v589_v35 = vsel %vm588_vm15, %v570_v33, %v586_v34  ;;  %v2565_v33 = vsel %vm3065_vm12, %v2512_v12, 0.0 }
 0x2bb   :  { %v590_v36 = vpack.c.bf16 %v589_v35, %v589_v35 }
 0x2bd   :  { %1897 = vmatmul.msk.bf16.vlgmr.msrb.gmra.mxu0 %vm149_vm0, %v590_v36  ;;  %1898 = vmatmul.msk.bf16.vlgmr.msrb.gmra.mxu1 %vm149_vm0, %v590_v36 }
 0x2be   :  { %1172 = vmatpush.bf16.msrb.mxu0 %v2420_v22  ;;  %1185 = vmatpush.bf16.msrb.mxu1 %v2425_v30 }
 0x2c2   :  { %1173 = vmatpush.bf16.msrb.mxu0 %v2423_v29  ;;  %1186 = vmatpush.bf16.msrb.mxu1 %v2428_v38 }
 0x2c6   :  { %1174 = vmatpush.bf16.msrb.mxu0 %v2431_v42  ;;  %1187 = vmatpush.bf16.msrb.mxu1 %v2434_v46 }
 0x2ca   :  { %1175 = vmatpush.bf16.msrb.mxu0 %v2438_v49  ;;  %1188 = vmatpush.bf16.msrb.mxu1 %v2444_v50 }
 0x33a   :  { %v603_v19 = vpop.f32.mrf.mxu0  ;;  %v616_v43 = vpop.f32.mrf.mxu1 }
 0x33b   :  { %v623_v44 = vadd.f32 %v622_v40, %v603_v19  ;;  %v627_v45 = vadd.f32 %v626_v41, %v616_v43 }
 0x33d   :  { %1991 = vtanh.f32 %v623_v44  ;;  %v1899_v53 = vmul.f32 -1.442695, %v623_v44  ;;  %v1900_v54 = vmul.f32 -1.442695, %v627_v45 }
 0x33e   :  { %1993 = vtanh.f32 %v627_v45 }
 0x33f   :  { %1995 = vpow2.f32 %v1899_v53 }
 0x340   :  { %1997 = vpow2.f32 %v1900_v54 }
 0x342   :  { %v605_v47 = vpop.f32.mrf.mxu0  ;;  %v618_v48 = vpop.f32.mrf.mxu1 }
 0x343   :  { %v1992_v51 = vpop.eup %1991  ;;  %v770_v48 = vld [vmem:[#allocation3 + $0x5] sm:$0x1] }
 0x344   :  { %v1994_v52 = vpop.eup %1993  ;;  %650 = vrot.lane.b32.xlu1 %v1992_v51, %s2329_s7 }
 0x345   :  { %687 = vrot.lane.b32.xlu0 %v1994_v52, %s2329_s7  ;;  %v1996_v31 = vpop.eup %1995  ;;  %v771_v52 = vunpack.c.l.bf16 %v770_v48 }
 0x346   :  { %v1998_v55 = vpop.eup %1997  ;;  %v631_v56 = vadd.f32 1.0, %v1996_v31 }
 0x347   :  { %v668_v57 = vadd.f32 1.0, %v1998_v55 }
 0x348   :  { %1999 = vrcp.f32 %v631_v56  ;;  %v643_v4 = vand.u32 2147483648, %v631_v56  ;;  %vm637_vm4 = vweird.f32 %v631_v56  ;;  %v641_v6 = vand.u32 2147483647, %v631_v56 }
 0x349   :  { %2001 = vrcp.f32 %v668_v57  ;;  %v680_v5 = vand.u32 2147483648, %v668_v57  ;;  %vm674_vm5 = vweird.f32 %v668_v57  ;;  %v678_v7 = vand.u32 2147483647, %v668_v57 }
 0x34a   :  { %v644_v11 = vor.u32 1.1754944e-38, %v643_v4  ;;  %vm642_vm8 = vcmp.eq.f32.partialorder %v641_v6, 8.507059e+37 }
 0x34b   :  { %v681_v14 = vor.u32 1.1754944e-38, %v680_v5  ;;  %vm679_vm9 = vcmp.eq.f32.partialorder %v678_v7, 8.507059e+37 }
 0x34e   :  { %v2000_v58 = vpop.eup %1999 }
 0x34f   :  { %v2002_v59 = vpop.eup %2001  ;;  %v633_v60 = vmul.f32 %v2000_v58, %v631_v56  ;;  %vm638_vm1 = vweird.f32 %v2000_v58 }
 0x350   :  { %v670_v61 = vmul.f32 %v2002_v59, %v668_v57  ;;  %vm675_vm3 = vweird.f32 %v2002_v59  ;;  %vm639_vm6 = vmor %vm637_vm4, %vm638_vm1 }
 0x351   :  { %v634_v62 = vsub.f32 1.0, %v633_v60  ;;  %vm676_vm7 = vmor %vm674_vm5, %vm675_vm3 }
 0x352   :  { %v671_v63 = vsub.f32 1.0, %v670_v61 }
 0x353   :  { %v635_v0 = vmul.f32 %v2000_v58, %v634_v62 }
 0x354   :  { %v672_v1 = vmul.f32 %v2002_v59, %v671_v63 }
 0x355   :  { %v636_v2 = vadd.f32 %v2000_v58, %v635_v0 }
 0x356   :  { %v673_v3 = vadd.f32 %v2002_v59, %v672_v1 }
 0x357   :  { %v640_v8 = vsel %vm639_vm6, %v2000_v58, %v636_v2 }
 0x358   :  { %v677_v9 = vsel %vm676_vm7, %v2002_v59, %v673_v3  ;;  %v645_v16 = vsel %vm642_vm8, %v644_v11, %v640_v8 }
 0x359   :  { %v682_v13 = vsel %vm679_vm9, %v681_v14, %v677_v9  ;;  %v648_v34 = vmul.f32 %v645_v16, %v2565_v33 }
 0x35a   :  { %v685_v24 = vmul.f32 %v682_v13, %v2555_v23 }
 0x3b6   :  { %v651_v15 = vpop.permute.xlu1 %650 }
 0x3b7   :  { %v688_v18 = vpop.permute.xlu0 %687  ;;  %v653_v20 = vmul.f32 %v651_v15, %v645_v16 }
 0x3b8   :  { %v690_v21 = vmul.f32 %v688_v18, %v682_v13 }
 0x3b9   :  { %655 = vrot.lane.b32.xlu1 %v653_v20, %s2330_s21 }
 0x3ba   :  { %692 = vrot.lane.b32.xlu2 %v690_v21, %s2330_s21 }
 0x414   :  { %v693_v25 = vpop.permute.xlu2 %692 }
 0x415   :  { %v2558_v27 = vadd.f32 %v693_v25, %v685_v24 }
 0x417   :  { %2003 = vtanh.f32 %v2558_v27 }
 0x41d   :  { %v2004_v28 = vpop.eup %2003 }
 0x41e   :  { %698 = vrot.lane.b32.xlu1 %v2004_v28, %s2329_s7 }
 0x42b   :  { %v656_v35 = vpop.permute.xlu1 %655 }
 0x42c   :  { %v2568_v17 = vadd.f32 %v656_v35, %v648_v34 }
 0x42e   :  { %2005 = vtanh.f32 %v2568_v17  ;;  %v2624_v48 = vsel %vm702_vm11, %v2568_v17, %v2565_v33 }
 0x434   :  { %v2006_v36 = vpop.eup %2005 }
 0x435   :  { %661 = vrot.lane.b32.xlu0 %v2006_v36, %s2329_s7 }
 0x490   :  { %v699_v37 = vpop.permute.xlu1 %698 }
 0x491   :  { %v2572_v39 = vmul.f32 %v699_v37, %v682_v13 }
 0x493   :  { %v2579_v12 = vsel %vm703_vm10, %v2572_v39, %v2532_v32 }
 0x494   :  { %731 = vrot.lane.b32.xlu0 %v2579_v12, %s2329_s7 }
 0x4a7   :  { %v662_v40 = vpop.permute.xlu0 %661 }
 0x4a8   :  { %v2583_v41 = vmul.f32 %v662_v40, %v645_v16 }
 0x4aa   :  { %v2590_v19 = vsel %vm702_vm11, %v2583_v41, %v2525_v26  ;;  %v766_v26 = vld [vmem:[#allocation2 + $0x2] sm:$0x1] }
 0x4ab   :  { %727 = vrot.lane.b32.xlu2 %v2590_v19, %s2330_s21  ;;  %v767_v51 = vunpack.c.l.bf16 %v766_v26 }
 0x505   :  { %v728_v43 = vpop.permute.xlu2 %727 }
 0x506   :  { %v732_v44 = vpop.permute.xlu0 %731 }
 0x507   :  { %v734_v45 = vsel %vm588_vm15, %v728_v43, %v732_v44  ;;  %v2613_v43 = vsel %vm703_vm10, %v2558_v27, %v2555_v23 }
 0x508   :  { %v735_v47 = vpack.c.bf16 %v734_v45, %v734_v45 }
 0x50a   :  { %1901 = vmatmul.msk.bf16.vlgmr.msrb.gmra.mxu2 %vm149_vm0, %v735_v47  ;;  %1902 = vmatmul.msk.bf16.vlgmr.msrb.gmra.mxu3 %vm149_vm0, %v735_v47 }
 0x50b   :  { %1311 = vmatpush.bf16.msrb.mxu2 %v2420_v22  ;;  %1324 = vmatpush.bf16.msrb.mxu3 %v2425_v30 }
 0x50f   :  { %1312 = vmatpush.bf16.msrb.mxu2 %v2423_v29  ;;  %1325 = vmatpush.bf16.msrb.mxu3 %v2428_v38 }
 0x513   :  { %1313 = vmatpush.bf16.msrb.mxu2 %v2431_v42  ;;  %1326 = vmatpush.bf16.msrb.mxu3 %v2434_v46 }
 0x517   :  { %1314 = vmatpush.bf16.msrb.mxu2 %v2438_v49  ;;  %1327 = vmatpush.bf16.msrb.mxu3 %v2444_v50 }
 0x58d   :  { %v748_v53 = vpop.f32.mrf.mxu2  ;;  %v761_v54 = vpop.f32.mrf.mxu3 }
 0x58e   :  { %v768_v31 = vadd.f32 %v767_v51, %v748_v53  ;;  %v772_v55 = vadd.f32 %v771_v52, %v761_v54 }
 0x590   :  { %2007 = vtanh.f32 %v768_v31  ;;  %v1904_v60 = vmul.f32 -1.442695, %v772_v55  ;;  %v1903_v0 = vmul.f32 -1.442695, %v768_v31 }
 0x591   :  { %2009 = vtanh.f32 %v772_v55 }
 0x592   :  { %2011 = vpow2.f32 %v1904_v60 }
 0x595   :  { %v750_v56 = vpop.f32.mrf.mxu2  ;;  %v763_v57 = vpop.f32.mrf.mxu3 }
 0x596   :  { %v2008_v58 = vpop.eup %2007 }
 0x597   :  { %v2010_v59 = vpop.eup %2009  ;;  %795 = vrot.lane.b32.xlu1 %v2008_v58, %s2329_s7 }
 0x598   :  { %832 = vrot.lane.b32.xlu2 %v2010_v59, %s2329_s7  ;;  %v2012_v61 = vpop.eup %2011 }
 0x599   :  { %v813_v62 = vadd.f32 1.0, %v2012_v61 }
 0x59b   :  { %2013 = vrcp.f32 %v813_v62  ;;  %v825_v7 = vand.u32 2147483648, %v813_v62  ;;  %vm819_vm3 = vweird.f32 %v813_v62  ;;  %v823_v8 = vand.u32 2147483647, %v813_v62 }
 0x59c   :  { %2015 = vpow2.f32 %v1903_v0 }
 0x59d   :  { %v826_v11 = vor.u32 1.1754944e-38, %v825_v7  ;;  %vm824_vm5 = vcmp.eq.f32.partialorder %v823_v8, 8.507059e+37 }
 0x5a1   :  { %v2014_v63 = vpop.eup %2013 }
 0x5a2   :  { %v815_v1 = vmul.f32 %v2014_v63, %v813_v62  ;;  %v2016_v3 = vpop.eup %2015  ;;  %vm820_vm1 = vweird.f32 %v2014_v63 }
 0x5a3   :  { %v776_v5 = vadd.f32 1.0, %v2016_v3  ;;  %vm821_vm4 = vmor %vm819_vm3, %vm820_vm1  ;;  %vm847_vm1 = vcmp.gt.s32.totalorder %v2520_v10, 2  ;;  %vm848_vm3 = vcmp.gt.s32.totalorder %v2520_v10, 5 }
 0x5a4   :  { %v816_v2 = vsub.f32 1.0, %v815_v1 }
 0x5a5   :  { %2017 = vrcp.f32 %v776_v5  ;;  %v788_v25 = vand.u32 2147483648, %v776_v5  ;;  %vm782_vm7 = vweird.f32 %v776_v5  ;;  %v786_v28 = vand.u32 2147483647, %v776_v5 }
 0x5a6   :  { %v817_v4 = vmul.f32 %v2014_v63, %v816_v2 }
 0x5a7   :  { %v789_v35 = vor.u32 1.1754944e-38, %v788_v25  ;;  %vm787_vm9 = vcmp.eq.f32.partialorder %v786_v28, 8.507059e+37 }
 0x5a8   :  { %v818_v6 = vadd.f32 %v2014_v63, %v817_v4 }
 0x5aa   :  { %v822_v9 = vsel %vm821_vm4, %v2014_v63, %v818_v6 }
 0x5ab   :  { %v827_v15 = vsel %vm824_vm5, %v826_v11, %v822_v9  ;;  %v2018_v16 = vpop.eup %2017 }
 0x5ac   :  { %v778_v13 = vmul.f32 %v2018_v16, %v776_v5  ;;  %vm783_vm6 = vweird.f32 %v2018_v16  ;;  %v830_v44 = vmul.f32 %v827_v15, %v2613_v43 }
 0x5ad   :  { %vm784_vm8 = vmor %vm782_vm7, %vm783_vm6 }
 0x5ae   :  { %v779_v20 = vsub.f32 1.0, %v778_v13 }
 0x5b0   :  { %v780_v21 = vmul.f32 %v2018_v16, %v779_v20 }
 0x5b2   :  { %v781_v24 = vadd.f32 %v2018_v16, %v780_v21 }
 0x5b4   :  { %v785_v34 = vsel %vm784_vm8, %v2018_v16, %v781_v24 }
 0x5b5   :  { %v790_v37 = vsel %vm787_vm9, %v789_v35, %v785_v34 }
 0x5b6   :  { %v793_v51 = vmul.f32 %v790_v37, %v2624_v48 }
 0x5f2   :  { %v833_v14 = vpop.permute.xlu2 %832 }
 0x5f3   :  { %v835_v18 = vmul.f32 %v833_v14, %v827_v15 }
 0x5f5   :  { %837 = vrot.lane.b32.xlu1 %v835_v18, %s2330_s21 }
 0x609   :  { %v796_v36 = vpop.permute.xlu1 %795 }
 0x60a   :  { %v798_v40 = vmul.f32 %v796_v36, %v790_v37 }
 0x60c   :  { %800 = vrot.lane.b32.xlu0 %v798_v40, %s2330_s21 }
 0x667   :  { %v838_v45 = vpop.permute.xlu1 %837 }
 0x668   :  { %v2616_v47 = vadd.f32 %v838_v45, %v830_v44 }
 0x66a   :  { %2019 = vtanh.f32 %v2616_v47 }
 0x670   :  { %v2020_v26 = vpop.eup %2019 }
 0x671   :  { %843 = vrot.lane.b32.xlu0 %v2020_v26, %s2329_s7 }
 0x67e   :  { %v801_v23 = vpop.permute.xlu0 %800 }
 0x67f   :  { %v2627_v27 = vadd.f32 %v801_v23, %v793_v51 }
 0x681   :  { %2021 = vtanh.f32 %v2627_v27  ;;  %v2672_v26 = vsel %vm847_vm1, %v2627_v27, %v2624_v48 }
 0x687   :  { %v2022_v52 = vpop.eup %2021 }
 0x688   :  { %806 = vrot.lane.b32.xlu2 %v2022_v52, %s2329_s7 }
 0x6e2   :  { %v807_v53 = vpop.permute.xlu2 %806 }
 0x6e3   :  { %v844_v54 = vpop.permute.xlu0 %843  ;;  %v2631_v31 = vmul.f32 %v807_v53, %v790_v37 }
 0x6e4   :  { %v2633_v55 = vmul.f32 %v844_v54, %v827_v15  ;;  %v2683_v54 = vsel %vm848_vm3, %v2616_v47, %v2613_v43 }
 0x6e5   :  { %v2641_v33 = vsel %vm847_vm1, %v2631_v31, %v2590_v19  ;;  %v915_v19 = vld [vmem:[#allocation3 + $0x4] sm:$0x1] }
 0x6e6   :  { %v2647_v17 = vsel %vm848_vm3, %v2633_v55, %v2579_v12  ;;  %872 = vrot.lane.b32.xlu1 %v2641_v33, %s2330_s21  ;;  %v911_v12 = vld [vmem:[#allocation2 + $0x3] sm:$0x1]  ;;  %v916_v61 = vunpack.c.l.bf16 %v915_v19 }
 0x6e7   :  { %876 = vrot.lane.b32.xlu2 %v2647_v17, %s2329_s7  ;;  %v912_v60 = vunpack.c.l.bf16 %v911_v12 }
 0x741   :  { %v877_v56 = vpop.permute.xlu2 %876 }
 0x758   :  { %v873_v57 = vpop.permute.xlu1 %872 }
 0x759   :  { %v879_v58 = vsel %vm588_vm15, %v873_v57, %v877_v56 }
 0x75a   :  { %v880_v59 = vpack.c.bf16 %v879_v58, %v879_v58 }
 0x75c   :  { %1905 = vmatmul.msk.bf16.vlgmr.msra.gmra.mxu0 %vm149_vm0, %v880_v59  ;;  %1906 = vmatmul.msk.bf16.vlgmr.msra.gmra.mxu1 %vm149_vm0, %v880_v59 }
 0x75d   :  { %1463 = vmatpush.bf16.msra.mxu1 %v2425_v30  ;;  %1450 = vmatpush.bf16.msra.mxu0 %v2420_v22 }
 0x761   :  { %1464 = vmatpush.bf16.msra.mxu1 %v2428_v38  ;;  %1451 = vmatpush.bf16.msra.mxu0 %v2423_v29 }
 0x765   :  { %1465 = vmatpush.bf16.msra.mxu1 %v2434_v46  ;;  %1452 = vmatpush.bf16.msra.mxu0 %v2431_v42 }
 0x769   :  { %1466 = vmatpush.bf16.msra.mxu1 %v2444_v50  ;;  %1453 = vmatpush.bf16.msra.mxu0 %v2438_v49 }
 0x7d9   :  { %v893_v62 = vpop.f32.mrf.mxu0  ;;  %v906_v30 = vpop.f32.mrf.mxu1 }
 0x7da   :  { %v913_v63 = vadd.f32 %v912_v60, %v893_v62  ;;  %v917_v22 = vadd.f32 %v916_v61, %v906_v30 }
 0x7dc   :  { %2023 = vtanh.f32 %v913_v63  ;;  %v1907_v42 = vmul.f32 -1.442695, %v913_v63  ;;  %v1908_v49 = vmul.f32 -1.442695, %v917_v22  ;;  %v1060_v63 = vld [vmem:[#allocation3 + $0x3] sm:$0x1] }
 0x7dd   :  { %2025 = vtanh.f32 %v917_v22 }
 0x7de   :  { %2027 = vpow2.f32 %v1907_v42 }
 0x7df   :  { %2029 = vpow2.f32 %v1908_v49 }
 0x7e1   :  { %v895_v38 = vpop.f32.mrf.mxu0  ;;  %v908_v29 = vpop.f32.mrf.mxu1 }
 0x7e2   :  { %v2024_v0 = vpop.eup %2023 }
 0x7e3   :  { %v2026_v46 = vpop.eup %2025  ;;  %940 = vrot.lane.b32.xlu0 %v2024_v0, %s2329_s7 }
 0x7e4   :  { %977 = vrot.lane.b32.xlu1 %v2026_v46, %s2329_s7  ;;  %v2028_v50 = vpop.eup %2027 }
 0x7e5   :  { %v2030_v1 = vpop.eup %2029  ;;  %v921_v2 = vadd.f32 1.0, %v2028_v50 }
 0x7e6   :  { %v958_v3 = vadd.f32 1.0, %v2030_v1 }
 0x7e7   :  { %2031 = vrcp.f32 %v921_v2  ;;  %v933_v18 = vand.u32 2147483648, %v921_v2  ;;  %vm927_vm6 = vweird.f32 %v921_v2  ;;  %v931_v20 = vand.u32 2147483647, %v921_v2 }
 0x7e8   :  { %2033 = vrcp.f32 %v958_v3  ;;  %v970_v13 = vand.u32 2147483648, %v958_v3  ;;  %vm964_vm7 = vweird.f32 %v958_v3  ;;  %v968_v21 = vand.u32 2147483647, %v958_v3 }
 0x7e9   :  { %v934_v28 = vor.u32 1.1754944e-38, %v933_v18  ;;  %vm932_vm2 = vcmp.eq.f32.partialorder %v931_v20, 8.507059e+37 }
 0x7ea   :  { %v971_v34 = vor.u32 1.1754944e-38, %v970_v13  ;;  %vm969_vm13 = vcmp.eq.f32.partialorder %v968_v21, 8.507059e+37 }
 0x7ed   :  { %v2032_v4 = vpop.eup %2031 }
 0x7ee   :  { %v2034_v5 = vpop.eup %2033  ;;  %v923_v6 = vmul.f32 %v2032_v4, %v921_v2  ;;  %vm928_vm4 = vweird.f32 %v2032_v4 }
 0x7ef   :  { %v960_v7 = vmul.f32 %v2034_v5, %v958_v3  ;;  %vm965_vm5 = vweird.f32 %v2034_v5  ;;  %vm929_vm8 = vmor %vm927_vm6, %vm928_vm4 }
 0x7f0   :  { %v924_v8 = vsub.f32 1.0, %v923_v6  ;;  %vm966_vm9 = vmor %vm964_vm7, %vm965_vm5 }
 0x7f1   :  { %v961_v9 = vsub.f32 1.0, %v960_v7 }
 0x7f2   :  { %v925_v11 = vmul.f32 %v2032_v4, %v924_v8 }
 0x7f3   :  { %v962_v14 = vmul.f32 %v2034_v5, %v961_v9 }
 0x7f4   :  { %v926_v15 = vadd.f32 %v2032_v4, %v925_v11 }
 0x7f5   :  { %v963_v16 = vadd.f32 %v2034_v5, %v962_v14 }
 0x7f6   :  { %v930_v24 = vsel %vm929_vm8, %v2032_v4, %v926_v15 }
 0x7f7   :  { %v967_v25 = vsel %vm966_vm9, %v2034_v5, %v963_v16  ;;  %v935_v36 = vsel %vm932_vm2, %v934_v28, %v930_v24  ;;  %vm992_vm2 = vcmp.gt.s32.totalorder %v2520_v10, 3 }
 0x7f8   :  { %v972_v40 = vsel %vm969_vm13, %v971_v34, %v967_v25  ;;  %v938_v51 = vmul.f32 %v935_v36, %v2672_v26  ;;  %vm3066_vm13 = vcmp.gt.s32.totalorder %v2520_v10, 4 }
 0x7f9   :  { %v975_v56 = vmul.f32 %v972_v40, %v2683_v54 }
 0x855   :  { %v941_v35 = vpop.permute.xlu0 %940 }
 0x856   :  { %v978_v37 = vpop.permute.xlu1 %977  ;;  %v943_v44 = vmul.f32 %v941_v35, %v935_v36 }
 0x857   :  { %v980_v45 = vmul.f32 %v978_v37, %v972_v40 }
 0x858   :  { %945 = vrot.lane.b32.xlu2 %v943_v44, %s2330_s21 }
 0x859   :  { %982 = vrot.lane.b32.xlu0 %v980_v45, %s2330_s21 }
 0x8b2   :  { %v946_v23 = vpop.permute.xlu2 %945 }
 0x8b3   :  { %v2675_v52 = vadd.f32 %v946_v23, %v938_v51 }
 0x8b5   :  { %2035 = vtanh.f32 %v2675_v52 }
 0x8bb   :  { %v2036_v53 = vpop.eup %2035 }
 0x8bc   :  { %951 = vrot.lane.b32.xlu1 %v2036_v53, %s2329_s7 }
 0x8cb   :  { %v983_v48 = vpop.permute.xlu0 %982 }
 0x8cc   :  { %v2686_v27 = vadd.f32 %v983_v48, %v975_v56  ;;  %v2723_v48 = vsel %vm992_vm2, %v2675_v52, %v2672_v26 }
 0x8ce   :  { %2037 = vtanh.f32 %v2686_v27 }
 0x8d4   :  { %v2038_v57 = vpop.eup %2037 }
 0x8d5   :  { %988 = vrot.lane.b32.xlu2 %v2038_v57, %s2329_s7  ;;  %v2729_v57 = vsel %vm3066_vm13, %v2686_v27, %v2683_v54 }
 0x92e   :  { %v952_v58 = vpop.permute.xlu1 %951 }
 0x92f   :  { %v989_v59 = vpop.permute.xlu2 %988  ;;  %v2690_v12 = vmul.f32 %v952_v58, %v935_v36 }
 0x930   :  { %v2692_v19 = vmul.f32 %v989_v59, %v972_v40 }
 0x931   :  { %v2700_v43 = vsel %vm992_vm2, %v2690_v12, %v2641_v33  ;;  %v1056_v33 = vld [vmem:[#allocation2 + $0x4] sm:$0x1] }
 0x932   :  { %v2706_v47 = vsel %vm3066_vm13, %v2692_v19, %v2647_v17  ;;  %1017 = vrot.lane.b32.xlu0 %v2700_v43, %s2330_s21  ;;  %v1057_v22 = vunpack.c.l.bf16 %v1056_v33  ;;  %v1061_v17 = vunpack.c.l.bf16 %v1060_v63 }
 0x933   :  { %1021 = vrot.lane.b32.xlu1 %v2706_v47, %s2329_s7 }
 0x9a4   :  { %v1018_v60 = vpop.permute.xlu0 %1017 }
 0x9a5   :  { %v1022_v61 = vpop.permute.xlu1 %1021 }
 0x9a6   :  { %v1024_v62 = vsel %vm588_vm15, %v1018_v60, %v1022_v61 }
 0x9a7   :  { %v1025_v30 = vpack.c.bf16 %v1024_v62, %v1024_v62 }
 0x9a9   :  { %1909 = vmatmul.msk.bf16.vlgmr.msra.gmra.mxu2 %vm149_vm0, %v1025_v30  ;;  %1910 = vmatmul.msk.bf16.vlgmr.msra.gmra.mxu3 %vm149_vm0, %v1025_v30 }
 0xa2c   :  { %v1038_v38 = vpop.f32.mrf.mxu2  ;;  %v1051_v29 = vpop.f32.mrf.mxu3 }
 0xa2d   :  { %v1058_v0 = vadd.f32 %v1057_v22, %v1038_v38  ;;  %v1062_v46 = vadd.f32 %v1061_v17, %v1051_v29 }
 0xa2f   :  { %2039 = vtanh.f32 %v1058_v0  ;;  %v1911_v2 = vmul.f32 -1.442695, %v1058_v0  ;;  %v1912_v6 = vmul.f32 -1.442695, %v1062_v46 }
 0xa30   :  { %2041 = vtanh.f32 %v1062_v46 }
 0xa31   :  { %2043 = vpow2.f32 %v1911_v2 }
 0xa34   :  { %v1040_v42 = vpop.f32.mrf.mxu2  ;;  %v1053_v49 = vpop.f32.mrf.mxu3 }
 0xa35   :  { %v2040_v50 = vpop.eup %2039  ;;  %v1199_v42 = vld [vmem:[#allocation3 + $0x2] sm:$0x1] }
 0xa36   :  { %v2042_v1 = vpop.eup %2041  ;;  %1085 = vrot.lane.b32.xlu2 %v2040_v50, %s2329_s7 }
 0xa37   :  { %1122 = vrot.lane.b32.xlu0 %v2042_v1, %s2329_s7  ;;  %v2044_v3 = vpop.eup %2043 }
 0xa38   :  { %v1066_v4 = vadd.f32 1.0, %v2044_v3 }
 0xa3a   :  { %2045 = vrcp.f32 %v1066_v4  ;;  %v1078_v16 = vand.u32 2147483648, %v1066_v4  ;;  %vm1072_vm5 = vweird.f32 %v1066_v4  ;;  %v1076_v18 = vand.u32 2147483647, %v1066_v4 }
 0xa3b   :  { %2047 = vpow2.f32 %v1912_v6 }
 0xa3c   :  { %v1079_v20 = vor.u32 1.1754944e-38, %v1078_v16  ;;  %vm1077_vm7 = vcmp.eq.f32.partialorder %v1076_v18, 8.507059e+37 }
 0xa40   :  { %v2046_v5 = vpop.eup %2045 }
 0xa41   :  { %v1068_v7 = vmul.f32 %v2046_v5, %v1066_v4  ;;  %v2048_v11 = vpop.eup %2047  ;;  %vm1073_vm4 = vweird.f32 %v2046_v5 }
 0xa42   :  { %v1103_v14 = vadd.f32 1.0, %v2048_v11  ;;  %vm1074_vm6 = vmor %vm1072_vm5, %vm1073_vm4 }
 0xa43   :  { %v1069_v8 = vsub.f32 1.0, %v1068_v7 }
 0xa44   :  { %2049 = vrcp.f32 %v1103_v14  ;;  %v1115_v40 = vand.u32 2147483648, %v1103_v14  ;;  %vm1109_vm9 = vweird.f32 %v1103_v14  ;;  %v1113_v44 = vand.u32 2147483647, %v1103_v14 }
 0xa45   :  { %v1070_v9 = vmul.f32 %v2046_v5, %v1069_v8 }
 0xa46   :  { %v1116_v51 = vor.u32 1.1754944e-38, %v1115_v40  ;;  %vm1114_vm4 = vcmp.eq.f32.partialorder %v1113_v44, 8.507059e+37 }
 0xa47   :  { %v1071_v15 = vadd.f32 %v2046_v5, %v1070_v9 }
 0xa49   :  { %v1075_v13 = vsel %vm1074_vm6, %v2046_v5, %v1071_v15 }
 0xa4a   :  { %v1080_v24 = vsel %vm1077_vm7, %v1079_v20, %v1075_v13  ;;  %v2050_v28 = vpop.eup %2049 }
 0xa4b   :  { %v1105_v34 = vmul.f32 %v2050_v28, %v1103_v14  ;;  %vm1110_vm8 = vweird.f32 %v2050_v28  ;;  %v1083_v58 = vmul.f32 %v1080_v24, %v2723_v48 }
 0xa4c   :  { %vm1111_vm12 = vmor %vm1109_vm9, %vm1110_vm8 }
 0xa4d   :  { %v1106_v35 = vsub.f32 1.0, %v1105_v34 }
 0xa4f   :  { %v1107_v36 = vmul.f32 %v2050_v28, %v1106_v35 }
 0xa51   :  { %v1108_v37 = vadd.f32 %v2050_v28, %v1107_v36 }
 0xa53   :  { %v1112_v45 = vsel %vm1111_vm12, %v2050_v28, %v1108_v37 }
 0xa54   :  { %v1117_v53 = vsel %vm1114_vm4, %v1116_v51, %v1112_v45 }
 0xa55   :  { %v1120_v59 = vmul.f32 %v1117_v53, %v2729_v57 }
 0xa90   :  { %v1086_v21 = vpop.permute.xlu2 %1085 }
 0xa91   :  { %v1088_v25 = vmul.f32 %v1086_v21, %v1080_v24 }
 0xa93   :  { %1090 = vrot.lane.b32.xlu1 %v1088_v25, %s2330_s21 }
 0xaa9   :  { %v1123_v23 = vpop.permute.xlu0 %1122 }
 0xaaa   :  { %v1125_v56 = vmul.f32 %v1123_v23, %v1117_v53 }
 0xaac   :  { %1127 = vrot.lane.b32.xlu2 %v1125_v56, %s2330_s21 }
 0xb05   :  { %v1091_v60 = vpop.permute.xlu1 %1090 }
 0xb06   :  { %v1128_v61 = vpop.permute.xlu2 %1127  ;;  %v2733_v62 = vadd.f32 %v1091_v60, %v1083_v58 }
 0xb07   :  { %v2735_v30 = vadd.f32 %v1128_v61, %v1120_v59 }
 0xb08   :  { %2051 = vtanh.f32 %v2733_v62 }
 0xb09   :  { %2053 = vtanh.f32 %v2735_v30 }
 0xb0e   :  { %v2052_v26 = vpop.eup %2051 }
 0xb0f   :  { %v2054_v52 = vpop.eup %2053  ;;  %1096 = vrot.lane.b32.xlu0 %v2052_v26, %s2329_s7 }
 0xb10   :  { %1133 = vrot.lane.b32.xlu1 %v2054_v52, %s2329_s7 }
 0xb81   :  { %v1097_v54 = vpop.permute.xlu0 %1096 }
 0xb82   :  { %v1134_v27 = vpop.permute.xlu1 %1133  ;;  %v2741_v33 = vmul.f32 %v1097_v54, %v1080_v24  ;;  %v2772_v54 = vsel %vm992_vm2, %v2735_v30, %v2729_v57 }
 0xb83   :  { %v2743_v63 = vmul.f32 %v1134_v27, %v1117_v53 }
 0xb84   :  { %v2749_v22 = vsel %vm3066_vm13, %v2741_v33, %v2700_v43  ;;  %v1195_v43 = vld [vmem:[#allocation2 + $0x5] sm:$0x1] }
 0xb85   :  { %v2755_v17 = vsel %vm992_vm2, %v2743_v63, %v2706_v47  ;;  %1156 = vrot.lane.b32.xlu2 %v2749_v22, %s2330_s21  ;;  %v1196_v49 = vunpack.c.l.bf16 %v1195_v43  ;;  %v1200_v47 = vunpack.c.l.bf16 %v1199_v42 }
 0xb86   :  { %1160 = vrot.lane.b32.xlu0 %v2755_v17, %s2329_s7 }
 0xbdf   :  { %v1157_v38 = vpop.permute.xlu2 %1156 }
 0xbf8   :  { %v1161_v29 = vpop.permute.xlu0 %1160 }
 0xbf9   :  { %v1163_v0 = vsel %vm588_vm15, %v1157_v38, %v1161_v29 }
 0xbfa   :  { %v1164_v46 = vpack.c.bf16 %v1163_v0, %v1163_v0 }
 0xbfc   :  { %1913 = vmatmul.msk.bf16.vlgmr.msrb.gmra.mxu0 %vm149_vm0, %v1164_v46  ;;  %1914 = vmatmul.msk.bf16.vlgmr.msrb.gmra.mxu1 %vm149_vm0, %v1164_v46  ;;  %v2783_v46 = vsel %vm3066_vm13, %v2733_v62, %v2723_v48 }
 0xc79   :  { %v1177_v50 = vpop.f32.mrf.mxu0  ;;  %v1190_v1 = vpop.f32.mrf.mxu1 }
 0xc7a   :  { %v1197_v2 = vadd.f32 %v1196_v49, %v1177_v50  ;;  %v1201_v3 = vadd.f32 %v1200_v47, %v1190_v1 }
 0xc7c   :  { %2055 = vtanh.f32 %v1197_v2  ;;  %v1916_v8 = vmul.f32 -1.442695, %v1201_v3  ;;  %v1915_v15 = vmul.f32 -1.442695, %v1197_v2 }
 0xc7d   :  { %2057 = vtanh.f32 %v1201_v3 }
 0xc7e   :  { %2059 = vpow2.f32 %v1916_v8 }
 0xc81   :  { %v1179_v4 = vpop.f32.mrf.mxu0  ;;  %v1192_v5 = vpop.f32.mrf.mxu1 }
 0xc82   :  { %v2056_v6 = vpop.eup %2055 }
 0xc83   :  { %v2058_v7 = vpop.eup %2057  ;;  %1224 = vrot.lane.b32.xlu1 %v2056_v6, %s2329_s7  ;;  %v1338_v6 = vld [vmem:[#allocation3 + $0x1] sm:$0x1] }
 0xc84   :  { %1261 = vrot.lane.b32.xlu2 %v2058_v7, %s2329_s7  ;;  %v2060_v9 = vpop.eup %2059 }
 0xc85   :  { %v1242_v11 = vadd.f32 1.0, %v2060_v9 }
 0xc87   :  { %2061 = vrcp.f32 %v1242_v11  ;;  %v1254_v25 = vand.u32 2147483648, %v1242_v11  ;;  %vm1248_vm5 = vweird.f32 %v1242_v11  ;;  %v1252_v28 = vand.u32 2147483647, %v1242_v11 }
 0xc88   :  { %2063 = vpow2.f32 %v1915_v15 }
 0xc89   :  { %v1255_v35 = vor.u32 1.1754944e-38, %v1254_v25  ;;  %vm1253_vm7 = vcmp.eq.f32.partialorder %v1252_v28, 8.507059e+37 }
 0xc8d   :  { %v2062_v14 = vpop.eup %2061 }
 0xc8e   :  { %v1244_v16 = vmul.f32 %v2062_v14, %v1242_v11  ;;  %v2064_v13 = vpop.eup %2063  ;;  %vm1249_vm12 = vweird.f32 %v2062_v14 }
 0xc8f   :  { %v1205_v21 = vadd.f32 1.0, %v2064_v13  ;;  %vm1250_vm6 = vmor %vm1248_vm5, %vm1249_vm12 }
 0xc90   :  { %v1245_v18 = vsub.f32 1.0, %v1244_v16 }
 0xc91   :  { %2065 = vrcp.f32 %v1205_v21  ;;  %v1217_v56 = vand.u32 2147483648, %v1205_v21  ;;  %vm1211_vm9 = vweird.f32 %v1205_v21  ;;  %v1215_v58 = vand.u32 2147483647, %v1205_v21 }
 0xc92   :  { %v1246_v20 = vmul.f32 %v2062_v14, %v1245_v18 }
 0xc93   :  { %v1218_v60 = vor.u32 1.1754944e-38, %v1217_v56  ;;  %vm1216_vm12 = vcmp.eq.f32.partialorder %v1215_v58, 8.507059e+37 }
 0xc94   :  { %v1247_v24 = vadd.f32 %v2062_v14, %v1246_v20 }
 0xc96   :  { %v1251_v34 = vsel %vm1250_vm6, %v2062_v14, %v1247_v24 }
 0xc97   :  { %v1256_v37 = vsel %vm1253_vm7, %v1255_v35, %v1251_v34  ;;  %v2066_v40 = vpop.eup %2065 }
 0xc98   :  { %v1207_v45 = vmul.f32 %v2066_v40, %v1205_v21  ;;  %vm1212_vm8 = vweird.f32 %v2066_v40  ;;  %v1259_v27 = vmul.f32 %v1256_v37, %v2772_v54 }
 0xc99   :  { %vm1213_vm4 = vmor %vm1211_vm9, %vm1212_vm8 }
 0xc9a   :  { %v1208_v51 = vsub.f32 1.0, %v1207_v45 }
 0xc9c   :  { %v1209_v23 = vmul.f32 %v2066_v40, %v1208_v51 }
 0xc9e   :  { %v1210_v53 = vadd.f32 %v2066_v40, %v1209_v23 }
 0xca0   :  { %v1214_v59 = vsel %vm1213_vm4, %v2066_v40, %v1210_v53 }
 0xca1   :  { %v1219_v26 = vsel %vm1216_vm12, %v1218_v60, %v1214_v59 }
 0xca2   :  { %v1222_v43 = vmul.f32 %v1219_v26, %v2783_v46 }
 0xcde   :  { %v1262_v36 = vpop.permute.xlu2 %1261 }
 0xcdf   :  { %v1264_v44 = vmul.f32 %v1262_v36, %v1256_v37 }
 0xce1   :  { %1266 = vrot.lane.b32.xlu1 %v1264_v44, %s2330_s21 }
 0xcf5   :  { %v1225_v61 = vpop.permute.xlu1 %1224 }
 0xcf6   :  { %v1227_v52 = vmul.f32 %v1225_v61, %v1219_v26 }
 0xcf8   :  { %1229 = vrot.lane.b32.xlu0 %v1227_v52, %s2330_s21 }
 0xd53   :  { %v1267_v38 = vpop.permute.xlu1 %1266 }
 0xd54   :  { %v2775_v29 = vadd.f32 %v1267_v38, %v1259_v27 }
 0xd56   :  { %2067 = vtanh.f32 %v2775_v29 }
 0xd5c   :  { %v2068_v0 = vpop.eup %2067 }
 0xd5d   :  { %1272 = vrot.lane.b32.xlu0 %v2068_v0, %s2329_s7 }
 0xd6a   :  { %v1230_v57 = vpop.permute.xlu0 %1229 }
 0xd6b   :  { %v2786_v30 = vadd.f32 %v1230_v57, %v1222_v43 }
 0xd6d   :  { %2069 = vtanh.f32 %v2786_v30 }
 0xd73   :  { %v2070_v42 = vpop.eup %2069 }
 0xd74   :  { %1235 = vrot.lane.b32.xlu2 %v2070_v42, %s2329_s7 }
 0xdce   :  { %v1236_v49 = vpop.permute.xlu2 %1235 }
 0xdcf   :  { %v1273_v47 = vpop.permute.xlu0 %1272  ;;  %v2790_v50 = vmul.f32 %v1236_v49, %v1219_v26 }
 0xdd0   :  { %v2792_v1 = vmul.f32 %v1273_v47, %v1256_v37 }
 0xdd1   :  { %v2798_v48 = vsel %vm848_vm3, %v2790_v50, %v2749_v22  ;;  %v1334_v22 = vld [vmem:[#allocation2 + $0x6] sm:$0x1] }
 0xdd2   :  { %v2804_v62 = vsel %vm847_vm1, %v2792_v1, %v2755_v17  ;;  %1295 = vrot.lane.b32.xlu1 %v2798_v48, %s2330_s21  ;;  %v1335_v7 = vunpack.c.l.bf16 %v1334_v22  ;;  %v1339_v17 = vunpack.c.l.bf16 %v1338_v6  ;;  %v2832_v6 = vsel %vm847_vm1, %v2775_v29, %v2772_v54 }
 0xdd3   :  { %1299 = vrot.lane.b32.xlu2 %v2804_v62, %s2329_s7 }
 0xe2d   :  { %v1300_v2 = vpop.permute.xlu2 %1299 }
 0xe44   :  { %v1296_v3 = vpop.permute.xlu1 %1295 }
 0xe45   :  { %v1302_v4 = vsel %vm588_vm15, %v1296_v3, %v1300_v2  ;;  %v2821_v2 = vsel %vm848_vm3, %v2786_v30, %v2783_v46 }
 0xe46   :  { %v1303_v5 = vpack.c.bf16 %v1302_v4, %v1302_v4 }
 0xe48   :  { %1917 = vmatmul.msk.bf16.vlgmr.msrb.gmra.mxu2 %vm149_vm0, %v1303_v5  ;;  %1918 = vmatmul.msk.bf16.vlgmr.msrb.gmra.mxu3 %vm149_vm0, %v1303_v5 }
 0xecb   :  { %v1316_v8 = vpop.f32.mrf.mxu2  ;;  %v1329_v9 = vpop.f32.mrf.mxu3 }
 0xecc   :  { %v1336_v11 = vadd.f32 %v1335_v7, %v1316_v8  ;;  %v1340_v14 = vadd.f32 %v1339_v17, %v1329_v9 }
 0xece   :  { %2071 = vtanh.f32 %v1336_v11  ;;  %v1919_v20 = vmul.f32 -1.442695, %v1336_v11  ;;  %v1920_v21 = vmul.f32 -1.442695, %v1340_v14 }
 0xecf   :  { %2073 = vtanh.f32 %v1340_v14 }
 0xed0   :  { %2075 = vpow2.f32 %v1919_v20 }
 0xed1   :  { %2077 = vpow2.f32 %v1920_v21  ;;  %v1476_v21 = vld [vmem:[#allocation3] sm:$0x1] }
 0xed3   :  { %v1318_v15 = vpop.f32.mrf.mxu2  ;;  %v1331_v16 = vpop.f32.mrf.mxu3 }
 0xed4   :  { %v2072_v18 = vpop.eup %2071  ;;  %v996_v15 = vsel %vm992_vm2, %v2690_v12, 0.0 }
 0xed5   :  { %v2074_v13 = vpop.eup %2073  ;;  %1363 = vrot.lane.b32.xlu0 %v2072_v18, %s2329_s7 }
 0xed6   :  { %1400 = vrot.lane.b32.xlu1 %v2074_v13, %s2329_s7  ;;  %v2076_v24 = vpop.eup %2075 }
 0xed7   :  { %v2078_v25 = vpop.eup %2077  ;;  %v1344_v28 = vadd.f32 1.0, %v2076_v24 }
 0xed8   :  { %v1381_v34 = vadd.f32 1.0, %v2078_v25  ;;  %v1477_v25 = vunpack.c.l.bf16 %v1476_v21 }
 0xed9   :  { %2079 = vrcp.f32 %v1344_v28  ;;  %v1356_v58 = vand.u32 2147483648, %v1344_v28  ;;  %vm1350_vm7 = vweird.f32 %v1344_v28  ;;  %v1354_v60 = vand.u32 2147483647, %v1344_v28 }
 0xeda   :  { %2081 = vrcp.f32 %v1381_v34  ;;  %v1393_v59 = vand.u32 2147483648, %v1381_v34  ;;  %vm1387_vm8 = vweird.f32 %v1381_v34  ;;  %v1391_v61 = vand.u32 2147483647, %v1381_v34 }
 0xedb   :  { %v1357_v27 = vor.u32 1.1754944e-38, %v1356_v58  ;;  %vm1355_vm12 = vcmp.eq.f32.partialorder %v1354_v60, 8.507059e+37 }
 0xedc   :  { %v1394_v38 = vor.u32 1.1754944e-38, %v1393_v59  ;;  %vm1392_vm13 = vcmp.eq.f32.partialorder %v1391_v61, 8.507059e+37 }
 0xedf   :  { %v2080_v35 = vpop.eup %2079 }
 0xee0   :  { %v2082_v36 = vpop.eup %2081  ;;  %v1346_v37 = vmul.f32 %v2080_v35, %v1344_v28  ;;  %vm1351_vm5 = vweird.f32 %v2080_v35 }
 0xee1   :  { %v1383_v40 = vmul.f32 %v2082_v36, %v1381_v34  ;;  %vm1388_vm6 = vweird.f32 %v2082_v36  ;;  %vm1352_vm9 = vmor %vm1350_vm7, %vm1351_vm5 }
 0xee2   :  { %v1347_v44 = vsub.f32 1.0, %v1346_v37  ;;  %vm1389_vm4 = vmor %vm1387_vm8, %vm1388_vm6  ;;  %vm3067_vm6 = vcmp.gt.s32.totalorder %v2520_v10, 4 }
 0xee3   :  { %v1384_v45 = vsub.f32 1.0, %v1383_v40 }
 0xee4   :  { %v1348_v51 = vmul.f32 %v2080_v35, %v1347_v44 }
 0xee5   :  { %v1385_v23 = vmul.f32 %v2082_v36, %v1384_v45 }
 0xee6   :  { %v1349_v53 = vadd.f32 %v2080_v35, %v1348_v51  ;;  %v706_v51 = vsel %vm702_vm11, %v2583_v41, 0.0 }
 0xee7   :  { %v1386_v56 = vadd.f32 %v2082_v36, %v1385_v23  ;;  %v1283_v23 = vsel %vm847_vm1, %v2792_v1, 0.0 }
 0xee8   :  { %v1353_v26 = vsel %vm1352_vm9, %v2080_v35, %v1349_v53  ;;  %v851_v53 = vsel %vm847_vm1, %v2631_v31, 0.0 }
 0xee9   :  { %v1390_v52 = vsel %vm1389_vm4, %v2082_v36, %v1386_v56  ;;  %v1358_v43 = vsel %vm1355_vm12, %v1357_v27, %v1353_v26  ;;  %vm1678_vm12 = vcmask 1043459  }
 0xeea   :  { %v1395_v42 = vsel %vm1392_vm13, %v1394_v38, %v1390_v52  ;;  %v1361_v3 = vmul.f32 %v1358_v43, %v2821_v2 }
 0xeeb   :  { %v1398_v7 = vmul.f32 %v1395_v42, %v2832_v6 }
 0xf47   :  { %v1364_v0 = vpop.permute.xlu0 %1363 }
 0xf48   :  { %v1401_v57 = vpop.permute.xlu1 %1400  ;;  %v1366_v49 = vmul.f32 %v1364_v0, %v1358_v43 }
 0xf49   :  { %v1403_v47 = vmul.f32 %v1401_v57, %v1395_v42 }
 0xf4a   :  { %1368 = vrot.lane.b32.xlu2 %v1366_v49, %s2330_s21 }
 0xf4b   :  { %1405 = vrot.lane.b32.xlu0 %v1403_v47, %s2330_s21 }
 0xfa4   :  { %v1369_v4 = vpop.permute.xlu2 %1368 }
 0xfa5   :  { %v2824_v5 = vadd.f32 %v1369_v4, %v1361_v3 }
 0xfa7   :  { %2083 = vtanh.f32 %v2824_v5 }
 0xfad   :  { %v2084_v22 = vpop.eup %2083 }
 0xfae   :  { %1374 = vrot.lane.b32.xlu1 %v2084_v22, %s2329_s7 }
 0xfbd   :  { %v1406_v46 = vpop.permute.xlu0 %1405 }
 0xfbe   :  { %v2835_v30 = vadd.f32 %v1406_v46, %v1398_v7  ;;  %v1137_v46 = vsel %vm3067_vm6, %v2741_v33, 0.0 }
 0xfc0   :  { %2085 = vtanh.f32 %v2835_v30 }
 0xfc6   :  { %v2086_v17 = vpop.eup %2085 }
 0xfc7   :  { %1411 = vrot.lane.b32.xlu2 %v2086_v17, %s2329_s7 }
0x1020   :  { %v1375_v8 = vpop.permute.xlu1 %1374 }
0x1021   :  { %v1412_v9 = vpop.permute.xlu2 %1411  ;;  %v2839_v11 = vmul.f32 %v1375_v8, %v1358_v43 }
0x1022   :  { %v1414_v14 = vmul.f32 %v1412_v9, %v1395_v42 }
0x1023   :  { %v1429_v54 = vsel %vm703_vm10, %v2839_v11, %v2798_v48  ;;  %v1415_v21 = vsel %vm703_vm10, %v2839_v11, 0.0  ;;  %v2919_v11 = vld [vmem:[%s3056_s4 + $0x1] ss:$0 sm:$0xff] }
0x1024   :  { %v1431_v29 = vsel %vm702_vm11, %v1414_v14, %v2804_v62  ;;  %1434 = vrot.lane.b32.xlu0 %v1429_v54, %s2330_s21  ;;  %v1473_v62 = vld [vmem:[#allocation2 + $0x7] sm:$0x1]  ;;  %v1422_v45 = vsel %vm702_vm11, %v1414_v14, 0.0  ;;  %v715_v54 = vsel %vm703_vm10, %v2572_v39, 0.0  ;;  %v1144_v39 = vsel %vm992_vm2, %v2743_v63, 0.0 }
0x1025   :  { %1438 = vrot.lane.b32.xlu1 %v1431_v29, %s2329_s7  ;;  %v1474_v24 = vunpack.c.l.bf16 %v1473_v62  ;;  %v860_v62 = vsel %vm848_vm3, %v2633_v55, 0.0  ;;  %v2910_v63 = vld [vmem:[%s3056_s4] ss:$0 sm:$0xff]  ;;  %v1566_v55 = vld [vmem:[#allocation4] sm:$0x3]  ;;  %vm1676_vm2 = vcmask 1042434  }
0x102d   :  { %998 = vrot.lane.b32.xlu1 %v996_v15, %s2330_s21 }
0x1096   :  { %v1435_v16 = vpop.permute.xlu0 %1434 }
0x1097   :  { %v1439_v18 = vpop.permute.xlu1 %1438 }
0x1098   :  { %v1441_v13 = vsel %vm588_vm15, %v1435_v16, %v1439_v18 }
0x1099   :  { %v1442_v20 = vpack.c.bf16 %v1441_v13, %v1441_v13 }
0x109b   :  { %1921 = vmatmul.msk.bf16.vlgmr.msra.gmra.mxu0 %vm149_vm0, %v1442_v20  ;;  %1922 = vmatmul.msk.bf16.vlgmr.msra.gmra.mxu1 %vm149_vm0, %v1442_v20 }
0x109f   :  { %v999_v48 = vpop.permute.xlu1 %998 }
0x10a0   :  { %1002 = vst.msk [vmem:[#allocation4 + $0x6] sm:$0x3] %vm572_vm14, %v999_v48 }
0x1118   :  { %v1455_v28 = vpop.f32.mrf.mxu0  ;;  %v1468_v12 = vpop.f32.mrf.mxu1 }
0x1119   :  { %v1475_v34 = vadd.f32 %v1474_v24, %v1455_v28  ;;  %v1478_v35 = vadd.f32 %v1477_v25, %v1468_v12  ;;  %v1569_v24 = vld [vmem:[#allocation4 + $0x6] sm:$0x3]  ;;  %v1575_v12 = vmul.f32 %v2910_v63, %v1566_v55 }
0x111a   :  { %v1578_v25 = vmul.f32 %v2910_v63, %v1569_v24 }
0x111b   :  { %2087 = vtanh.f32 %v1475_v34  ;;  %v1924_v56 = vmul.f32 -1.442695, %v1478_v35  ;;  %v1923_v60 = vmul.f32 -1.442695, %v1475_v34  ;;  %v1583_v34 = vsel %vm572_vm14, %v1575_v12, 0.0 }
0x111c   :  { %2089 = vtanh.f32 %v1478_v35  ;;  %v1592_v28 = vsel %vm572_vm14, %v1578_v25, 0.0  ;;  %v1971_v12 = vld [vmem:[#allocation12 + $0x2] ss:$0 sm:$0xff] }
0x111d   :  { %2091 = vpow2.f32 %v1924_v56 }
0x1120   :  { %v1457_v36 = vpop.f32.mrf.mxu0  ;;  %v1470_v37 = vpop.f32.mrf.mxu1 }
0x1121   :  { %v2088_v40 = vpop.eup %2087 }
0x1122   :  { %v2090_v44 = vpop.eup %2089  ;;  %1501 = vrot.lane.b32.xlu0 %v2088_v40, %s2329_s7 }
0x1123   :  { %1538 = vrot.lane.b32.xlu2 %v2090_v44, %s2329_s7  ;;  %v2092_v58 = vpop.eup %2091 }
0x1124   :  { %v1519_v41 = vadd.f32 1.0, %v2092_v58 }
0x1126   :  { %2093 = vrcp.f32 %v1519_v41  ;;  %v1531_v31 = vand.u32 2147483648, %v1519_v41  ;;  %vm1525_vm1 = vweird.f32 %v1519_v41  ;;  %v1529_v0 = vand.u32 2147483647, %v1519_v41 }
0x1127   :  { %2095 = vpow2.f32 %v1923_v60 }
0x1128   :  { %v1532_v57 = vor.u32 1.1754944e-38, %v1531_v31  ;;  %vm1530_vm5 = vcmp.eq.f32.partialorder %v1529_v0, 8.507059e+37  ;;  %v1276_v31 = vsel %vm848_vm3, %v2790_v50, 0.0  ;;  %vm3070_vm3 = vcmp.gt.s32.totalorder %v2520_v10, 7 }
0x112a   :  { %1424 = vrot.lane.b32.xlu0 %v1422_v45, %s2330_s21 }
0x112b   :  { %708 = vrot.lane.b32.xlu2 %v706_v51, %s2330_s21  ;;  %v1430_v51 = vsel %vm703_vm10, %v2824_v5, %v2821_v2  ;;  %vm3068_vm10 = vmmov %vm3067_vm6  ;;  %vm3071_vm6 = vcmask 58368  }
0x112c   :  { %v2094_v59 = vpop.eup %2093 }
0x112d   :  { %v1521_v61 = vmul.f32 %v2094_v59, %v1519_v41  ;;  %v2096_v52 = vpop.eup %2095  ;;  %vm1526_vm15 = vweird.f32 %v2094_v59 }
0x112e   :  { %v1482_v27 = vadd.f32 1.0, %v2096_v52  ;;  %vm1527_vm13 = vmor %vm1525_vm1, %vm1526_vm15  ;;  %vm1680_vm15 = vcmask 1044484   ;;  %vm1682_vm1 = vcmask 1045509  }
0x112f   :  { %v1522_v26 = vsub.f32 1.0, %v1521_v61 }
0x1130   :  { %2097 = vrcp.f32 %v1482_v27  ;;  %v1494_v14 = vand.u32 2147483648, %v1482_v27  ;;  %vm1488_vm8 = vweird.f32 %v1482_v27  ;;  %v1492_v29 = vand.u32 2147483647, %v1482_v27 }
0x1131   :  { %v1523_v1 = vmul.f32 %v2094_v59, %v1522_v26 }
0x1132   :  { %1285 = vrot.lane.b32.xlu0 %v1283_v23, %s2330_s21  ;;  %v1495_v33 = vor.u32 1.1754944e-38, %v1494_v14  ;;  %vm1493_vm4 = vcmp.eq.f32.partialorder %v1492_v29, 8.507059e+37 }
0x1133   :  { %853 = vrot.lane.b32.xlu2 %v851_v53, %s2330_s21  ;;  %v1524_v38 = vadd.f32 %v2094_v59, %v1523_v1  ;;  %v1432_v53 = vsel %vm702_vm11, %v2835_v30, %v2832_v6  ;;  %v1005_v1 = vsel %vm3068_vm10, %v2692_v19, 0.0  ;;  %vm3069_vm11 = vcmp.gt.s32.totalorder %v2520_v10, 0 }
0x1135   :  { %v1528_v43 = vsel %vm1527_vm13, %v2094_v59, %v1524_v38  ;;  %vm1684_vm13 = vcmask 1046534  }
0x1136   :  { %v2875_v49 = vsel %vm1530_vm5, %v1532_v57, %v1528_v43  ;;  %v2098_v47 = vpop.eup %2097  ;;  %vm1686_vm5 = vcmask 1047559  }
0x1137   :  { %v1484_v4 = vmul.f32 %v2098_v47, %v1482_v27  ;;  %vm1489_vm7 = vweird.f32 %v2098_v47  ;;  %v1536_v58 = vmul.f32 %v2875_v49, %v1432_v53 }
0x1138   :  { %vm1490_vm9 = vmor %vm1488_vm8, %vm1489_vm7 }
0x1139   :  { %v1485_v7 = vsub.f32 1.0, %v1484_v4  ;;  %vm3072_vm7 = vmmov %vm3071_vm6 }
0x113a   :  { %vm3073_vm8 = vmmov %vm3071_vm6 }
0x113b   :  { %v1486_v17 = vmul.f32 %v2098_v47, %v1485_v7 }
0x113d   :  { %v1487_v9 = vadd.f32 %v2098_v47, %v1486_v17 }
0x113f   :  { %v1491_v15 = vsel %vm1490_vm9, %v2098_v47, %v1487_v9  ;;  %vm3074_vm9 = vmmov %vm3071_vm6 }
0x1140   :  { %v2889_v18 = vsel %vm1493_vm4, %v1495_v33, %v1491_v15  ;;  %vm3075_vm4 = vmmov %vm3071_vm6 }
0x1141   :  { %v1499_v23 = vmul.f32 %v2889_v18, %v1430_v51  ;;  %v2331_v51 = vmov 1   ;;  %vm3076_vm10 = vmmov %vm3075_vm4 }
0x1142   :  { %1964 = vset.pattern.permute.xlu1 %v2331_v51 }
0x117d   :  { %v1539_v42 = vpop.permute.xlu2 %1538 }
0x117e   :  { %v1541_v3 = vmul.f32 %v1539_v42, %v2875_v49 }
0x1180   :  { %1543 = vrot.lane.b32.xlu1 %v1541_v3, %s2330_s21 }
0x1185   :  { %v709_v22 = vpop.permute.xlu2 %708 }
0x1186   :  { %712 = vst.msk [vmem:[#allocation4 + $0x2] sm:$0x3] %vm572_vm14, %v709_v22 }
0x1188   :  { %1139 = vrot.lane.b32.xlu1 %v1137_v46, %s2330_s21 }
0x118d   :  { %v854_v8 = vpop.permute.xlu2 %853  ;;  %v1567_v0 = vld [vmem:[#allocation4 + $0x2] sm:$0x3] }
0x118e   :  { %857 = vst.msk [vmem:[#allocation4 + $0x4] sm:$0x3] %vm572_vm14, %v854_v8  ;;  %v1576_v19 = vmul.f32 %v2910_v63, %v1567_v0 }
0x1190   :  { %717 = vrot.lane.b32.xlu1 %v715_v54, %s2330_s21  ;;  %v1586_v43 = vsel %vm572_vm14, %v1576_v19, 0.0 }
0x1194   :  { %v1502_v16 = vpop.permute.xlu0 %1501 }
0x1195   :  { %v1504_v13 = vmul.f32 %v1502_v16, %v2889_v18  ;;  %v1568_v40 = vld [vmem:[#allocation4 + $0x4] sm:$0x3] }
0x1196   :  { %v1577_v44 = vmul.f32 %v2910_v63, %v1568_v40 }
0x1197   :  { %1506 = vrot.lane.b32.xlu2 %v1504_v13, %s2330_s21 }
0x1198   :  { %v1589_v45 = vsel %vm572_vm14, %v1577_v44, 0.0 }
0x119c   :  { %v1425_v20 = vpop.permute.xlu0 %1424 }
0x119d   :  { %1428 = vst.msk [vmem:[#allocation5 + $0x2] sm:$0x3] %vm572_vm14, %v1425_v20 }
0x119f   :  { %1146 = vrot.lane.b32.xlu2 %v1144_v39, %s2330_s21 }
0x11a4   :  { %v1286_v48 = vpop.permute.xlu0 %1285  ;;  %v1608_v35 = vld [vmem:[#allocation5 + $0x2] sm:$0x3] }
0x11a5   :  { %1289 = vst.msk [vmem:[#allocation5 + $0x4] sm:$0x3] %vm572_vm14, %v1286_v48  ;;  %v1617_v36 = vmul.f32 %v2919_v11, %v1608_v35 }
0x11a7   :  { %862 = vrot.lane.b32.xlu2 %v860_v62, %s2330_s21  ;;  %v1627_v37 = vsel %vm572_vm14, %v1617_v36, 0.0 }
0x11ac   :  { %v1609_v57 = vld [vmem:[#allocation5 + $0x4] sm:$0x3] }
0x11ad   :  { %v1618_v42 = vmul.f32 %v2919_v11, %v1609_v57 }
0x11af   :  { %1417 = vrot.lane.b32.xlu2 %v1415_v21, %s2330_s21  ;;  %v1630_v47 = vsel %vm572_vm14, %v1618_v42, 0.0 }
0x11ba   :  { %1593 = vadd.xlane.f32.xlu1 %v1592_v28 }
0x11d8   :  { %1584 = vadd.xlane.f32.xlu2 %v1583_v34  ;;  %v2978_v34 = vld [vmem:[#allocation6 + $0x8] sm:$0xff] }
0x11d9   :  { %v177_v35 = vmul.f32 %v1971_v12, %v2978_v34 }
0x11db   :  { %v181_v36 = vsel %vm149_vm0, %v177_v35, 0.0 }
0x11e0   :  { %1628 = vadd.xlane.f32.xlu2 %v1627_v37 }
0x11e8   :  { %1590 = vadd.xlane.f32.xlu2 %v1589_v45 }
0x11f1   :  { %v1507_v56 = vpop.permute.xlu2 %1506 }
0x11f2   :  { %v2935_v41 = vadd.f32 %v1507_v56, %v1499_v23  ;;  %v1544_v59 = vpop.permute.xlu1 %1543 }
0x11f3   :  { %v1546_v60 = vadd.f32 %v1544_v59, %v1536_v58 }
0x11f5   :  { %2099 = vtanh.f32 %v1546_v60 }
0x11f6   :  { %2101 = vtanh.f32 %v2935_v41 }
0x11f9   :  { %v1147_v61 = vpop.permute.xlu2 %1146 }
0x11fa   :  { %1150 = vst.msk [vmem:[#allocation5 + $0x6] sm:$0x3] %vm572_vm14, %v1147_v61  ;;  %v1140_v26 = vpop.permute.xlu1 %1139 }
0x11fb   :  { %v2100_v2 = vpop.eup %2099  ;;  %1143 = vst.msk [vmem:[#allocation4 + $0x8] sm:$0x3] %vm572_vm14, %v1140_v26  ;;  %v3003_v26 = vld [vmem:[#allocation6] sm:$0xff] }
0x11fc   :  { %1549 = vrot.lane.b32.xlu0 %v2100_v2, %s2329_s7  ;;  %v2102_v55 = vpop.eup %2101  ;;  %v176_v2 = vmul.f32 %v1971_v12, %v3003_v26 }
0x1201   :  { %v863_v5 = vpop.permute.xlu2 %862  ;;  %v1610_v52 = vld [vmem:[#allocation5 + $0x6] sm:$0x3] }
0x1202   :  { %866 = vst.msk [vmem:[#allocation5 + $0xa] sm:$0x3] %vm572_vm14, %v863_v5  ;;  %v718_v6 = vpop.permute.xlu1 %717  ;;  %v1619_v30 = vmul.f32 %v2919_v11, %v1610_v52  ;;  %v1570_v3 = vld [vmem:[#allocation4 + $0x8] sm:$0x3]  ;;  %v178_v5 = vsel %vm149_vm0, %v176_v2, 0.0 }
0x1203   :  { %721 = vst.msk [vmem:[#allocation5 + $0xc] sm:$0x3] %vm572_vm14, %v718_v6  ;;  %v1579_v50 = vmul.f32 %v2910_v63, %v1570_v3 }
0x1204   :  { %1007 = vrot.lane.b32.xlu0 %v1005_v1, %s2330_s21  ;;  %v1633_v27 = vsel %vm572_vm14, %v1619_v30, 0.0 }
0x1205   :  { %1634 = vadd.xlane.f32.xlu2 %v1633_v27  ;;  %v1595_v4 = vsel %vm572_vm14, %v1579_v50, 0.0 }
0x1209   :  { %v1418_v38 = vpop.permute.xlu2 %1417  ;;  %v1612_v22 = vld [vmem:[#allocation5 + $0xa] sm:$0x3] }
0x120a   :  { %1421 = vst.msk [vmem:[#allocation4 + $0xc] sm:$0x3] %vm572_vm14, %v1418_v38  ;;  %v1613_v48 = vld [vmem:[#allocation5 + $0xc] sm:$0x3] }
0x120b   :  { %v1622_v62 = vmul.f32 %v2919_v11, %v1613_v48 }
0x120c   :  { %1278 = vrot.lane.b32.xlu0 %v1276_v31, %s2330_s21 }
0x120d   :  { %v1642_v28 = vsel %vm572_vm14, %v1622_v62, 0.0 }
0x1211   :  { %v1572_v29 = vld [vmem:[#allocation4 + $0xc] sm:$0x3] }
0x1212   :  { %v1581_v15 = vmul.f32 %v2910_v63, %v1572_v29 }
0x1214   :  { %578 = vrot.lane.b32.xlu0 %v2532_v32, %s2330_s21  ;;  %v1621_v32 = vmul.f32 %v2919_v11, %v1612_v22  ;;  %v1601_v20 = vsel %vm572_vm14, %v1581_v15, 0.0 }
0x1216   :  { %v1639_v7 = vsel %vm572_vm14, %v1621_v32, 0.0 }
0x122d   :  { %v1594_v44 = vpop.xlane.xlu1 %1593 }
0x123e   :  { %1587 = vadd.xlane.f32.xlu0 %v1586_v43 }
0x1246   :  { %1631 = vadd.xlane.f32.xlu0 %v1630_v47  ;;  %v1664_v47 = vlaneseq }
0x1248   :  { %v3012_v22 = vand.u32 127, %v1664_v47 }
0x124e   :  { %1596 = vadd.xlane.f32.xlu0 %v1595_v4 }
0x1256   :  { %1640 = vadd.xlane.f32.xlu0 %v1639_v7 }
0x125e   :  { %179 = vadd.xlane.f32.xlu0 %v178_v5 }
0x126e   :  { %v1550_v46 = vpop.permute.xlu0 %1549 }
0x126f   :  { %v1552_v37 = vmul.f32 %v1550_v46, %v2875_v49  ;;  %v2995_v49 = vld [vmem:[%s3060_s8] ss:$0 sm:$0xff]  ;;  %s2333_s8 = smov [#allocation17]  }
0x1270   :  { %s1798_s1 = sshll.u32 %s2333_s8, 4  ;;  %s1799_s1 = int_to_ptr.vmem [resolvable:$true] %s1798_s1 }
0x1271   :  { %v1560_v40 = vsel %vm3069_vm11, %v1552_v37, 0.0 }
0x1276   :  { %v1008_v17 = vpop.permute.xlu0 %1007 }
0x1277   :  { %1011 = vst.msk [vmem:[#allocation5 + $0x8] sm:$0x3] %vm572_vm14, %v1008_v17 }
0x127e   :  { %v1279_v8 = vpop.permute.xlu0 %1278  ;;  %v1611_v9 = vld [vmem:[#allocation5 + $0x8] sm:$0x3] }
0x127f   :  { %1282 = vst.msk [vmem:[#allocation4 + $0xa] sm:$0x3] %vm572_vm14, %v1279_v8  ;;  %v1620_v14 = vmul.f32 %v2919_v11, %v1611_v9 }
0x1281   :  { %v1636_v54 = vsel %vm572_vm14, %v1620_v14, 0.0 }
0x1282   :  { %1637 = vadd.xlane.f32.xlu1 %v1636_v54 }
0x1286   :  { %v579_v33 = vpop.permute.xlu0 %578  ;;  %v1571_v16 = vld [vmem:[#allocation4 + $0xa] sm:$0x3] }
0x1287   :  { %582 = vst.msk [vmem:[#allocation5 + $0xe] sm:$0x3] %vm572_vm14, %v579_v33  ;;  %v1580_v13 = vmul.f32 %v2910_v63, %v1571_v16 }
0x1289   :  { %v1598_v39 = vsel %vm572_vm14, %v1580_v13, 0.0 }
0x128a   :  { %1602 = vadd.xlane.f32.xlu1 %v1601_v20  ;;  %1599 = vadd.xlane.f32.xlu2 %v1598_v39 }
0x128e   :  { %v1614_v21 = vld [vmem:[#allocation5 + $0xe] sm:$0x3] }
0x128f   :  { %v1623_v24 = vmul.f32 %v2919_v11, %v1614_v21 }
0x1291   :  { %v1645_v25 = vsel %vm572_vm14, %v1623_v24, 0.0 }
0x1292   :  { %1646 = vadd.xlane.f32.xlu1 %v1645_v25  ;;  %1643 = vadd.xlane.f32.xlu2 %v1642_v28  ;;  %v1973_v25 = vld [vmem:[#allocation12] ss:$0 sm:$0xff]  ;;  %v1724_v28 = vshrl.u32 %v1664_v47, 7  ;;  %v2113_v47 = vld [vmem:[#allocation11] sm:$0x3] }
0x1294   :  { %1965 = vset.pattern.permute.xlu0 %v1724_v28 }
0x12ab   :  { %1512 = vrot.lane.b32.xlu1 %v2102_v55, %s2329_s7  ;;  %v148_v55 = vmul.f32 %v1973_v25, %v2978_v34  ;;  %v147_v34 = vmul.f32 %v1973_v25, %v3003_v26 }
0x12ad   :  { %v153_v12 = vsel %vm149_vm0, %v148_v55, 0.0 }
0x12b1   :  { %v1588_v38 = vpop.xlane.xlu0 %1587 }
0x12b9   :  { %v1632_v0 = vpop.xlane.xlu0 %1631 }
0x12c1   :  { %v1597_v42 = vpop.xlane.xlu0 %1596 }
0x12c9   :  { %v1641_v46 = vpop.xlane.xlu0 %1640 }
0x12d1   :  { %v180_v35 = vpop.xlane.xlu0 %179 }
0x12d5   :  { %182 = vadd.xlane.f32.xlu1 %v181_v36 }
0x12ee   :  { %1562 = vrot.lane.b32.xlu1 %v1560_v40, %s2330_s21 }
0x12f5   :  { %v1638_v45 = vpop.xlane.xlu1 %1637 }
0x12f6   :  { %v1652_v17 = vadd.f32 %v1638_v45, %v1597_v42 }
0x12f8   :  { %v1670_v16 = vperm.slane %v1652_v17, %v3012_v22 }
0x12fd   :  { %v1603_v23 = vpop.xlane.xlu1 %1602 }
0x1305   :  { %v2986_v53 = vpop.xlane.xlu1 %1646 }
0x131d   :  { %v1513_v56 = vpop.permute.xlu1 %1512 }
0x131e   :  { %v1515_v58 = vmul.f32 %v1513_v56, %v2889_v18  ;;  %v2332_v56 = vmov 0  }
0x1320   :  { %v1553_v41 = vsel %vm3070_vm3, %v1515_v58, 0.0  ;;  %v150_v58 = vsel %vm149_vm0, %v147_v34, 0.0 }
0x1321   :  { %1555 = vrot.lane.b32.xlu1 %v1553_v41, %s2330_s21  ;;  %v1974_v41 = vld [vmem:[#allocation12 + $0x1] ss:$0 sm:$0xff] }
0x1329   :  { %1741 = vperm.xlu1 %1964, %v2995_v49  }
0x1331   :  { %1966 = vset.pattern.permute.xlu1 %v1724_v28 }
0x1348   :  { %v2998_v59 = vpop.xlane.xlu1 %182 }
0x1360   :  { %v1563_v60 = vpop.permute.xlu1 %1562 }
0x1361   :  { %1565 = vst.msk [vmem:[#allocation5] sm:$0x3] %vm572_vm14, %v1563_v60 }
0x1368   :  { %v1607_v61 = vld [vmem:[#allocation5] sm:$0x3] }
0x1369   :  { %v1616_v18 = vmul.f32 %v2919_v11, %v1607_v61  ;;  %v1585_v11 = vpop.xlane.xlu2 %1584  ;;  %v2112_v61 = vld [vmem:[#allocation9] sm:$0xff] }
0x136b   :  { %v1624_v10 = vsel %vm572_vm14, %v1616_v18, 0.0  ;;  %v157_v18 = vmul.f32 %v2112_v61, %v1974_v41 }
0x136c   :  { %1625 = vadd.xlane.f32.xlu1 %v1624_v10 }
0x136d   :  { %v159_v2 = vsel %vm149_vm0, %v157_v18, 0.0 }
0x1371   :  { %v1629_v27 = vpop.xlane.xlu2 %1628 }
0x1372   :  { %v1649_v3 = vadd.f32 %v1629_v27, %v1588_v38 }
0x1374   :  { %v1667_v8 = vperm.slane %v1649_v3, %v3012_v22  ;;  %154 = vadd.xlane.f32.xlu1 %v153_v12 }
0x1379   :  { %v1591_v31 = vpop.xlane.xlu2 %1590 }
0x137a   :  { %v1650_v50 = vadd.f32 %v1632_v0, %v1591_v31 }
0x137c   :  { %v1668_v54 = vperm.slane %v1650_v50, %v3012_v22 }
0x1381   :  { %v1635_v19 = vpop.xlane.xlu2 %1634 }
0x1389   :  { %v1600_v57 = vpop.xlane.xlu2 %1599 }
0x138a   :  { %v1653_v9 = vadd.f32 %v1641_v46, %v1600_v57 }
0x138c   :  { %v1671_v20 = vperm.slane %v1653_v9, %v3012_v22 }
0x1391   :  { %v1644_v32 = vpop.xlane.xlu2 %1643 }
0x1392   :  { %v1654_v29 = vadd.f32 %v1644_v32, %v1603_v23 }
0x1393   :  { %v1556_v52 = vpop.permute.xlu1 %1555 }
0x1394   :  { %1559 = vst.msk [vmem:[#allocation4 + $0xe] sm:$0x3] %vm572_vm14, %v1556_v52  ;;  %v1672_v48 = vperm.slane %v1654_v29, %v3012_v22 }
0x139b   :  { %v1573_v6 = vld [vmem:[#allocation4 + $0xe] sm:$0x3]  ;;  %v3010_v43 = vpop.permute.xlu1 %1741 }
0x139c   :  { %v1582_v30 = vmul.f32 %v2910_v63, %v1573_v6  ;;  %v1651_v63 = vadd.f32 %v1635_v19, %v1594_v44 }
0x139e   :  { %v1604_v1 = vsel %vm572_vm14, %v1582_v30, 0.0  ;;  %vm1674_vm14 = vcmask 1041409   ;;  %v1669_v15 = vperm.slane %v1651_v63, %v3012_v22 }
0x139f   :  { %1605 = vadd.xlane.f32.xlu0 %v1604_v1 }
0x13df   :  { %v1626_v4 = vpop.xlane.xlu1 %1625 }
0x13e0   :  { %v1648_v7 = vadd.f32 %v1626_v4, %v1585_v11 }
0x13e2   :  { %v1666_v14 = vperm.slane %v1648_v7, %v3012_v22 }
0x13e4   :  { %v1675_v33 = vsel %vm1674_vm14, %v1667_v8, %v1666_v14 }
0x13e5   :  { %v1677_v13 = vsel %vm1676_vm2, %v1668_v54, %v1675_v33 }
0x13e6   :  { %v1679_v39 = vsel %vm1678_vm12, %v1669_v15, %v1677_v13 }
0x13e7   :  { %v1681_v62 = vsel %vm1680_vm15, %v1670_v16, %v1679_v39  ;;  %v155_v26 = vpop.xlane.xlu1 %154 }
0x13e8   :  { %v1683_v21 = vsel %vm1682_vm1, %v1671_v20, %v1681_v62 }
0x13e9   :  { %v1685_v24 = vsel %vm1684_vm13, %v1672_v48, %v1683_v21 }
0x1412   :  { %v1606_v36 = vpop.xlane.xlu0 %1605 }
0x1413   :  { %v1655_v37 = vadd.f32 %v2986_v53, %v1606_v36  ;;  %v2111_v53 = vld [vmem:[#allocation9 + $0x8] sm:$0xff] }
0x1414   :  { %v158_v60 = vmul.f32 %v2111_v53, %v1974_v41 }
0x1415   :  { %v1673_v40 = vperm.slane %v1655_v37, %v3012_v22 }
0x1416   :  { %v162_v10 = vsel %vm149_vm0, %v158_v60, 0.0  ;;  %vm1746_vm0 = vcmp.gt.f32.partialorder %v2113_v47, 0.5 }
0x1417   :  { %v1687_v44 = vsel %vm1686_vm5, %v1673_v40, %v1685_v24 }
0x1418   :  { %1689 = vxpose.xlu2.b32.start.end [1/1] (short) (narrow) %v1687_v44, 8 }
0x1489   :  { %151 = vadd.xlane.f32.xlu2 %v150_v58 }
0x14b1   :  { %v1705_v45 = vpop.trf.xlu2 }
0x14b2   :  { %v1722_v51 = vperm.slane %v1705_v45, 0  ;;  %v1729_v23 = vperm.slane %v1705_v45, 1 }
0x14b4   :  { %1734 = vperm.xlu1 %1966, %v1729_v23   ;;  %1727 = vperm.xlu0 %1965, %v1722_v51  }
0x14bc   :  { %1967 = vset.pattern.permute.xlu0 %v2332_v56  ;;  %1968 = vset.pattern.permute.xlu1 %v2332_v56 }
0x14de   :  { %163 = vadd.xlane.f32.xlu1 %v162_v10  ;;  %160 = vadd.xlane.f32.xlu0 %v159_v2 }
0x14f2   :  { %170 = vperm.xlu0 %1967, %v2995_v49  }
0x14fc   :  { %v152_v38 = vpop.xlane.xlu2 %151 }
0x1526   :  { %v1728_v5 = vpop.permute.xlu0 %1727  ;;  %v1735_v30 = vpop.permute.xlu1 %1734 }
0x1527   :  { %v1738_v52 = vadd.f32 %v1728_v5, %v180_v35  ;;  %v1739_v1 = vadd.f32 %v1735_v30, %v2998_v59 }
0x1529   :  { %v1744_v6 = vadd.f32 %v3010_v43, %v1738_v52  ;;  %v1745_v11 = vadd.f32 %v3010_v43, %v1739_v1 }
0x152b   :  { %1770 = vperm.xlu1 %1968, %v1744_v6  }
0x1533   :  { %1773 = vperm.xlu1 %1968, %v1745_v11  }
0x1551   :  { %v161_v27 = vpop.xlane.xlu0 %160  ;;  %v164_v31 = vpop.xlane.xlu1 %163 }
0x1552   :  { %v165_v0 = vadd.f32 %v161_v27, %v152_v38  ;;  %v166_v19 = vadd.f32 %v164_v31, %v155_v26 }
0x1564   :  { %v171_v57 = vpop.permute.xlu0 %170 }
0x1565   :  { %v173_v42 = vadd.f32 %v171_v57, %v165_v0  ;;  %v174_v49 = vadd.f32 %v171_v57, %v166_v19 }
0x1567   :  { %v1749_v3 = vperm.slane %v173_v42, %v3012_v22  ;;  %v1750_v50 = vperm.slane %v174_v49, %v3012_v22 }
0x1569   :  { %v1751_v4 = vsel %vm1674_vm14, %v1750_v50, %v1749_v3 }
0x156a   :  { %v1753_v59 = vsel %vm1746_vm0, %v1751_v4, -1e+30 }
0x156b   :  { %v1754_v43 = vsel %vm3071_vm6, %v1753_v59, -inf }
0x156c   :  { %1755 = vmax.xlane.f32.xlu1 %v1754_v43 }
0x159d   :  { %v1771_v63 = vpop.permute.xlu1 %1770 }
0x159e   :  { %v1775_v7 = vperm.slane %v1771_v63, %v3012_v22 }
0x15a5   :  { %v1774_v32 = vpop.permute.xlu1 %1773 }
0x15a6   :  { %v1776_v46 = vperm.slane %v1774_v32, %v3012_v22 }
0x15a8   :  { %v1777_v17 = vsel %vm1674_vm14, %v1776_v46, %v1775_v7 }
0x15a9   :  { %v1779_v8 = vsel %vm1746_vm0, %v1777_v17, -1e+30 }
0x15aa   :  { %v1780_v9 = vsel %vm3072_vm7, %v1779_v8, -inf }
0x15ab   :  { %1781 = vmax.xlane.f32.xlu0 %v1780_v9 }
0x15df   :  { %v1756_v14 = vpop.xlane.xlu1 %1755 }
0x15e0   :  { %v1757_v54 = vsub.f32 %v1753_v59, %v1756_v14 }
0x15e2   :  { %v1758_v29 = vmul.f32 1.442695, %v1757_v54 }
0x15e4   :  { %2103 = vpow2.f32 %v1758_v29 }
0x15ea   :  { %v2104_v15 = vpop.eup %2103 }
0x15eb   :  { %v1760_v33 = vsel %vm3073_vm8, %v2104_v15, 0.0 }
0x15ec   :  { %1761 = vadd.xlane.f32.xlu2 %v1760_v33 }
0x161e   :  { %v1782_v16 = vpop.xlane.xlu0 %1781 }
0x161f   :  { %v1783_v13 = vsub.f32 %v1779_v8, %v1782_v16 }
0x1621   :  { %v1784_v20 = vmul.f32 1.442695, %v1783_v13 }
0x1623   :  { %2105 = vpow2.f32 %v1784_v20 }
0x1629   :  { %v2106_v39 = vpop.eup %2105 }
0x162a   :  { %v1786_v22 = vsel %vm3074_vm9, %v2106_v39, 0.0 }
0x162b   :  { %1787 = vadd.xlane.f32.xlu2 %v1786_v22 }
0x165f   :  { %v1762_v48 = vpop.xlane.xlu2 %1761 }
0x1660   :  { %2107 = vlog2.f32 %v1762_v48 }
0x1666   :  { %v2108_v62 = vpop.eup %2107 }
0x1667   :  { %v1764_v21 = vmul.f32 0.6931472, %v2108_v62 }
0x1669   :  { %v1765_v24 = vsub.f32 %v1757_v54, %v1764_v21 }
0x166b   :  { %1766 = vst.msk [vmem:[#allocation17] sm:$0x3] %vm3075_vm4, %v1765_v24 }
0x166c   :  { %1803 = dma.vmem_to_hbm [thread:$0]  %s1799_s1, 32, %s1801_s3, [#allocation8]  }
0x169e   :  { %v1788_v25 = vpop.xlane.xlu2 %1787 }
0x169f   :  { %2109 = vlog2.f32 %v1788_v25 }
0x16a5   :  { %v2110_v28 = vpop.eup %2109 }
0x16a6   :  { %v1790_v55 = vmul.f32 0.6931472, %v2110_v28 }
0x16a8   :  { %v1791_v12 = vsub.f32 %v1783_v13, %v1790_v55 }
0x16aa   :  { %1792 = vst.msk [vmem:[#allocation18] sm:$0x3] %vm3076_vm10, %v1791_v12 }
0x16ab   :  { %1814 = dma.vmem_to_hbm [thread:$0]  %s1810_s30, 32, %s1812_s13, [#allocation19]  }
0x16ac   :  { %2314 = dma.done.wait [#allocation8], 32  }
0x16ad   :  { %2315 = vsyncadd [#allocation8], 4294967264 }
0x16ae   :  { %2316 = dma.done.wait [#allocation19], 32  }
0x16af   :  { %2317 = vsyncadd [#allocation19], 4294967264 }
0x16b0   :  { %1823 = vsyncpa [#allocation7], 1 }
0x16b1   :  { %1824 = vsyncpa [#allocation10], 1 }
0x16b2   :  { %1825 = vsyncpa [#allocation13], 1 }
0x16b3   :  { %1826 = vsyncpa [#allocation16], 1 }
0x16b4   :  { %1827 = vsyncpa [#allocation8], 1 }
0x16b5   :  { %1828 = vsyncpa [#allocation19], 1 }

</bundles_post_ra>
